<compile_context>
chip_gen: v5e
topology: v5e:2x2
jax: 0.10.0
libtpu: 0.0.40
codegen_flags: <defaults>
</compile_context>

<pallas_src>
import jax
import jax.numpy as jnp
from jax.experimental import pallas as pl
from jax.experimental.pallas import tpu as pltpu

EPS = 1e-5  # PyTorch BatchNorm2d default


# --------------------------------------------------------------------------------------
# In-kernel helpers
# --------------------------------------------------------------------------------------
def _conv3x3_same(x, pad_ref, w_ref, b_ref):
    """3x3 'same' convolution of one NHWC sample as 3 accumulating im2col matmuls.

    x:       (1, H, W, Cin) float32 value (unpadded).
    pad_ref: (1, H+2, W+2, Cin) float32 VMEM scratch for the 1-pixel zero halo.
    w_ref:   (3, 3*Cin, Cout) weights in compute_dtype, row order (dy, (dx, cin)).
    b_ref:   (1, Cout) float32 conv bias.
    returns: (H*W, Cout) float32.
    """
    _, H, W, Cin = x.shape
    Hp, Wp = H + 2, W + 2
    Cout = w_ref.shape[-1]
    cdt = w_ref.dtype

    # Zero only the halo border (not the whole scratch), then write the interior.
    pad_ref[:, 0:1, :, :] = jnp.zeros((1, 1, Wp, Cin), jnp.float32)
    pad_ref[:, Hp - 1:Hp, :, :] = jnp.zeros((1, 1, Wp, Cin), jnp.float32)
    pad_ref[:, :, 0:1, :] = jnp.zeros((1, Hp, 1, Cin), jnp.float32)
    pad_ref[:, :, Wp - 1:Wp, :] = jnp.zeros((1, Hp, 1, Cin), jnp.float32)
    pad_ref[:, 1:1 + H, 1:1 + W, :] = x

    # Three dx-shifted lane-concats of the padded buffer, straight from ref slices (no
    # full-buffer load), cast once to compute_dtype: (1, Hp, W, 3*Cin).  Only these dx
    # shifts cross (8,128) tile boundaries; the dy shifts below slice the leading H axis.
    slab = jnp.concatenate(
        [pad_ref[:, :, dx:dx + W, :].astype(cdt) for dx in range(3)], axis=-1)

    # Three accumulating MXU matmuls with K = 3*Cin; f32 accumulation.
    # slab[(y,x), dx*Cin+ci] (rows dy..dy+H) * w[dy, dx*Cin+ci, co].
    acc = jnp.dot(slab[:, 0:H, :, :].reshape(H * W, 3 * Cin), w_ref[0],
                  preferred_element_type=jnp.float32)
    for dy in (1, 2):
        acc = acc + jnp.dot(slab[:, dy:dy + H, :, :].reshape(H * W, 3 * Cin), w_ref[dy],
                            preferred_element_type=jnp.float32)
    return acc + b_ref[...]


def _conv1_stats_kernel(x_ref, w1_ref, cb1_ref, a1_ref, s1_ref, ss1_ref, pad_ref):
    """Pass 1: conv1 + per-sample sum / sum-of-squares (one-pass BN1 statistics)."""
    _, H, W, Cin = x_ref.shape
    a1 = _conv3x3_same(x_ref[...], pad_ref, w1_ref, cb1_ref)      # (H*W, Cin) f32
    # Stats in f32 BEFORE the (possibly bf16) downcast of the stored intermediate.
    s1_ref[...] = jnp.sum(a1, axis=0, keepdims=True).reshape(1, 1, Cin)
    ss1_ref[...] = jnp.sum(a1 * a1, axis=0, keepdims=True).reshape(1, 1, Cin)
    a1_ref[...] = a1.reshape(1, H, W, Cin).astype(a1_ref.dtype)


def _bn1_conv2_stats_kernel(x_ref, a1_ref, sc1_ref, sh1_ref, w2_ref, cb2_ref,
                            a2_ref, s2_ref, ss2_ref, pad_ref):
    """Pass 2: BN1 (folded) + ReLU + residual, conv2, one-pass BN2 statistics."""
    _, H, W, Cin = x_ref.shape
    Cout = a2_ref.shape[-1]
    a1 = a1_ref[...].astype(jnp.float32)
    h1 = jnp.maximum(a1 * sc1_ref[...] + sh1_ref[...], 0.0) + x_ref[...]
    a2 = _conv3x3_same(h1, pad_ref, w2_ref, cb2_ref)              # (H*W, Cout) f32
    s2_ref[...] = jnp.sum(a2, axis=0, keepdims=True).reshape(1, 1, Cout)
    ss2_ref[...] = jnp.sum(a2 * a2, axis=0, keepdims=True).reshape(1, 1, Cout)
    a2_ref[...] = a2.reshape(1, H, W, Cout).astype(a2_ref.dtype)


def _bn2_pool_kernel(a2_ref, sc2_ref, sh2_ref, o_ref):
    """Pass 3: BN2 (folded) + ReLU + 2x2 max-pool."""
    _, H, W, C = a2_ref.shape
    h2 = jnp.maximum(a2_ref[...].astype(jnp.float32) * sc2_ref[...] + sh2_ref[...], 0.0)
    # Row pairs first on the cheap untiled H axis, then column pairs, so only half the
    # data goes through the sublane-splitting reshape.
    # TODO(synk): an even/odd strided column select (or pltpu.roll + select) would avoid
    # the second relayout entirely, but strided value-slices on the sublane axis are not
    # uniformly supported by Mosaic, so the proven reshape path is kept here.
    h2 = jnp.max(h2.reshape(1, H // 2, 2, W, C), axis=2)
    h2 = jnp.max(h2.reshape(1, H // 2, W // 2, 2, C), axis=3)
    o_ref[...] = h2.astype(o_ref.dtype)


# --------------------------------------------------------------------------------------
# Wrappers
# --------------------------------------------------------------------------------------
def _vmem_limit_bytes(need_bytes):
    """Per-chip VMEM limit: size to the working set, clamp to ~3/4 of physical VMEM."""
    try:
        cap = int(pltpu.get_tpu_info().vmem_capacity_bytes)
    except Exception:                     # older runtimes / CPU tracing fallbacks
        cap = 64 << 20                    # v7x physical VMEM (most restrictive)
    ceiling = max((cap * 3) // 4, 32 << 20)   # ~48 MiB on v7x, ~96 MiB on v5e/v6e
    return int(min(max(need_bytes, 32 << 20), ceiling))


def resblock_pallas_nhwc(x, params, compute_dtype=jnp.bfloat16):
    """NHWC fast path: (N, H, W, Cin) f32 -> (N, H//2, W//2, Cout) f32.

    compute_dtype selects the MXU matmul-input dtype *and* the HBM dtype of the a1/a2
    intermediates (bf16 is the right default on v5e/v6e/v7x); accumulation and all
    BatchNorm math stay in float32.
    """
    w1, cb1, g1, be1, w2, cb2, g2, be2 = params
    N, H, W, Cin = x.shape
    Cout = w2.shape[-1]
    assert H % 2 == 0 and W % 2 == 0

    f32 = jnp.float32
    cdt = jnp.dtype(compute_dtype)
    idt = cdt                              # intermediate (a1/a2) HBM storage dtype
    csz, isz = cdt.itemsize, idt.itemsize
    count = N * H * W
    hw = H * W

    # HWIO (3,3,Ci,Co) -> (3, 3*Ci, Co); row block dy, column order (dx, ci) == slab order.
    w1f = w1.reshape(3, 3 * Cin, Cin).astype(cdt)
    w2f = w2.reshape(3, 3 * Cin, Cout).astype(cdt)

    def tile_spec(c):
        return pl.BlockSpec((1, H, W, c), lambda n: (n, 0, 0, 0))

    def stat_spec(c):
        return pl.BlockSpec((1, 1, c), lambda n: (n, 0, 0))

    def full_spec(shape):
        return pl.BlockSpec(shape, lambda n: (0,) * len(shape))

    def cparams(need_bytes):
        # Batch axis is "parallel" so megacore parts split the grid; VMEM limit is sized
        # per pass (including slab temporaries) and clamped per chip.
        return pltpu.CompilerParams(
            dimension_semantics=("parallel",),
            vmem_limit_bytes=_vmem_limit_bytes(need_bytes))

    halo_b = 4 * (H + 2) * (W + 2) * Cin            # f32 halo scratch
    slab_b = (H + 2) * W * 3 * Cin * csz            # compute_dtype im2col slab

    # ---- pass 1: conv1 + BN1 statistics -------------------------------------------------
    need1 = (2 * (4 * hw * Cin + w1f.size * csz + 4 * Cin)      # double-buffered inputs
             + 2 * (isz * hw * Cin + 8 * Cin)                   # double-buffered outputs
             + halo_b + 2 * slab_b + 4 * hw * Cin               # scratch + slab temps + acc
             + (4 << 20))
    a1, s1, ss1 = pl.pallas_call(
        _conv1_stats_kernel,
        grid=(N,),
        in_specs=[tile_spec(Cin), full_spec((3, 3 * Cin, Cin)), full_spec((1, Cin))],
        out_specs=(tile_spec(Cin), stat_spec(Cin), stat_spec(Cin)),
        out_shape=(jax.ShapeDtypeStruct((N, H, W, Cin), idt),
                   jax.ShapeDtypeStruct((N, 1, Cin), f32),
                   jax.ShapeDtypeStruct((N, 1, Cin), f32)),
        scratch_shapes=[pltpu.VMEM((1, H + 2, W + 2, Cin), f32)],
        compiler_params=cparams(need1),
        cost_estimate=pl.CostEstimate(
            flops=2 * count * 9 * Cin * Cin,
            transcendentals=0,
            bytes_accessed=(4 + isz) * count * Cin + w1f.size * csz),
    )(x, w1f, cb1)

    # Fold global batch statistics into per-channel scale/shift (tiny O(C) work in XLA).
    # TODO(synk): nn.BatchNorm2d's running_mean/running_var buffer updates (training-time
    # side effect) are not produced; the forward output does not depend on them.
    def bn_fold(s, ss, gamma, beta):
        mean = jnp.sum(s, axis=0) / count                           # (1, C)
        var = jnp.maximum(jnp.sum(ss, axis=0) / count - mean * mean, 0.0)
        inv = jax.lax.rsqrt(var + EPS)
        return gamma * inv, beta - gamma * mean * inv               # scale, shift

    scale1, shift1 = bn_fold(s1, ss1, g1, be1)

    # ---- pass 2: BN1+ReLU+residual -> conv2 + BN2 statistics ----------------------------
    need2 = (2 * (4 * hw * Cin + isz * hw * Cin + 8 * Cin + w2f.size * csz + 4 * Cout)
             + 2 * (isz * hw * Cout + 8 * Cout)
             + halo_b + 2 * slab_b + 4 * hw * max(Cin, Cout)
             + (4 << 20))
    a2, s2, ss2 = pl.pallas_call(
        _bn1_conv2_stats_kernel,
        grid=(N,),
        in_specs=[tile_spec(Cin), tile_spec(Cin),
                  full_spec((1, Cin)), full_spec((1, Cin)),
                  full_spec((3, 3 * Cin, Cout)), full_spec((1, Cout))],
        out_specs=(tile_spec(Cout), stat_spec(Cout), stat_spec(Cout)),
        out_shape=(jax.ShapeDtypeStruct((N, H, W, Cout), idt),
                   jax.ShapeDtypeStruct((N, 1, Cout), f32),
                   jax.ShapeDtypeStruct((N, 1, Cout), f32)),
        scratch_shapes=[pltpu.VMEM((1, H + 2, W + 2, Cin), f32)],
        compiler_params=cparams(need2),
        cost_estimate=pl.CostEstimate(
            flops=2 * count * 9 * Cin * Cout,
            transcendentals=0,
            bytes_accessed=count * (4 * Cin + isz * Cin + isz * Cout) + w2f.size * csz),
    )(x, a1, scale1, shift1, w2f, cb2)

    scale2, shift2 = bn_fold(s2, ss2, g2, be2)

    # ---- pass 3: BN2 + ReLU + 2x2 max-pool ----------------------------------------------
    need3 = 2 * (isz * hw * Cout) + 2 * (hw * Cout) + 2 * 4 * hw * Cout + (4 << 20)
    out = pl.pallas_call(
        _bn2_pool_kernel,
        grid=(N,),
        in_specs=[tile_spec(Cout), full_spec((1, Cout)), full_spec((1, Cout))],
        out_specs=pl.BlockSpec((1, H // 2, W // 2, Cout), lambda n: (n, 0, 0, 0)),
        out_shape=jax.ShapeDtypeStruct((N, H // 2, W // 2, Cout), f32),
        compiler_params=cparams(need3),
        cost_estimate=pl.CostEstimate(
            flops=4 * count * Cout,
            transcendentals=0,
            bytes_accessed=isz * count * Cout + count * Cout),
    )(a2, scale2, shift2)

    return out


def resblock_pallas(x_nchw, params, compute_dtype=jnp.bfloat16):
    """PyTorch-layout wrapper: (N, Cin, H, W) f32 -> (N, Cout, H//2, W//2) f32.

    NOTE: each NCHW<->NHWC transpose is a full HBM relayout of the activations; callers
    that can keep activations in NHWC should call resblock_pallas_nhwc directly.
    """
    x = jnp.transpose(x_nchw, (0, 2, 3, 1))
    out = resblock_pallas_nhwc(x, params, compute_dtype=compute_dtype)
    return jnp.transpose(out, (0, 3, 1, 2))


# --------------------------------------------------------------------------------------
# Pure-JAX reference (same semantics) and test harness
# --------------------------------------------------------------------------------------
def resblock_reference(x_nchw, params):
    w1, cb1, g1, be1, w2, cb2, g2, be2 = params
    x = jnp.transpose(x_nchw, (0, 2, 3, 1))
    dn = ('NHWC', 'HWIO', 'NHWC')

    def bn_relu(a, g, b):
        m = jnp.mean(a, axis=(0, 1, 2), keepdims=True)
        v = jnp.mean((a - m) ** 2, axis=(0, 1, 2), keepdims=True)
        return jnp.maximum(g * (a - m) * jax.lax.rsqrt(v + EPS) + b, 0.0)

    a1 = jax.lax.conv_general_dilated(x, w1, (1, 1), 'SAME', dimension_numbers=dn) + cb1
    h1 = bn_relu(a1, g1, be1) + x
    a2 = jax.lax.conv_general_dilated(h1, w2, (1, 1), 'SAME', dimension_numbers=dn) + cb2
    h2 = bn_relu(a2, g2, be2)
    N, H, W, C = h2.shape
    pooled = jnp.max(h2.reshape(N, H // 2, 2, W // 2, 2, C), axis=(2, 4))
    return jnp.transpose(pooled, (0, 3, 1, 2))


def init_params(key, in_channels, out_channels):
    k = jax.random.split(key, 6)
    w1 = 0.1 * jax.random.normal(k[0], (3, 3, in_channels, in_channels), jnp.float32)
    cb1 = 0.1 * jax.random.normal(k[1], (1, in_channels), jnp.float32)
    g1 = 1.0 + 0.1 * jax.random.normal(k[2], (1, in_channels), jnp.float32)
    be1 = 0.1 * jax.random.normal(k[3], (1, in_channels), jnp.float32)
    w2 = 0.1 * jax.random.normal(k[4], (3, 3, in_channels, out_channels), jnp.float32)
    cb2 = 0.1 * jax.random.normal(k[5], (1, out_channels), jnp.float32)
    g2 = jnp.ones((1, out_channels), jnp.float32)
    be2 = jnp.zeros((1, out_channels), jnp.float32)
    return (w1, cb1, g1, be1, w2, cb2, g2, be2)


if __name__ == "__main__":
    key = jax.random.PRNGKey(0)
    kx, kp = jax.random.split(key)

    N, Cin, Cout, H, W = 2, 4, 8, 16, 16
    x = jax.random.normal(kx, (N, Cin, H, W), jnp.float32)   # NCHW, like PyTorch
    params = init_params(kp, Cin, Cout)

    resblock_jit = jax.jit(resblock_pallas, static_argnames=("compute_dtype",))
    y_ref = jax.block_until_ready(resblock_reference(x, params))

    # f32 path (f32 matmul inputs + f32 intermediates): must match the reference tightly.
    y = jax.block_until_ready(resblock_jit(x, params, compute_dtype=jnp.float32))
    assert y.shape == (N, Cout, H // 2, W // 2), y.shape
    err = float(jnp.max(jnp.abs(y - y_ref)))
    assert err < 1e-3, err

    # bf16 fast path (default; v5e/v6e/v7x MXUs are natively bf16): bf16 matmul inputs and
    # bf16 HBM intermediates with f32 accumulation / f32 BN stats -> loose sanity tolerance.
    y_bf16 = jax.block_until_ready(resblock_jit(x, params, compute_dtype=jnp.bfloat16))
    err_bf16 = float(jnp.max(jnp.abs(y_bf16 - y_ref)))
    assert err_bf16 < 2e-1, err_bf16

    print("KERNEL_OK")
</pallas_src>

<mosaic_0001>
module attributes {stable_mosaic.version = 11 : i64} {
  func.func @_conv1_stats_kernel(%arg0: i32, %arg1: memref<1x16x16x4xf32, #tpu.memory_space<vmem>>, %arg2: memref<3x12x4xf32, #tpu.memory_space<vmem>>, %arg3: memref<1x4xf32, #tpu.memory_space<vmem>>, %arg4: memref<1x16x16x4xf32, #tpu.memory_space<vmem>>, %arg5: memref<1x1x4xf32, #tpu.memory_space<vmem>>, %arg6: memref<1x1x4xf32, #tpu.memory_space<vmem>>, %arg7: memref<1x18x18x4xf32, #tpu.memory_space<vmem>>) attributes {dimension_semantics = [#tpu.dimension_semantics<parallel>], iteration_bounds = array<i64: 2>, scalar_prefetch = 0 : i64, scratch_operands = 1 : i64, tpu.core_type = #tpu.core_type<tc>, window_params = [{transform_indices = @transform_0, window_bounds = array<i64: 1, 16, 16, 4>}, {pipeline_mode = #tpu.pipeline_mode<synchronous>, transform_indices = @transform_1, window_bounds = array<i64: 3, 12, 4>}, {pipeline_mode = #tpu.pipeline_mode<synchronous>, transform_indices = @transform_2, window_bounds = array<i64: 1, 4>}, {transform_indices = @transform_3, window_bounds = array<i64: 1, 16, 16, 4>}, {transform_indices = @transform_4, window_bounds = array<i64: 1, 1, 4>}, {transform_indices = @transform_5, window_bounds = array<i64: 1, 1, 4>}]} {
    %c0 = arith.constant 0 : index
    %c0_0 = arith.constant 0 : index
    %c0_1 = arith.constant 0 : index
    %c0_2 = arith.constant 0 : index
    %0 = vector.load %arg1[%c0, %c0_0, %c0_1, %c0_2] : memref<1x16x16x4xf32, #tpu.memory_space<vmem>>, vector<1x16x16x4xf32>
    %cst = arith.constant 0.000000e+00 : f32
    %1 = vector.broadcast %cst : f32 to vector<1x1x18x4xf32>
    %c0_3 = arith.constant 0 : index
    %c0_4 = arith.constant 0 : index
    %c0_5 = arith.constant 0 : index
    %c0_6 = arith.constant 0 : index
    %2 = vector.load %arg7[%c0_3, %c0_4, %c0_5, %c0_6] : memref<1x18x18x4xf32, #tpu.memory_space<vmem>>, vector<1x1x18x4xf32>
    tpu.vector_store %arg7[%c0_3, %c0_4, %c0_5, %c0_6], %1 {strides = array<i32>} : memref<1x18x18x4xf32, #tpu.memory_space<vmem>>, vector<1x1x18x4xf32>,
    %cst_7 = arith.constant 0.000000e+00 : f32
    %3 = vector.broadcast %cst_7 : f32 to vector<1x1x18x4xf32>
    %c0_8 = arith.constant 0 : index
    %c17 = arith.constant 17 : index
    %c0_9 = arith.constant 0 : index
    %c0_10 = arith.constant 0 : index
    %4 = vector.load %arg7[%c0_8, %c17, %c0_9, %c0_10] : memref<1x18x18x4xf32, #tpu.memory_space<vmem>>, vector<1x1x18x4xf32>
    tpu.vector_store %arg7[%c0_8, %c17, %c0_9, %c0_10], %3 {strides = array<i32>} : memref<1x18x18x4xf32, #tpu.memory_space<vmem>>, vector<1x1x18x4xf32>,
    %cst_11 = arith.constant 0.000000e+00 : f32
    %5 = vector.broadcast %cst_11 : f32 to vector<1x18x1x4xf32>
    %c0_12 = arith.constant 0 : index
    %c0_13 = arith.constant 0 : index
    %c0_14 = arith.constant 0 : index
    %c0_15 = arith.constant 0 : index
    %6 = vector.load %arg7[%c0_12, %c0_13, %c0_14, %c0_15] : memref<1x18x18x4xf32, #tpu.memory_space<vmem>>, vector<1x18x1x4xf32>
    tpu.vector_store %arg7[%c0_12, %c0_13, %c0_14, %c0_15], %5 {strides = array<i32>} : memref<1x18x18x4xf32, #tpu.memory_space<vmem>>, vector<1x18x1x4xf32>,
    %cst_16 = arith.constant 0.000000e+00 : f32
    %7 = vector.broadcast %cst_16 : f32 to vector<1x18x1x4xf32>
    %c0_17 = arith.constant 0 : index
    %c0_18 = arith.constant 0 : index
    %c17_19 = arith.constant 17 : index
    %c0_20 = arith.constant 0 : index
    %8 = vector.load %arg7[%c0_17, %c0_18, %c17_19, %c0_20] : memref<1x18x18x4xf32, #tpu.memory_space<vmem>>, vector<1x18x1x4xf32>
    tpu.vector_store %arg7[%c0_17, %c0_18, %c17_19, %c0_20], %7 {strides = array<i32>} : memref<1x18x18x4xf32, #tpu.memory_space<vmem>>, vector<1x18x1x4xf32>,
    %c0_21 = arith.constant 0 : index
    %c1 = arith.constant 1 : index
    %c1_22 = arith.constant 1 : index
    %c0_23 = arith.constant 0 : index
    %9 = vector.load %arg7[%c0_21, %c1, %c1_22, %c0_23] : memref<1x18x18x4xf32, #tpu.memory_space<vmem>>, vector<1x16x16x4xf32>
    tpu.vector_store %arg7[%c0_21, %c1, %c1_22, %c0_23], %0 {strides = array<i32>} : memref<1x18x18x4xf32, #tpu.memory_space<vmem>>, vector<1x16x16x4xf32>,
    %c0_24 = arith.constant 0 : index
    %c0_25 = arith.constant 0 : index
    %c0_26 = arith.constant 0 : index
    %c0_27 = arith.constant 0 : index
    %10 = vector.load %arg7[%c0_24, %c0_25, %c0_26, %c0_27] : memref<1x18x18x4xf32, #tpu.memory_space<vmem>>, vector<1x18x16x4xf32>
    %c0_28 = arith.constant 0 : index
    %c0_29 = arith.constant 0 : index
    %c1_30 = arith.constant 1 : index
    %c0_31 = arith.constant 0 : index
    %11 = vector.load %arg7[%c0_28, %c0_29, %c1_30, %c0_31] : memref<1x18x18x4xf32, #tpu.memory_space<vmem>>, vector<1x18x16x4xf32>
    %c0_32 = arith.constant 0 : index
    %c0_33 = arith.constant 0 : index
    %c2 = arith.constant 2 : index
    %c0_34 = arith.constant 0 : index
    %12 = vector.load %arg7[%c0_32, %c0_33, %c2, %c0_34] : memref<1x18x18x4xf32, #tpu.memory_space<vmem>>, vector<1x18x16x4xf32>
    %13 = tpu.concatenate %10, %11, %12 in 3 : vector<1x18x16x4xf32>, vector<1x18x16x4xf32>, vector<1x18x16x4xf32> -> vector<1x18x16x12xf32>
    %14 = vector.extract_strided_slice %13 {offsets = [0, 0, 0, 0], sizes = [1, 16, 16, 12], strides = [1, 1, 1, 1]} : vector<1x18x16x12xf32> to vector<1x16x16x12xf32>
    %15 = vector.shape_cast %14 : vector<1x16x16x12xf32> to vector<256x12xf32>
    %c0_35 = arith.constant 0 : index
    %c0_36 = arith.constant 0 : index
    %c0_37 = arith.constant 0 : index
    %16 = vector.load %arg2[%c0_35, %c0_36, %c0_37] : memref<3x12x4xf32, #tpu.memory_space<vmem>>, vector<1x12x4xf32>
    %17 = vector.shape_cast %16 : vector<1x12x4xf32> to vector<12x4xf32>
    %cst_38 = arith.constant dense<0.000000e+00> : vector<256x4xf32>
    %18 = tpu.matmul %15, %17, %cst_38 {dimension_numbers = #tpu.dot_dimension_numbers<[1], [0], [0], [1], [0, 0, 1, 1], [], []>} : vector<256x12xf32>, vector<12x4xf32>, vector<256x4xf32> -> vector<256x4xf32>
    %19 = vector.extract_strided_slice %13 {offsets = [0, 1, 0, 0], sizes = [1, 16, 16, 12], strides = [1, 1, 1, 1]} : vector<1x18x16x12xf32> to vector<1x16x16x12xf32>
    %20 = vector.shape_cast %19 : vector<1x16x16x12xf32> to vector<256x12xf32>
    %c1_39 = arith.constant 1 : index
    %c0_40 = arith.constant 0 : index
    %c0_41 = arith.constant 0 : index
    %21 = vector.load %arg2[%c1_39, %c0_40, %c0_41] : memref<3x12x4xf32, #tpu.memory_space<vmem>>, vector<1x12x4xf32>
    %22 = vector.shape_cast %21 : vector<1x12x4xf32> to vector<12x4xf32>
    %cst_42 = arith.constant dense<0.000000e+00> : vector<256x4xf32>
    %23 = tpu.matmul %20, %22, %cst_42 {dimension_numbers = #tpu.dot_dimension_numbers<[1], [0], [0], [1], [0, 0, 1, 1], [], []>} : vector<256x12xf32>, vector<12x4xf32>, vector<256x4xf32> -> vector<256x4xf32>
    %24 = arith.addf %18, %23 : vector<256x4xf32>
    %25 = vector.extract_strided_slice %13 {offsets = [0, 2, 0, 0], sizes = [1, 16, 16, 12], strides = [1, 1, 1, 1]} : vector<1x18x16x12xf32> to vector<1x16x16x12xf32>
    %26 = vector.shape_cast %25 : vector<1x16x16x12xf32> to vector<256x12xf32>
    %c2_43 = arith.constant 2 : index
    %c0_44 = arith.constant 0 : index
    %c0_45 = arith.constant 0 : index
    %27 = vector.load %arg2[%c2_43, %c0_44, %c0_45] : memref<3x12x4xf32, #tpu.memory_space<vmem>>, vector<1x12x4xf32>
    %28 = vector.shape_cast %27 : vector<1x12x4xf32> to vector<12x4xf32>
    %cst_46 = arith.constant dense<0.000000e+00> : vector<256x4xf32>
    %29 = tpu.matmul %26, %28, %cst_46 {dimension_numbers = #tpu.dot_dimension_numbers<[1], [0], [0], [1], [0, 0, 1, 1], [], []>} : vector<256x12xf32>, vector<12x4xf32>, vector<256x4xf32> -> vector<256x4xf32>
    %30 = arith.addf %24, %29 : vector<256x4xf32>
    %c0_47 = arith.constant 0 : index
    %c0_48 = arith.constant 0 : index
    %31 = vector.load %arg3[%c0_47, %c0_48] : memref<1x4xf32, #tpu.memory_space<vmem>>, vector<1x4xf32>
    %32 = vector.broadcast %31 : vector<1x4xf32> to vector<256x4xf32>
    %33 = arith.addf %30, %32 : vector<256x4xf32>
    %cst_49 = arith.constant dense<0.000000e+00> : vector<4xf32>
    %34 = vector.multi_reduction <add>, %33, %cst_49 [0] : vector<256x4xf32> to vector<4xf32>
    %35 = vector.shape_cast %34 : vector<4xf32> to vector<1x4xf32>
    %36 = vector.shape_cast %35 : vector<1x4xf32> to vector<1x1x4xf32>
    %c0_50 = arith.constant 0 : index
    %c0_51 = arith.constant 0 : index
    %c0_52 = arith.constant 0 : index
    %37 = vector.load %arg5[%c0_50, %c0_51, %c0_52] : memref<1x1x4xf32, #tpu.memory_space<vmem>>, vector<1x1x4xf32>
    tpu.vector_store %arg5[%c0_50, %c0_51, %c0_52], %36 {strides = array<i32>} : memref<1x1x4xf32, #tpu.memory_space<vmem>>, vector<1x1x4xf32>,
    %38 = arith.mulf %33, %33 : vector<256x4xf32>
    %cst_53 = arith.constant dense<0.000000e+00> : vector<4xf32>
    %39 = vector.multi_reduction <add>, %38, %cst_53 [0] : vector<256x4xf32> to vector<4xf32>
    %40 = vector.shape_cast %39 : vector<4xf32> to vector<1x4xf32>
    %41 = vector.shape_cast %40 : vector<1x4xf32> to vector<1x1x4xf32>
    %c0_54 = arith.constant 0 : index
    %c0_55 = arith.constant 0 : index
    %c0_56 = arith.constant 0 : index
    %42 = vector.load %arg6[%c0_54, %c0_55, %c0_56] : memref<1x1x4xf32, #tpu.memory_space<vmem>>, vector<1x1x4xf32>
    tpu.vector_store %arg6[%c0_54, %c0_55, %c0_56], %41 {strides = array<i32>} : memref<1x1x4xf32, #tpu.memory_space<vmem>>, vector<1x1x4xf32>,
    %43 = vector.shape_cast %33 : vector<256x4xf32> to vector<1x16x16x4xf32>
    %c0_57 = arith.constant 0 : index
    %c0_58 = arith.constant 0 : index
    %c0_59 = arith.constant 0 : index
    %c0_60 = arith.constant 0 : index
    %44 = vector.load %arg4[%c0_57, %c0_58, %c0_59, %c0_60] : memref<1x16x16x4xf32, #tpu.memory_space<vmem>>, vector<1x16x16x4xf32>
    tpu.vector_store %arg4[%c0_57, %c0_58, %c0_59, %c0_60], %43 {strides = array<i32>} : memref<1x16x16x4xf32, #tpu.memory_space<vmem>>, vector<1x16x16x4xf32>,
    return
  }
  func.func @transform_0(%arg0: i32) -> (i32, i32, i32, i32) {
    %c0_i32 = arith.constant 0 : i32
    %c0_i32_0 = arith.constant 0 : i32
    %c0_i32_1 = arith.constant 0 : i32
    %c0_i32_2 = arith.constant 0 : i32
    return %arg0, %c0_i32, %c0_i32_0, %c0_i32_1 : i32, i32, i32, i32
  }
  func.func @transform_1(%arg0: i32) -> (i32, i32, i32) {
    %c0_i32 = arith.constant 0 : i32
    %c0_i32_0 = arith.constant 0 : i32
    %c0_i32_1 = arith.constant 0 : i32
    %c0_i32_2 = arith.constant 0 : i32
    return %c0_i32, %c0_i32_0, %c0_i32_1 : i32, i32, i32
  }
  func.func @transform_2(%arg0: i32) -> (i32, i32) {
    %c0_i32 = arith.constant 0 : i32
    %c0_i32_0 = arith.constant 0 : i32
    %c0_i32_1 = arith.constant 0 : i32
    return %c0_i32, %c0_i32_0 : i32, i32
  }
  func.func @transform_3(%arg0: i32) -> (i32, i32, i32, i32) {
    %c0_i32 = arith.constant 0 : i32
    %c0_i32_0 = arith.constant 0 : i32
    %c0_i32_1 = arith.constant 0 : i32
    %c0_i32_2 = arith.constant 0 : i32
    return %arg0, %c0_i32, %c0_i32_0, %c0_i32_1 : i32, i32, i32, i32
  }
  func.func @transform_4(%arg0: i32) -> (i32, i32, i32) {
    %c0_i32 = arith.constant 0 : i32
    %c0_i32_0 = arith.constant 0 : i32
    %c0_i32_1 = arith.constant 0 : i32
    return %arg0, %c0_i32, %c0_i32_0 : i32, i32, i32
  }
  func.func @transform_5(%arg0: i32) -> (i32, i32, i32) {
    %c0_i32 = arith.constant 0 : i32
    %c0_i32_0 = arith.constant 0 : i32
    %c0_i32_1 = arith.constant 0 : i32
    return %arg0, %c0_i32, %c0_i32_0 : i32, i32, i32
  }
}

module attributes {stable_mosaic.version = 11 : i64} {
  func.func @_bn1_conv2_stats_kernel(%arg0: i32, %arg1: memref<1x16x16x4xf32, #tpu.memory_space<vmem>>, %arg2: memref<1x16x16x4xf32, #tpu.memory_space<vmem>>, %arg3: memref<1x4xf32, #tpu.memory_space<vmem>>, %arg4: memref<1x4xf32, #tpu.memory_space<vmem>>, %arg5: memref<3x12x8xf32, #tpu.memory_space<vmem>>, %arg6: memref<1x8xf32, #tpu.memory_space<vmem>>, %arg7: memref<1x16x16x8xf32, #tpu.memory_space<vmem>>, %arg8: memref<1x1x8xf32, #tpu.memory_space<vmem>>, %arg9: memref<1x1x8xf32, #tpu.memory_space<vmem>>, %arg10: memref<1x18x18x4xf32, #tpu.memory_space<vmem>>) attributes {dimension_semantics = [#tpu.dimension_semantics<parallel>], iteration_bounds = array<i64: 2>, scalar_prefetch = 0 : i64, scratch_operands = 1 : i64, tpu.core_type = #tpu.core_type<tc>, window_params = [{transform_indices = @transform_0, window_bounds = array<i64: 1, 16, 16, 4>}, {transform_indices = @transform_1, window_bounds = array<i64: 1, 16, 16, 4>}, {pipeline_mode = #tpu.pipeline_mode<synchronous>, transform_indices = @transform_2, window_bounds = array<i64: 1, 4>}, {pipeline_mode = #tpu.pipeline_mode<synchronous>, transform_indices = @transform_3, window_bounds = array<i64: 1, 4>}, {pipeline_mode = #tpu.pipeline_mode<synchronous>, transform_indices = @transform_4, window_bounds = array<i64: 3, 12, 8>}, {pipeline_mode = #tpu.pipeline_mode<synchronous>, transform_indices = @transform_5, window_bounds = array<i64: 1, 8>}, {transform_indices = @transform_6, window_bounds = array<i64: 1, 16, 16, 8>}, {transform_indices = @transform_7, window_bounds = array<i64: 1, 1, 8>}, {transform_indices = @transform_8, window_bounds = array<i64: 1, 1, 8>}]} {
    %c0 = arith.constant 0 : index
    %c0_0 = arith.constant 0 : index
    %c0_1 = arith.constant 0 : index
    %c0_2 = arith.constant 0 : index
    %0 = vector.load %arg2[%c0, %c0_0, %c0_1, %c0_2] : memref<1x16x16x4xf32, #tpu.memory_space<vmem>>, vector<1x16x16x4xf32>
    %c0_3 = arith.constant 0 : index
    %c0_4 = arith.constant 0 : index
    %1 = vector.load %arg3[%c0_3, %c0_4] : memref<1x4xf32, #tpu.memory_space<vmem>>, vector<1x4xf32>
    %2 = vector.shape_cast %1 : vector<1x4xf32> to vector<1x1x1x4xf32>
    %3 = vector.broadcast %2 : vector<1x1x1x4xf32> to vector<1x16x16x4xf32>
    %4 = arith.mulf %0, %3 : vector<1x16x16x4xf32>
    %c0_5 = arith.constant 0 : index
    %c0_6 = arith.constant 0 : index
    %5 = vector.load %arg4[%c0_5, %c0_6] : memref<1x4xf32, #tpu.memory_space<vmem>>, vector<1x4xf32>
    %6 = vector.shape_cast %5 : vector<1x4xf32> to vector<1x1x1x4xf32>
    %7 = vector.broadcast %6 : vector<1x1x1x4xf32> to vector<1x16x16x4xf32>
    %8 = arith.addf %4, %7 : vector<1x16x16x4xf32>
    %cst = arith.constant 0.000000e+00 : f32
    %9 = vector.broadcast %cst : f32 to vector<1x16x16x4xf32>
    %10 = arith.maximumf %8, %9 : vector<1x16x16x4xf32>
    %c0_7 = arith.constant 0 : index
    %c0_8 = arith.constant 0 : index
    %c0_9 = arith.constant 0 : index
    %c0_10 = arith.constant 0 : index
    %11 = vector.load %arg1[%c0_7, %c0_8, %c0_9, %c0_10] : memref<1x16x16x4xf32, #tpu.memory_space<vmem>>, vector<1x16x16x4xf32>
    %12 = arith.addf %10, %11 : vector<1x16x16x4xf32>
    %cst_11 = arith.constant 0.000000e+00 : f32
    %13 = vector.broadcast %cst_11 : f32 to vector<1x1x18x4xf32>
    %c0_12 = arith.constant 0 : index
    %c0_13 = arith.constant 0 : index
    %c0_14 = arith.constant 0 : index
    %c0_15 = arith.constant 0 : index
    %14 = vector.load %arg10[%c0_12, %c0_13, %c0_14, %c0_15] : memref<1x18x18x4xf32, #tpu.memory_space<vmem>>, vector<1x1x18x4xf32>
    tpu.vector_store %arg10[%c0_12, %c0_13, %c0_14, %c0_15], %13 {strides = array<i32>} : memref<1x18x18x4xf32, #tpu.memory_space<vmem>>, vector<1x1x18x4xf32>,
    %cst_16 = arith.constant 0.000000e+00 : f32
    %15 = vector.broadcast %cst_16 : f32 to vector<1x1x18x4xf32>
    %c0_17 = arith.constant 0 : index
    %c17 = arith.constant 17 : index
    %c0_18 = arith.constant 0 : index
    %c0_19 = arith.constant 0 : index
    %16 = vector.load %arg10[%c0_17, %c17, %c0_18, %c0_19] : memref<1x18x18x4xf32, #tpu.memory_space<vmem>>, vector<1x1x18x4xf32>
    tpu.vector_store %arg10[%c0_17, %c17, %c0_18, %c0_19], %15 {strides = array<i32>} : memref<1x18x18x4xf32, #tpu.memory_space<vmem>>, vector<1x1x18x4xf32>,
    %cst_20 = arith.constant 0.000000e+00 : f32
    %17 = vector.broadcast %cst_20 : f32 to vector<1x18x1x4xf32>
    %c0_21 = arith.constant 0 : index
    %c0_22 = arith.constant 0 : index
    %c0_23 = arith.constant 0 : index
    %c0_24 = arith.constant 0 : index
    %18 = vector.load %arg10[%c0_21, %c0_22, %c0_23, %c0_24] : memref<1x18x18x4xf32, #tpu.memory_space<vmem>>, vector<1x18x1x4xf32>
    tpu.vector_store %arg10[%c0_21, %c0_22, %c0_23, %c0_24], %17 {strides = array<i32>} : memref<1x18x18x4xf32, #tpu.memory_space<vmem>>, vector<1x18x1x4xf32>,
    %cst_25 = arith.constant 0.000000e+00 : f32
    %19 = vector.broadcast %cst_25 : f32 to vector<1x18x1x4xf32>
    %c0_26 = arith.constant 0 : index
    %c0_27 = arith.constant 0 : index
    %c17_28 = arith.constant 17 : index
    %c0_29 = arith.constant 0 : index
    %20 = vector.load %arg10[%c0_26, %c0_27, %c17_28, %c0_29] : memref<1x18x18x4xf32, #tpu.memory_space<vmem>>, vector<1x18x1x4xf32>
    tpu.vector_store %arg10[%c0_26, %c0_27, %c17_28, %c0_29], %19 {strides = array<i32>} : memref<1x18x18x4xf32, #tpu.memory_space<vmem>>, vector<1x18x1x4xf32>,
    %c0_30 = arith.constant 0 : index
    %c1 = arith.constant 1 : index
    %c1_31 = arith.constant 1 : index
    %c0_32 = arith.constant 0 : index
    %21 = vector.load %arg10[%c0_30, %c1, %c1_31, %c0_32] : memref<1x18x18x4xf32, #tpu.memory_space<vmem>>, vector<1x16x16x4xf32>
    tpu.vector_store %arg10[%c0_30, %c1, %c1_31, %c0_32], %12 {strides = array<i32>} : memref<1x18x18x4xf32, #tpu.memory_space<vmem>>, vector<1x16x16x4xf32>,
    %c0_33 = arith.constant 0 : index
    %c0_34 = arith.constant 0 : index
    %c0_35 = arith.constant 0 : index
    %c0_36 = arith.constant 0 : index
    %22 = vector.load %arg10[%c0_33, %c0_34, %c0_35, %c0_36] : memref<1x18x18x4xf32, #tpu.memory_space<vmem>>, vector<1x18x16x4xf32>
    %c0_37 = arith.constant 0 : index
    %c0_38 = arith.constant 0 : index
    %c1_39 = arith.constant 1 : index
    %c0_40 = arith.constant 0 : index
    %23 = vector.load %arg10[%c0_37, %c0_38, %c1_39, %c0_40] : memref<1x18x18x4xf32, #tpu.memory_space<vmem>>, vector<1x18x16x4xf32>
    %c0_41 = arith.constant 0 : index
    %c0_42 = arith.constant 0 : index
    %c2 = arith.constant 2 : index
    %c0_43 = arith.constant 0 : index
    %24 = vector.load %arg10[%c0_41, %c0_42, %c2, %c0_43] : memref<1x18x18x4xf32, #tpu.memory_space<vmem>>, vector<1x18x16x4xf32>
    %25 = tpu.concatenate %22, %23, %24 in 3 : vector<1x18x16x4xf32>, vector<1x18x16x4xf32>, vector<1x18x16x4xf32> -> vector<1x18x16x12xf32>
    %26 = vector.extract_strided_slice %25 {offsets = [0, 0, 0, 0], sizes = [1, 16, 16, 12], strides = [1, 1, 1, 1]} : vector<1x18x16x12xf32> to vector<1x16x16x12xf32>
    %27 = vector.shape_cast %26 : vector<1x16x16x12xf32> to vector<256x12xf32>
    %c0_44 = arith.constant 0 : index
    %c0_45 = arith.constant 0 : index
    %c0_46 = arith.constant 0 : index
    %28 = vector.load %arg5[%c0_44, %c0_45, %c0_46] : memref<3x12x8xf32, #tpu.memory_space<vmem>>, vector<1x12x8xf32>
    %29 = vector.shape_cast %28 : vector<1x12x8xf32> to vector<12x8xf32>
    %cst_47 = arith.constant dense<0.000000e+00> : vector<256x8xf32>
    %30 = tpu.matmul %27, %29, %cst_47 {dimension_numbers = #tpu.dot_dimension_numbers<[1], [0], [0], [1], [0, 0, 1, 1], [], []>} : vector<256x12xf32>, vector<12x8xf32>, vector<256x8xf32> -> vector<256x8xf32>
    %31 = vector.extract_strided_slice %25 {offsets = [0, 1, 0, 0], sizes = [1, 16, 16, 12], strides = [1, 1, 1, 1]} : vector<1x18x16x12xf32> to vector<1x16x16x12xf32>
    %32 = vector.shape_cast %31 : vector<1x16x16x12xf32> to vector<256x12xf32>
    %c1_48 = arith.constant 1 : index
    %c0_49 = arith.constant 0 : index
    %c0_50 = arith.constant 0 : index
    %33 = vector.load %arg5[%c1_48, %c0_49, %c0_50] : memref<3x12x8xf32, #tpu.memory_space<vmem>>, vector<1x12x8xf32>
    %34 = vector.shape_cast %33 : vector<1x12x8xf32> to vector<12x8xf32>
    %cst_51 = arith.constant dense<0.000000e+00> : vector<256x8xf32>
    %35 = tpu.matmul %32, %34, %cst_51 {dimension_numbers = #tpu.dot_dimension_numbers<[1], [0], [0], [1], [0, 0, 1, 1], [], []>} : vector<256x12xf32>, vector<12x8xf32>, vector<256x8xf32> -> vector<256x8xf32>
    %36 = arith.addf %30, %35 : vector<256x8xf32>
    %37 = vector.extract_strided_slice %25 {offsets = [0, 2, 0, 0], sizes = [1, 16, 16, 12], strides = [1, 1, 1, 1]} : vector<1x18x16x12xf32> to vector<1x16x16x12xf32>
    %38 = vector.shape_cast %37 : vector<1x16x16x12xf32> to vector<256x12xf32>
    %c2_52 = arith.constant 2 : index
    %c0_53 = arith.constant 0 : index
    %c0_54 = arith.constant 0 : index
    %39 = vector.load %arg5[%c2_52, %c0_53, %c0_54] : memref<3x12x8xf32, #tpu.memory_space<vmem>>, vector<1x12x8xf32>
    %40 = vector.shape_cast %39 : vector<1x12x8xf32> to vector<12x8xf32>
    %cst_55 = arith.constant dense<0.000000e+00> : vector<256x8xf32>
    %41 = tpu.matmul %38, %40, %cst_55 {dimension_numbers = #tpu.dot_dimension_numbers<[1], [0], [0], [1], [0, 0, 1, 1], [], []>} : vector<256x12xf32>, vector<12x8xf32>, vector<256x8xf32> -> vector<256x8xf32>
    %42 = arith.addf %36, %41 : vector<256x8xf32>
    %c0_56 = arith.constant 0 : index
    %c0_57 = arith.constant 0 : index
    %43 = vector.load %arg6[%c0_56, %c0_57] : memref<1x8xf32, #tpu.memory_space<vmem>>, vector<1x8xf32>
    %44 = vector.broadcast %43 : vector<1x8xf32> to vector<256x8xf32>
    %45 = arith.addf %42, %44 : vector<256x8xf32>
    %cst_58 = arith.constant dense<0.000000e+00> : vector<8xf32>
    %46 = vector.multi_reduction <add>, %45, %cst_58 [0] : vector<256x8xf32> to vector<8xf32>
    %47 = vector.shape_cast %46 : vector<8xf32> to vector<1x8xf32>
    %48 = vector.shape_cast %47 : vector<1x8xf32> to vector<1x1x8xf32>
    %c0_59 = arith.constant 0 : index
    %c0_60 = arith.constant 0 : index
    %c0_61 = arith.constant 0 : index
    %49 = vector.load %arg8[%c0_59, %c0_60, %c0_61] : memref<1x1x8xf32, #tpu.memory_space<vmem>>, vector<1x1x8xf32>
    tpu.vector_store %arg8[%c0_59, %c0_60, %c0_61], %48 {strides = array<i32>} : memref<1x1x8xf32, #tpu.memory_space<vmem>>, vector<1x1x8xf32>,
    %50 = arith.mulf %45, %45 : vector<256x8xf32>
    %cst_62 = arith.constant dense<0.000000e+00> : vector<8xf32>
    %51 = vector.multi_reduction <add>, %50, %cst_62 [0] : vector<256x8xf32> to vector<8xf32>
    %52 = vector.shape_cast %51 : vector<8xf32> to vector<1x8xf32>
    %53 = vector.shape_cast %52 : vector<1x8xf32> to vector<1x1x8xf32>
    %c0_63 = arith.constant 0 : index
    %c0_64 = arith.constant 0 : index
    %c0_65 = arith.constant 0 : index
    %54 = vector.load %arg9[%c0_63, %c0_64, %c0_65] : memref<1x1x8xf32, #tpu.memory_space<vmem>>, vector<1x1x8xf32>
    tpu.vector_store %arg9[%c0_63, %c0_64, %c0_65], %53 {strides = array<i32>} : memref<1x1x8xf32, #tpu.memory_space<vmem>>, vector<1x1x8xf32>,
    %55 = vector.shape_cast %45 : vector<256x8xf32> to vector<1x16x16x8xf32>
    %c0_66 = arith.constant 0 : index
    %c0_67 = arith.constant 0 : index
    %c0_68 = arith.constant 0 : index
    %c0_69 = arith.constant 0 : index
    %56 = vector.load %arg7[%c0_66, %c0_67, %c0_68, %c0_69] : memref<1x16x16x8xf32, #tpu.memory_space<vmem>>, vector<1x16x16x8xf32>
    tpu.vector_store %arg7[%c0_66, %c0_67, %c0_68, %c0_69], %55 {strides = array<i32>} : memref<1x16x16x8xf32, #tpu.memory_space<vmem>>, vector<1x16x16x8xf32>,
    return
  }
  func.func @transform_0(%arg0: i32) -> (i32, i32, i32, i32) {
    %c0_i32 = arith.constant 0 : i32
    %c0_i32_0 = arith.constant 0 : i32
    %c0_i32_1 = arith.constant 0 : i32
    %c0_i32_2 = arith.constant 0 : i32
    return %arg0, %c0_i32, %c0_i32_0, %c0_i32_1 : i32, i32, i32, i32
  }
  func.func @transform_1(%arg0: i32) -> (i32, i32, i32, i32) {
    %c0_i32 = arith.constant 0 : i32
    %c0_i32_0 = arith.constant 0 : i32
    %c0_i32_1 = arith.constant 0 : i32
    %c0_i32_2 = arith.constant 0 : i32
    return %arg0, %c0_i32, %c0_i32_0, %c0_i32_1 : i32, i32, i32, i32
  }
  func.func @transform_2(%arg0: i32) -> (i32, i32) {
    %c0_i32 = arith.constant 0 : i32
    %c0_i32_0 = arith.constant 0 : i32
    %c0_i32_1 = arith.constant 0 : i32
    return %c0_i32, %c0_i32_0 : i32, i32
  }
  func.func @transform_3(%arg0: i32) -> (i32, i32) {
    %c0_i32 = arith.constant 0 : i32
    %c0_i32_0 = arith.constant 0 : i32
    %c0_i32_1 = arith.constant 0 : i32
    return %c0_i32, %c0_i32_0 : i32, i32
  }
  func.func @transform_4(%arg0: i32) -> (i32, i32, i32) {
    %c0_i32 = arith.constant 0 : i32
    %c0_i32_0 = arith.constant 0 : i32
    %c0_i32_1 = arith.constant 0 : i32
    %c0_i32_2 = arith.constant 0 : i32
    return %c0_i32, %c0_i32_0, %c0_i32_1 : i32, i32, i32
  }
  func.func @transform_5(%arg0: i32) -> (i32, i32) {
    %c0_i32 = arith.constant 0 : i32
    %c0_i32_0 = arith.constant 0 : i32
    %c0_i32_1 = arith.constant 0 : i32
    return %c0_i32, %c0_i32_0 : i32, i32
  }
  func.func @transform_6(%arg0: i32) -> (i32, i32, i32, i32) {
    %c0_i32 = arith.constant 0 : i32
    %c0_i32_0 = arith.constant 0 : i32
    %c0_i32_1 = arith.constant 0 : i32
    %c0_i32_2 = arith.constant 0 : i32
    return %arg0, %c0_i32, %c0_i32_0, %c0_i32_1 : i32, i32, i32, i32
  }
  func.func @transform_7(%arg0: i32) -> (i32, i32, i32) {
    %c0_i32 = arith.constant 0 : i32
    %c0_i32_0 = arith.constant 0 : i32
    %c0_i32_1 = arith.constant 0 : i32
    return %arg0, %c0_i32, %c0_i32_0 : i32, i32, i32
  }
  func.func @transform_8(%arg0: i32) -> (i32, i32, i32) {
    %c0_i32 = arith.constant 0 : i32
    %c0_i32_0 = arith.constant 0 : i32
    %c0_i32_1 = arith.constant 0 : i32
    return %arg0, %c0_i32, %c0_i32_0 : i32, i32, i32
  }
}

module attributes {stable_mosaic.version = 11 : i64} {
  func.func @_bn2_pool_kernel(%arg0: i32, %arg1: memref<1x16x16x8xf32, #tpu.memory_space<vmem>>, %arg2: memref<1x8xf32, #tpu.memory_space<vmem>>, %arg3: memref<1x8xf32, #tpu.memory_space<vmem>>, %arg4: memref<1x8x8x8xf32, #tpu.memory_space<vmem>>) attributes {dimension_semantics = [#tpu.dimension_semantics<parallel>], iteration_bounds = array<i64: 2>, scalar_prefetch = 0 : i64, scratch_operands = 0 : i64, tpu.core_type = #tpu.core_type<tc>, window_params = [{transform_indices = @transform_0, window_bounds = array<i64: 1, 16, 16, 8>}, {pipeline_mode = #tpu.pipeline_mode<synchronous>, transform_indices = @transform_1, window_bounds = array<i64: 1, 8>}, {pipeline_mode = #tpu.pipeline_mode<synchronous>, transform_indices = @transform_2, window_bounds = array<i64: 1, 8>}, {transform_indices = @transform_3, window_bounds = array<i64: 1, 8, 8, 8>}]} {
    %c0 = arith.constant 0 : index
    %c0_0 = arith.constant 0 : index
    %c0_1 = arith.constant 0 : index
    %c0_2 = arith.constant 0 : index
    %0 = vector.load %arg1[%c0, %c0_0, %c0_1, %c0_2] : memref<1x16x16x8xf32, #tpu.memory_space<vmem>>, vector<1x16x16x8xf32>
    %c0_3 = arith.constant 0 : index
    %c0_4 = arith.constant 0 : index
    %1 = vector.load %arg2[%c0_3, %c0_4] : memref<1x8xf32, #tpu.memory_space<vmem>>, vector<1x8xf32>
    %2 = vector.shape_cast %1 : vector<1x8xf32> to vector<1x1x1x8xf32>
    %3 = vector.broadcast %2 : vector<1x1x1x8xf32> to vector<1x16x16x8xf32>
    %4 = arith.mulf %0, %3 : vector<1x16x16x8xf32>
    %c0_5 = arith.constant 0 : index
    %c0_6 = arith.constant 0 : index
    %5 = vector.load %arg3[%c0_5, %c0_6] : memref<1x8xf32, #tpu.memory_space<vmem>>, vector<1x8xf32>
    %6 = vector.shape_cast %5 : vector<1x8xf32> to vector<1x1x1x8xf32>
    %7 = vector.broadcast %6 : vector<1x1x1x8xf32> to vector<1x16x16x8xf32>
    %8 = arith.addf %4, %7 : vector<1x16x16x8xf32>
    %cst = arith.constant 0.000000e+00 : f32
    %9 = vector.broadcast %cst : f32 to vector<1x16x16x8xf32>
    %10 = arith.maximumf %8, %9 : vector<1x16x16x8xf32>
    %11 = vector.shape_cast %10 : vector<1x16x16x8xf32> to vector<1x8x2x16x8xf32>
    %cst_7 = arith.constant dense<0xFF800000> : vector<1x8x16x8xf32>
    %12 = vector.multi_reduction <maximumf>, %11, %cst_7 [2] : vector<1x8x2x16x8xf32> to vector<1x8x16x8xf32>
    %13 = vector.shape_cast %12 : vector<1x8x16x8xf32> to vector<1x8x8x2x8xf32>
    %cst_8 = arith.constant dense<0xFF800000> : vector<1x8x8x8xf32>
    %14 = vector.multi_reduction <maximumf>, %13, %cst_8 [3] : vector<1x8x8x2x8xf32> to vector<1x8x8x8xf32>
    %c0_9 = arith.constant 0 : index
    %c0_10 = arith.constant 0 : index
    %c0_11 = arith.constant 0 : index
    %c0_12 = arith.constant 0 : index
    %15 = vector.load %arg4[%c0_9, %c0_10, %c0_11, %c0_12] : memref<1x8x8x8xf32, #tpu.memory_space<vmem>>, vector<1x8x8x8xf32>
    tpu.vector_store %arg4[%c0_9, %c0_10, %c0_11, %c0_12], %14 {strides = array<i32>} : memref<1x8x8x8xf32, #tpu.memory_space<vmem>>, vector<1x8x8x8xf32>,
    return
  }
  func.func @transform_0(%arg0: i32) -> (i32, i32, i32, i32) {
    %c0_i32 = arith.constant 0 : i32
    %c0_i32_0 = arith.constant 0 : i32
    %c0_i32_1 = arith.constant 0 : i32
    %c0_i32_2 = arith.constant 0 : i32
    return %arg0, %c0_i32, %c0_i32_0, %c0_i32_1 : i32, i32, i32, i32
  }
  func.func @transform_1(%arg0: i32) -> (i32, i32) {
    %c0_i32 = arith.constant 0 : i32
    %c0_i32_0 = arith.constant 0 : i32
    %c0_i32_1 = arith.constant 0 : i32
    return %c0_i32, %c0_i32_0 : i32, i32
  }
  func.func @transform_2(%arg0: i32) -> (i32, i32) {
    %c0_i32 = arith.constant 0 : i32
    %c0_i32_0 = arith.constant 0 : i32
    %c0_i32_1 = arith.constant 0 : i32
    return %c0_i32, %c0_i32_0 : i32, i32
  }
  func.func @transform_3(%arg0: i32) -> (i32, i32, i32, i32) {
    %c0_i32 = arith.constant 0 : i32
    %c0_i32_0 = arith.constant 0 : i32
    %c0_i32_1 = arith.constant 0 : i32
    %c0_i32_2 = arith.constant 0 : i32
    return %arg0, %c0_i32, %c0_i32_0, %c0_i32_1 : i32, i32, i32, i32
  }
}

</mosaic_0001>

<bundles_post_ra>
// kernel: resblock_pallas.5
= control target key start
LH: loop header
LB: loop body
LE: loop exit
PB: predicated region body
PF: predicated region fallthrough
CT: control target
= control target key end

     0   :  { %s1166_s12 = smov 0   ;;  %s1915_s0 = inlined_call_operand.vmem [shape: f32[2,16,16,8], index: 0, kind: input, shape index: {}]   ;;  %s1916_s1 = inlined_call_operand.vmem [shape: f32[1,8], index: 1, kind: input, shape index: {}]   ;;  %s1917_s2 = inlined_call_operand.vmem [shape: f32[1,8], index: 2, kind: input, shape index: {}]   ;;  %s1918_s3 = inlined_call_operand.vmem [shape: f32[2,8,8,8], index: 3, kind: output, shape index: {}]  }
   0x1 LB: > { %s1115_s13 = sadd.s32 4294967295, %s1144_s12   ;;  %p1119_p0 = scmp.ge.s32.totalorder %s1144_s12, 1  ;;  %s1144_s12 = sphi %s1166_s12, %s13_s12  }
   0x2   : > { %p137_p1 = scmp.lt.s32.totalorder %s1144_s12, 3 }
   0x4   : > { %p138_p2 = pnand %p1119_p0, %p137_p1 }
   0x6   : > { %141 = sbr.rel (%p138_p2) target bundleno = 195 (0xc3), region = 32 }
   0xb   : > { %p161_p3 = scmp.lt.s32.totalorder %s1115_s13, 1  ;;  %v1179_v0 = vld [vmem:[%s1916_s1] ss:$0 sm:$0xff]  ;;  %vm307_vm0 = vcmask 64512   ;;  %vm468_vm1 = vcmask 58368   ;;  %vm981_vm2 = vcmask 1041409  }
   0xc   : > { %v1190_v1 = vld [vmem:[%s1917_s2] ss:$0 sm:$0xff]  ;;  %vm983_vm3 = vcmask 1042434   ;;  %vm985_vm4 = vcmask 1043459   ;;  %vm987_vm5 = vcmask 1044484   ;;  %vm989_vm6 = vcmask 1045509  }
   0xd   : > { %s2004_s13 = smov (!%p161_p3, %s1115_s13), 1  ;;  %vm991_vm7 = vcmask 1046534   ;;  %vm993_vm8 = vcmask 1047559  }
   0xe   : > { %s1126_s16 = sshll.u32 %s2004_s13, 8  ;;  %s1127_s22 = sshll.u32 %s2004_s13, 6 }
   0xf   : > { %s1185_s19 = scalar_lea.vmem %s1915_s0, %s1126_s16  ;;  %s1810_s25 = scalar_lea.vmem %s1918_s3, %s1127_s22 }
  0x10   : > { %v171_v2 = vld [vmem:[%s1185_s19] sm:$0xff]  ;;  %v172_v3 = vld [vmem:[%s1185_s19 + $0x8] sm:$0xff]  ;;  %v173_v4 = vld [vmem:[%s1185_s19 + $0x10] sm:$0xff] }
  0x11   : > { %v174_v5 = vld [vmem:[%s1185_s19 + $0x18] sm:$0xff]  ;;  %v175_v6 = vld [vmem:[%s1185_s19 + $0x20] sm:$0xff]  ;;  %v176_v7 = vld [vmem:[%s1185_s19 + $0x28] sm:$0xff]  ;;  %v207_v8 = vmul.f32 %v1179_v0, %v171_v2  ;;  %v208_v9 = vmul.f32 %v1179_v0, %v172_v3  ;;  %v209_v13 = vmul.f32 %v1179_v0, %v173_v4 }
  0x12   : > { %v177_v10 = vld [vmem:[%s1185_s19 + $0x30] sm:$0xff]  ;;  %v178_v11 = vld [vmem:[%s1185_s19 + $0x38] sm:$0xff]  ;;  %v179_v12 = vld [vmem:[%s1185_s19 + $0x40] sm:$0xff]  ;;  %v210_v14 = vmul.f32 %v1179_v0, %v174_v5  ;;  %v211_v15 = vmul.f32 %v1179_v0, %v175_v6  ;;  %v212_v19 = vmul.f32 %v1179_v0, %v176_v7 }
  0x13   : > { %v180_v16 = vld [vmem:[%s1185_s19 + $0x48] sm:$0xff]  ;;  %v181_v17 = vld [vmem:[%s1185_s19 + $0x50] sm:$0xff]  ;;  %v182_v18 = vld [vmem:[%s1185_s19 + $0x58] sm:$0xff]  ;;  %v213_v20 = vmul.f32 %v1179_v0, %v177_v10  ;;  %v214_v21 = vmul.f32 %v1179_v0, %v178_v11  ;;  %v215_v22 = vmul.f32 %v1179_v0, %v179_v12  ;;  %v1220_v29 = vadd.f32 %v1190_v1, %v207_v8 }
  0x14   : > { %v183_v23 = vld [vmem:[%s1185_s19 + $0x60] sm:$0xff]  ;;  %v184_v24 = vld [vmem:[%s1185_s19 + $0x68] sm:$0xff]  ;;  %v185_v25 = vld [vmem:[%s1185_s19 + $0x70] sm:$0xff]  ;;  %v216_v26 = vmul.f32 %v1179_v0, %v180_v16  ;;  %v217_v27 = vmul.f32 %v1179_v0, %v181_v17  ;;  %v218_v28 = vmul.f32 %v1179_v0, %v182_v18  ;;  %v1229_v36 = vadd.f32 %v1190_v1, %v208_v9 }
  0x15   : > { %v186_v30 = vld [vmem:[%s1185_s19 + $0x78] sm:$0xff]  ;;  %v187_v31 = vld [vmem:[%s1185_s19 + $0x80] sm:$0xff]  ;;  %v188_v32 = vld [vmem:[%s1185_s19 + $0x88] sm:$0xff]  ;;  %v219_v33 = vmul.f32 %v1179_v0, %v183_v23  ;;  %v220_v34 = vmul.f32 %v1179_v0, %v184_v24  ;;  %v221_v35 = vmul.f32 %v1179_v0, %v185_v25  ;;  %v1238_v43 = vadd.f32 %v1190_v1, %v209_v13 }
  0x16   : > { %v189_v37 = vld [vmem:[%s1185_s19 + $0x90] sm:$0xff]  ;;  %v190_v38 = vld [vmem:[%s1185_s19 + $0x98] sm:$0xff]  ;;  %v191_v39 = vld [vmem:[%s1185_s19 + $0xa0] sm:$0xff]  ;;  %v222_v40 = vmul.f32 %v1179_v0, %v186_v30  ;;  %v223_v41 = vmul.f32 %v1179_v0, %v187_v31  ;;  %v224_v42 = vmul.f32 %v1179_v0, %v188_v32  ;;  %v1247_v50 = vadd.f32 %v1190_v1, %v210_v14 }
  0x17   : > { %v192_v44 = vld [vmem:[%s1185_s19 + $0xa8] sm:$0xff]  ;;  %v193_v45 = vld [vmem:[%s1185_s19 + $0xb0] sm:$0xff]  ;;  %v194_v46 = vld [vmem:[%s1185_s19 + $0xb8] sm:$0xff]  ;;  %v225_v47 = vmul.f32 %v1179_v0, %v189_v37  ;;  %v226_v48 = vmul.f32 %v1179_v0, %v190_v38  ;;  %v227_v49 = vmul.f32 %v1179_v0, %v191_v39  ;;  %v1256_v57 = vadd.f32 %v1190_v1, %v211_v15 }
  0x18   : > { %v195_v51 = vld [vmem:[%s1185_s19 + $0xc0] sm:$0xff]  ;;  %v196_v52 = vld [vmem:[%s1185_s19 + $0xc8] sm:$0xff]  ;;  %v197_v53 = vld [vmem:[%s1185_s19 + $0xd0] sm:$0xff]  ;;  %v228_v54 = vmul.f32 %v1179_v0, %v192_v44  ;;  %v229_v55 = vmul.f32 %v1179_v0, %v193_v45  ;;  %v230_v56 = vmul.f32 %v1179_v0, %v194_v46  ;;  %v1265_v2 = vadd.f32 %v1190_v1, %v212_v19 }
  0x19   : > { %v198_v58 = vld [vmem:[%s1185_s19 + $0xd8] sm:$0xff]  ;;  %v199_v59 = vld [vmem:[%s1185_s19 + $0xe0] sm:$0xff]  ;;  %v200_v60 = vld [vmem:[%s1185_s19 + $0xe8] sm:$0xff]  ;;  %v231_v61 = vmul.f32 %v1179_v0, %v195_v51  ;;  %v232_v62 = vmul.f32 %v1179_v0, %v196_v52  ;;  %v233_v63 = vmul.f32 %v1179_v0, %v197_v53  ;;  %v1273_v8 = vadd.f32 %v1190_v1, %v213_v20 }
  0x1a   : > { %v201_v3 = vld [vmem:[%s1185_s19 + $0xf0] sm:$0xff]  ;;  %v202_v4 = vld [vmem:[%s1185_s19 + $0xf8] sm:$0xff]  ;;  %v234_v5 = vmul.f32 %v1179_v0, %v198_v58  ;;  %v235_v6 = vmul.f32 %v1179_v0, %v199_v59  ;;  %v236_v7 = vmul.f32 %v1179_v0, %v200_v60  ;;  %v1278_v11 = vadd.f32 %v1190_v1, %v214_v21 }
  0x1b   : > { %v237_v9 = vmul.f32 %v1179_v0, %v201_v3  ;;  %v238_v10 = vmul.f32 %v1179_v0, %v202_v4  ;;  %v1281_v12 = vadd.f32 %v1190_v1, %v215_v22  ;;  %v1284_v13 = vadd.f32 %v1190_v1, %v216_v26 }
  0x1c   : > { %v1287_v14 = vadd.f32 %v1190_v1, %v217_v27  ;;  %v1290_v15 = vadd.f32 %v1190_v1, %v218_v28  ;;  %v1293_v16 = vadd.f32 %v1190_v1, %v219_v33  ;;  %v1296_v0 = vadd.f32 %v1190_v1, %v220_v34 }
  0x1d   : > { %v1299_v17 = vadd.f32 %v1190_v1, %v221_v35  ;;  %v1302_v18 = vadd.f32 %v1190_v1, %v222_v40  ;;  %v1305_v19 = vadd.f32 %v1190_v1, %v223_v41  ;;  %v1308_v20 = vadd.f32 %v1190_v1, %v224_v42 }
  0x1e   : > { %v1311_v21 = vadd.f32 %v1190_v1, %v225_v47  ;;  %v1314_v22 = vadd.f32 %v1190_v1, %v226_v48  ;;  %v1317_v23 = vadd.f32 %v1190_v1, %v227_v49  ;;  %v1320_v24 = vadd.f32 %v1190_v1, %v228_v54 }
  0x1f   : > { %v1323_v25 = vadd.f32 %v1190_v1, %v229_v55  ;;  %v1326_v26 = vadd.f32 %v1190_v1, %v230_v56  ;;  %v1329_v27 = vadd.f32 %v1190_v1, %v231_v61  ;;  %v1332_v28 = vadd.f32 %v1190_v1, %v232_v62 }
  0x20   : > { %v1335_v30 = vadd.f32 %v1190_v1, %v233_v63  ;;  %v1338_v31 = vadd.f32 %v1190_v1, %v234_v5  ;;  %v1341_v32 = vadd.f32 %v1190_v1, %v235_v6  ;;  %v1344_v33 = vadd.f32 %v1190_v1, %v236_v7 }
  0x21   : > { %v1347_v34 = vadd.f32 %v1190_v1, %v237_v9  ;;  %v1350_v35 = vadd.f32 %v1190_v1, %v238_v10  ;;  %v275_v37 = vmax.f32 %v1220_v29, 0.0  ;;  %v276_v38 = vmax.f32 %v1229_v36, 0.0 }
  0x22   : > { %v277_v39 = vmax.f32 %v1238_v43, 0.0  ;;  %v278_v40 = vmax.f32 %v1247_v50, 0.0  ;;  %v279_v41 = vmax.f32 %v1256_v57, 0.0  ;;  %v280_v42 = vmax.f32 %v1265_v2, 0.0 }
  0x23   : > { %v281_v44 = vmax.f32 %v1273_v8, 0.0  ;;  %v282_v45 = vmax.f32 %v1278_v11, 0.0  ;;  %v283_v46 = vmax.f32 %v1281_v12, 0.0  ;;  %v284_v1 = vmax.f32 %v1284_v13, 0.0 }
  0x24   : > { %v285_v29 = vmax.f32 %v1287_v14, 0.0  ;;  %v286_v36 = vmax.f32 %v1290_v15, 0.0  ;;  %v287_v43 = vmax.f32 %v1293_v16, 0.0  ;;  %v288_v47 = vmax.f32 %v1296_v0, 0.0 }
  0x25   : > { %v289_v48 = vmax.f32 %v1299_v17, 0.0  ;;  %v290_v49 = vmax.f32 %v1302_v18, 0.0  ;;  %v291_v50 = vmax.f32 %v1305_v19, 0.0  ;;  %v292_v51 = vmax.f32 %v1308_v20, 0.0 }
  0x26   : > { %v293_v52 = vmax.f32 %v1311_v21, 0.0  ;;  %v294_v53 = vmax.f32 %v1314_v22, 0.0  ;;  %v295_v54 = vmax.f32 %v1317_v23, 0.0  ;;  %v296_v55 = vmax.f32 %v1320_v24, 0.0 }
  0x27   : > { %v297_v56 = vmax.f32 %v1323_v25, 0.0  ;;  %v298_v57 = vmax.f32 %v1326_v26, 0.0  ;;  %v299_v58 = vmax.f32 %v1329_v27, 0.0  ;;  %v300_v59 = vmax.f32 %v1332_v28, 0.0 }
  0x28   : > { %v301_v60 = vmax.f32 %v1335_v30, 0.0  ;;  %v302_v61 = vmax.f32 %v1338_v31, 0.0  ;;  %v303_v62 = vmax.f32 %v1341_v32, 0.0  ;;  %v304_v63 = vmax.f32 %v1344_v33, 0.0 }
  0x29   : > { %v305_v2 = vmax.f32 %v1347_v34, 0.0  ;;  %v308_v3 = vsel %vm307_vm0, %v275_v37, -inf  ;;  %v309_v4 = vsel %vm307_vm0, %v277_v39, -inf  ;;  %v306_v5 = vmax.f32 %v1350_v35, 0.0 }
  0x2a   : > { %v311_v6 = vsel %vm307_vm0, %v276_v38, -inf  ;;  %v312_v7 = vsel %vm307_vm0, %v278_v40, -inf  ;;  %v314_v8 = vsel %vm307_vm0, %v279_v41, -inf  ;;  %v1389_v9 = vmax.f32 %v308_v3, %v309_v4 }
  0x2b   : > { %v315_v10 = vsel %vm307_vm0, %v281_v44, -inf  ;;  %v317_v11 = vsel %vm307_vm0, %v280_v42, -inf  ;;  %v318_v12 = vsel %vm307_vm0, %v282_v45, -inf  ;;  %v1394_v13 = vmax.f32 %v311_v6, %v312_v7 }
  0x2c   : > { %v1396_v14 = vmax.f32 %v314_v8, %v315_v10  ;;  %v320_v15 = vsel %vm307_vm0, %v283_v46, -inf  ;;  %v321_v16 = vsel %vm307_vm0, %v285_v29, -inf  ;;  %v1400_v0 = vmax.f32 %v317_v11, %v318_v12 }
  0x2d   : > { %v323_v17 = vsel %vm307_vm0, %v284_v1, -inf  ;;  %v324_v18 = vsel %vm307_vm0, %v286_v36, -inf  ;;  %v326_v19 = vsel %vm307_vm0, %v287_v43, -inf  ;;  %v1405_v20 = vmax.f32 %v320_v15, %v321_v16 }
  0x2e   : > { %v327_v21 = vsel %vm307_vm0, %v289_v48, -inf  ;;  %v329_v22 = vsel %vm307_vm0, %v288_v47, -inf  ;;  %v330_v23 = vsel %vm307_vm0, %v290_v49, -inf  ;;  %v1410_v24 = vmax.f32 %v323_v17, %v324_v18 }
  0x2f   : > { %v1412_v25 = vmax.f32 %v326_v19, %v327_v21  ;;  %v332_v26 = vsel %vm307_vm0, %v291_v50, -inf  ;;  %v333_v27 = vsel %vm307_vm0, %v293_v52, -inf  ;;  %v1416_v28 = vmax.f32 %v329_v22, %v330_v23 }
  0x30   : > { %v335_v30 = vsel %vm307_vm0, %v292_v51, -inf  ;;  %v336_v31 = vsel %vm307_vm0, %v294_v53, -inf  ;;  %v338_v32 = vsel %vm307_vm0, %v295_v54, -inf  ;;  %v1421_v33 = vmax.f32 %v332_v26, %v333_v27 }
  0x31   : > { %v339_v34 = vsel %vm307_vm0, %v297_v56, -inf  ;;  %v341_v35 = vsel %vm307_vm0, %v296_v55, -inf  ;;  %v342_v37 = vsel %vm307_vm0, %v298_v57, -inf  ;;  %v1426_v38 = vmax.f32 %v335_v30, %v336_v31 }
  0x32   : > { %v1428_v39 = vmax.f32 %v338_v32, %v339_v34  ;;  %v344_v40 = vsel %vm307_vm0, %v299_v58, -inf  ;;  %v345_v41 = vsel %vm307_vm0, %v301_v60, -inf  ;;  %v1432_v42 = vmax.f32 %v341_v35, %v342_v37 }
  0x33   : > { %v347_v44 = vsel %vm307_vm0, %v300_v59, -inf  ;;  %v348_v45 = vsel %vm307_vm0, %v302_v61, -inf  ;;  %v350_v46 = vsel %vm307_vm0, %v303_v62, -inf  ;;  %v1437_v1 = vmax.f32 %v344_v40, %v345_v41 }
  0x34   : > { %v351_v29 = vsel %vm307_vm0, %v305_v2, -inf  ;;  %v353_v36 = vsel %vm307_vm0, %v304_v63, -inf  ;;  %v354_v43 = vsel %vm307_vm0, %v306_v5, -inf  ;;  %v1442_v47 = vmax.f32 %v347_v44, %v348_v45 }
  0x35   : > { %v1444_v48 = vmax.f32 %v350_v46, %v351_v29  ;;  %v1446_v49 = vmax.f32 %v353_v36, %v354_v43  ;;  %v372_v50 = vrot.slane %v1389_v9, 2  ;;  %v373_v51 = vrot.slane %v1389_v9, 4 }
  0x36   : > { %v374_v52 = vrot.slane %v1389_v9, 6  ;;  %v375_v53 = vrot.slane %v1394_v13, 2  ;;  %v376_v54 = vrot.slane %v1394_v13, 4  ;;  %v377_v55 = vrot.slane %v1394_v13, 6 }
  0x37   : > { %v378_v56 = vrot.slane %v1396_v14, 2  ;;  %v379_v57 = vrot.slane %v1396_v14, 4  ;;  %v380_v58 = vrot.slane %v1396_v14, 6  ;;  %v381_v59 = vrot.slane %v1400_v0, 2 }
  0x38   : > { %v382_v60 = vrot.slane %v1400_v0, 4  ;;  %v383_v61 = vrot.slane %v1400_v0, 6  ;;  %v384_v62 = vrot.slane %v1405_v20, 2  ;;  %v385_v63 = vrot.slane %v1405_v20, 4 }
  0x39   : > { %v386_v2 = vrot.slane %v1405_v20, 6  ;;  %v387_v3 = vrot.slane %v1410_v24, 2  ;;  %v388_v4 = vrot.slane %v1410_v24, 4  ;;  %v389_v5 = vrot.slane %v1410_v24, 6 }
  0x3a   : > { %v390_v6 = vrot.slane %v1412_v25, 2  ;;  %v391_v7 = vrot.slane %v1412_v25, 4  ;;  %v469_v37 = vsel %vm468_vm1, %v1389_v9, -inf  ;;  %v476_v40 = vsel %vm468_vm1, %v372_v50, -inf }
  0x3b   : > { %v483_v41 = vsel %vm468_vm1, %v373_v51, -inf  ;;  %v490_v44 = vsel %vm468_vm1, %v374_v52, -inf  ;;  %v470_v35 = vrot.slane %v469_v37, 4  ;;  %v477_v45 = vrot.slane %v476_v40, 4 }
  0x3c   : > { %v484_v34 = vrot.slane %v483_v41, 4  ;;  %v491_v46 = vrot.slane %v490_v44, 4  ;;  %v497_v29 = vsel %vm468_vm1, %v1394_v13, -inf  ;;  %v504_v36 = vsel %vm468_vm1, %v375_v53, -inf }
  0x3d   : > { %v511_v43 = vsel %vm468_vm1, %v376_v54, -inf  ;;  %v518_v32 = vsel %vm468_vm1, %v377_v55, -inf  ;;  %v471_v9 = vmax.f32 %v469_v37, %v470_v35  ;;  %v478_v31 = vmax.f32 %v476_v40, %v477_v45 }
  0x3e   : > { %v485_v50 = vmax.f32 %v483_v41, %v484_v34  ;;  %v492_v30 = vmax.f32 %v490_v44, %v491_v46  ;;  %v498_v51 = vrot.slane %v497_v29, 4  ;;  %v505_v27 = vrot.slane %v504_v36, 4 }
  0x3f   : > { %v512_v52 = vrot.slane %v511_v43, 4  ;;  %v519_v26 = vrot.slane %v518_v32, 4  ;;  %v472_v23 = vrot.slane %v471_v9, 2  ;;  %v479_v22 = vrot.slane %v478_v31, 2 }
  0x40   : > { %v486_v21 = vrot.slane %v485_v50, 2  ;;  %v493_v19 = vrot.slane %v492_v30, 2  ;;  %v499_v18 = vmax.f32 %v497_v29, %v498_v51  ;;  %v506_v13 = vmax.f32 %v504_v36, %v505_v27 }
  0x41   : > { %v513_v17 = vmax.f32 %v511_v43, %v512_v52  ;;  %v520_v53 = vmax.f32 %v518_v32, %v519_v26  ;;  %v473_v16 = vmax.f32 %v471_v9, %v472_v23  ;;  %v480_v54 = vmax.f32 %v478_v31, %v479_v22 }
  0x42   : > { %v487_v15 = vmax.f32 %v485_v50, %v486_v21  ;;  %v494_v55 = vmax.f32 %v492_v30, %v493_v19  ;;  %v500_v35 = vrot.slane %v499_v18, 2  ;;  %v507_v37 = vrot.slane %v506_v13, 2 }
  0x43   : > { %v514_v34 = vrot.slane %v513_v17, 2  ;;  %v521_v40 = vrot.slane %v520_v53, 2  ;;  %v474_v41 = vrot.slane %v473_v16, 1  ;;  %v481_v44 = vrot.slane %v480_v54, 1 }
  0x44   : > { %v488_v45 = vrot.slane %v487_v15, 1  ;;  %v495_v46 = vrot.slane %v494_v55, 1  ;;  %v501_v12 = vmax.f32 %v499_v18, %v500_v35  ;;  %v508_v11 = vmax.f32 %v506_v13, %v507_v37 }
  0x45   : > { %v515_v10 = vmax.f32 %v513_v17, %v514_v34  ;;  %v522_v8 = vmax.f32 %v520_v53, %v521_v40  ;;  %v1506_v29 = vmax.f32 %v473_v16, %v474_v41  ;;  %v1508_v27 = vmax.f32 %v480_v54, %v481_v44 }
  0x46   : > { %v1510_v23 = vmax.f32 %v487_v15, %v488_v45  ;;  %v1512_v21 = vmax.f32 %v494_v55, %v495_v46  ;;  %v502_v19 = vrot.slane %v501_v12, 1  ;;  %v509_v22 = vrot.slane %v508_v11, 1 }
  0x47   : > { %v516_v26 = vrot.slane %v515_v10, 1  ;;  %v523_v30 = vrot.slane %v522_v8, 1  ;;  %v525_v31 = vsel %vm468_vm1, %v1396_v14, -inf  ;;  %v532_v17 = vsel %vm468_vm1, %v378_v56, -inf }
  0x48   : > { %v539_v16 = vsel %vm468_vm1, %v379_v57, -inf  ;;  %v546_v15 = vsel %vm468_vm1, %v380_v58, -inf  ;;  %v1525_v18 = vmax.f32 %v501_v12, %v502_v19  ;;  %v1527_v32 = vmax.f32 %v508_v11, %v509_v22 }
  0x49   : > { %v1529_v36 = vmax.f32 %v515_v10, %v516_v26  ;;  %v1531_v43 = vmax.f32 %v522_v8, %v523_v30  ;;  %v526_v9 = vrot.slane %v525_v31, 4  ;;  %v533_v50 = vrot.slane %v532_v17, 4 }
  0x4a   : > { %v540_v51 = vrot.slane %v539_v16, 4  ;;  %v547_v56 = vrot.slane %v546_v15, 4  ;;  %v553_v52 = vsel %vm468_vm1, %v1400_v0, -inf  ;;  %v560_v14 = vsel %vm468_vm1, %v381_v59, -inf }
  0x4b   : > { %1919 = vst [vmem:[#allocation2_spill] sm:$0xff] %v1531_v43  ;;  %v567_v57 = vsel %vm468_vm1, %v382_v60, -inf  ;;  %v574_v58 = vsel %vm468_vm1, %v383_v61, -inf  ;;  %v527_v8 = vmax.f32 %v525_v31, %v526_v9  ;;  %v534_v10 = vmax.f32 %v532_v17, %v533_v50 }
  0x4c   : > { %v541_v11 = vmax.f32 %v539_v16, %v540_v51  ;;  %v548_v12 = vmax.f32 %v546_v15, %v547_v56  ;;  %v554_v13 = vrot.slane %v553_v52, 4  ;;  %v561_v53 = vrot.slane %v560_v14, 4 }
  0x4d   : > { %v568_v54 = vrot.slane %v567_v57, 4  ;;  %v575_v55 = vrot.slane %v574_v58, 4  ;;  %v528_v35 = vrot.slane %v527_v8, 2  ;;  %v535_v37 = vrot.slane %v534_v10, 2 }
  0x4e   : > { %v542_v34 = vrot.slane %v541_v11, 2  ;;  %v549_v59 = vrot.slane %v548_v12, 2  ;;  %v555_v40 = vmax.f32 %v553_v52, %v554_v13  ;;  %v562_v41 = vmax.f32 %v560_v14, %v561_v53 }
  0x4f   : > { %v569_v44 = vmax.f32 %v567_v57, %v568_v54  ;;  %v576_v60 = vmax.f32 %v574_v58, %v575_v55  ;;  %v529_v45 = vmax.f32 %v527_v8, %v528_v35  ;;  %v536_v0 = vmax.f32 %v534_v10, %v535_v37 }
  0x50   : > { %v543_v46 = vmax.f32 %v541_v11, %v542_v34  ;;  %v550_v61 = vmax.f32 %v548_v12, %v549_v59  ;;  %v556_v19 = vrot.slane %v555_v40, 2  ;;  %v563_v22 = vrot.slane %v562_v41, 2 }
  0x51   : > { %v570_v26 = vrot.slane %v569_v44, 2  ;;  %v577_v30 = vrot.slane %v576_v60, 2  ;;  %v530_v31 = vrot.slane %v529_v45, 1  ;;  %v537_v17 = vrot.slane %v536_v0, 1 }
  0x52   : > { %v544_v16 = vrot.slane %v543_v46, 1  ;;  %v551_v15 = vrot.slane %v550_v61, 1  ;;  %v557_v9 = vmax.f32 %v555_v40, %v556_v19  ;;  %v564_v50 = vmax.f32 %v562_v41, %v563_v22 }
  0x53   : > { %v571_v51 = vmax.f32 %v569_v44, %v570_v26  ;;  %v578_v56 = vmax.f32 %v576_v60, %v577_v30  ;;  %v1544_v52 = vmax.f32 %v529_v45, %v530_v31  ;;  %v1546_v14 = vmax.f32 %v536_v0, %v537_v17 }
  0x54   : > { %v1548_v57 = vmax.f32 %v543_v46, %v544_v16  ;;  %v1550_v58 = vmax.f32 %v550_v61, %v551_v15  ;;  %v558_v8 = vrot.slane %v557_v9, 1  ;;  %v565_v10 = vrot.slane %v564_v50, 1 }
  0x55   : > { %v572_v11 = vrot.slane %v571_v51, 1  ;;  %v579_v12 = vrot.slane %v578_v56, 1  ;;  %v581_v13 = vsel %vm468_vm1, %v1405_v20, -inf  ;;  %v588_v53 = vsel %vm468_vm1, %v384_v62, -inf }
  0x56   : > { %v595_v54 = vsel %vm468_vm1, %v385_v63, -inf  ;;  %v602_v55 = vsel %vm468_vm1, %v386_v2, -inf  ;;  %v1563_v35 = vmax.f32 %v557_v9, %v558_v8  ;;  %v1565_v37 = vmax.f32 %v564_v50, %v565_v10 }
  0x57   : > { %v1567_v34 = vmax.f32 %v571_v51, %v572_v11  ;;  %v1569_v59 = vmax.f32 %v578_v56, %v579_v12  ;;  %v582_v40 = vrot.slane %v581_v13, 4  ;;  %v589_v41 = vrot.slane %v588_v53, 4 }
  0x58   : > { %1920 = vst [vmem:[#allocation3_spill] sm:$0xff] %v1565_v37  ;;  %v596_v44 = vrot.slane %v595_v54, 4  ;;  %v603_v62 = vrot.slane %v602_v55, 4  ;;  %v609_v60 = vsel %vm468_vm1, %v1410_v24, -inf  ;;  %v616_v20 = vsel %vm468_vm1, %v387_v3, -inf }
  0x59   : > { %1921 = vst [vmem:[#allocation4_spill] sm:$0xff] %v1567_v34  ;;  %v623_v63 = vsel %vm468_vm1, %v388_v4, -inf  ;;  %v630_v2 = vsel %vm468_vm1, %v389_v5, -inf  ;;  %v583_v45 = vmax.f32 %v581_v13, %v582_v40  ;;  %v590_v0 = vmax.f32 %v588_v53, %v589_v41 }
  0x5a   : > { %1922 = vst [vmem:[#allocation5_spill] sm:$0xff] %v1569_v59  ;;  %v597_v46 = vmax.f32 %v595_v54, %v596_v44  ;;  %v604_v61 = vmax.f32 %v602_v55, %v603_v62  ;;  %v610_v19 = vrot.slane %v609_v60, 4  ;;  %v617_v22 = vrot.slane %v616_v20, 4 }
  0x5b   : > { %v624_v26 = vrot.slane %v623_v63, 4  ;;  %v631_v30 = vrot.slane %v630_v2, 4  ;;  %v584_v31 = vrot.slane %v583_v45, 2  ;;  %v591_v17 = vrot.slane %v590_v0, 2 }
  0x5c   : > { %v598_v16 = vrot.slane %v597_v46, 2  ;;  %v605_v3 = vrot.slane %v604_v61, 2  ;;  %v611_v15 = vmax.f32 %v609_v60, %v610_v19  ;;  %v618_v9 = vmax.f32 %v616_v20, %v617_v22 }
  0x5d   : > { %v625_v50 = vmax.f32 %v623_v63, %v624_v26  ;;  %v632_v4 = vmax.f32 %v630_v2, %v631_v30  ;;  %v585_v51 = vmax.f32 %v583_v45, %v584_v31  ;;  %v592_v24 = vmax.f32 %v590_v0, %v591_v17 }
  0x5e   : > { %v599_v56 = vmax.f32 %v597_v46, %v598_v16  ;;  %v606_v5 = vmax.f32 %v604_v61, %v605_v3  ;;  %v612_v8 = vrot.slane %v611_v15, 2  ;;  %v619_v10 = vrot.slane %v618_v9, 2 }
  0x5f   : > { %v626_v11 = vrot.slane %v625_v50, 2  ;;  %v633_v12 = vrot.slane %v632_v4, 2  ;;  %v586_v13 = vrot.slane %v585_v51, 1  ;;  %v593_v53 = vrot.slane %v592_v24, 1 }
  0x60   : > { %v600_v54 = vrot.slane %v599_v56, 1  ;;  %v607_v55 = vrot.slane %v606_v5, 1  ;;  %v613_v40 = vmax.f32 %v611_v15, %v612_v8  ;;  %v620_v41 = vmax.f32 %v618_v9, %v619_v10 }
  0x61   : > { %v627_v44 = vmax.f32 %v625_v50, %v626_v11  ;;  %v634_v62 = vmax.f32 %v632_v4, %v633_v12  ;;  %v1582_v60 = vmax.f32 %v585_v51, %v586_v13  ;;  %v1584_v20 = vmax.f32 %v592_v24, %v593_v53 }
  0x62   : > { %v1586_v63 = vmax.f32 %v599_v56, %v600_v54  ;;  %v1588_v2 = vmax.f32 %v606_v5, %v607_v55  ;;  %v614_v45 = vrot.slane %v613_v40, 1  ;;  %v621_v0 = vrot.slane %v620_v41, 1 }
  0x63   : > { %v628_v46 = vrot.slane %v627_v44, 1  ;;  %v635_v61 = vrot.slane %v634_v62, 1  ;;  %v637_v19 = vsel %vm468_vm1, %v1412_v25, -inf  ;;  %v644_v22 = vsel %vm468_vm1, %v390_v6, -inf }
  0x64   : > { %v651_v26 = vsel %vm468_vm1, %v391_v7, -inf  ;;  %v1923_v30 = vrot.slane %v1412_v25, 6  ;;  %v1601_v17 = vmax.f32 %v613_v40, %v614_v45  ;;  %v1603_v16 = vmax.f32 %v620_v41, %v621_v0 }
  0x65   : > { %v1605_v3 = vmax.f32 %v627_v44, %v628_v46  ;;  %v1607_v15 = vmax.f32 %v634_v62, %v635_v61  ;;  %v638_v9 = vrot.slane %v637_v19, 4  ;;  %v645_v50 = vrot.slane %v644_v22, 4 }
  0x66   : > { %v658_v31 = vsel %vm468_vm1, %v1923_v30, -inf  ;;  %1924 = vst [vmem:[#allocation6_spill] sm:$0xff] %v1603_v16  ;;  %v652_v4 = vrot.slane %v651_v26, 4  ;;  %v665_v51 = vsel %vm468_vm1, %v1416_v28, -inf  ;;  %v1927_v7 = vrot.slane %v1416_v28, 2 }
  0x67   : > { %1925 = vst [vmem:[#allocation7_spill] sm:$0xff] %v1605_v3  ;;  %v659_v6 = vrot.slane %v658_v31, 4  ;;  %v1928_v24 = vrot.slane %v1416_v28, 4  ;;  %v1929_v5 = vrot.slane %v1416_v28, 6  ;;  %v639_v10 = vmax.f32 %v637_v19, %v638_v9 }
  0x68   : > { %1926 = vst [vmem:[#allocation8_spill] sm:$0xff] %v1607_v15  ;;  %v672_v25 = vsel %vm468_vm1, %v1927_v7, -inf  ;;  %v646_v11 = vmax.f32 %v644_v22, %v645_v50  ;;  %v653_v12 = vmax.f32 %v651_v26, %v652_v4  ;;  %v666_v53 = vrot.slane %v665_v51, 4 }
  0x69   : > { %v679_v56 = vsel %vm468_vm1, %v1928_v24, -inf  ;;  %v686_v8 = vsel %vm468_vm1, %v1929_v5, -inf  ;;  %v660_v13 = vmax.f32 %v658_v31, %v659_v6  ;;  %v673_v54 = vrot.slane %v672_v25, 4 }
  0x6a   : > { %v680_v55 = vrot.slane %v679_v56, 4  ;;  %v687_v40 = vrot.slane %v686_v8, 4  ;;  %v640_v41 = vrot.slane %v639_v10, 2  ;;  %v647_v44 = vrot.slane %v646_v11, 2 }
  0x6b   : > { %v654_v62 = vrot.slane %v653_v12, 2  ;;  %v661_v45 = vrot.slane %v660_v13, 2  ;;  %v667_v0 = vmax.f32 %v665_v51, %v666_v53  ;;  %v674_v46 = vmax.f32 %v672_v25, %v673_v54 }
  0x6c   : > { %v681_v61 = vmax.f32 %v679_v56, %v680_v55  ;;  %v688_v30 = vmax.f32 %v686_v8, %v687_v40  ;;  %v641_v7 = vmax.f32 %v639_v10, %v640_v41  ;;  %v648_v28 = vmax.f32 %v646_v11, %v647_v44 }
  0x6d   : > { %v655_v24 = vmax.f32 %v653_v12, %v654_v62  ;;  %v662_v5 = vmax.f32 %v660_v13, %v661_v45  ;;  %v668_v19 = vrot.slane %v667_v0, 2  ;;  %v675_v22 = vrot.slane %v674_v46, 2 }
  0x6e   : > { %v682_v26 = vrot.slane %v681_v61, 2  ;;  %v689_v31 = vrot.slane %v688_v30, 2  ;;  %v642_v9 = vrot.slane %v641_v7, 1  ;;  %v649_v50 = vrot.slane %v648_v28, 1 }
  0x6f   : > { %v656_v4 = vrot.slane %v655_v24, 1  ;;  %v663_v6 = vrot.slane %v662_v5, 1  ;;  %v669_v15 = vmax.f32 %v667_v0, %v668_v19  ;;  %v676_v59 = vmax.f32 %v674_v46, %v675_v22 }
  0x70   : > { %v683_v3 = vmax.f32 %v681_v61, %v682_v26  ;;  %v690_v34 = vmax.f32 %v688_v30, %v689_v31  ;;  %v1620_v51 = vmax.f32 %v641_v7, %v642_v9  ;;  %v1622_v25 = vmax.f32 %v648_v28, %v649_v50 }
  0x71   : > { %v1624_v56 = vmax.f32 %v655_v24, %v656_v4  ;;  %v1626_v8 = vmax.f32 %v662_v5, %v663_v6  ;;  %v670_v10 = vrot.slane %v669_v15, 1  ;;  %v677_v11 = vrot.slane %v676_v59, 1 }
  0x72   : > { %v684_v12 = vrot.slane %v683_v3, 1  ;;  %v691_v13 = vrot.slane %v690_v34, 1  ;;  %v693_v53 = vsel %vm468_vm1, %v1421_v33, -inf  ;;  %v1930_v54 = vrot.slane %v1421_v33, 2 }
  0x73   : > { %v1931_v40 = vrot.slane %v1421_v33, 4  ;;  %v1932_v44 = vrot.slane %v1421_v33, 6  ;;  %v1639_v45 = vmax.f32 %v669_v15, %v670_v10  ;;  %v1641_v0 = vmax.f32 %v676_v59, %v677_v11 }
  0x74   : > { %v700_v55 = vsel %vm468_vm1, %v1930_v54, -inf  ;;  %v1643_v46 = vmax.f32 %v683_v3, %v684_v12  ;;  %v1645_v61 = vmax.f32 %v690_v34, %v691_v13  ;;  %v694_v30 = vrot.slane %v693_v53, 4 }
  0x75   : > { %v707_v41 = vsel %vm468_vm1, %v1931_v40, -inf  ;;  %v714_v62 = vsel %vm468_vm1, %v1932_v44, -inf  ;;  %1933 = vst [vmem:[#allocation9_spill] sm:$0xff] %v1641_v0  ;;  %v701_v7 = vrot.slane %v700_v55, 4  ;;  %v721_v5 = vsel %vm468_vm1, %v1426_v38, -inf }
  0x76   : > { %1934 = vst [vmem:[#allocation10_spill] sm:$0xff] %v1643_v46  ;;  %v708_v28 = vrot.slane %v707_v41, 4  ;;  %v715_v24 = vrot.slane %v714_v62, 4  ;;  %v1936_v19 = vrot.slane %v1426_v38, 2  ;;  %v1937_v15 = vrot.slane %v1426_v38, 4 }
  0x77   : > { %1935 = vst [vmem:[#allocation11_spill] sm:$0xff] %v1645_v61  ;;  %v1938_v3 = vrot.slane %v1426_v38, 6  ;;  %v695_v22 = vmax.f32 %v693_v53, %v694_v30  ;;  %v702_v26 = vmax.f32 %v700_v55, %v701_v7  ;;  %v722_v50 = vrot.slane %v721_v5, 4 }
  0x78   : > { %v728_v33 = vsel %vm468_vm1, %v1936_v19, -inf  ;;  %v735_v59 = vsel %vm468_vm1, %v1937_v15, -inf  ;;  %v709_v31 = vmax.f32 %v707_v41, %v708_v28  ;;  %v716_v9 = vmax.f32 %v714_v62, %v715_v24 }
  0x79   : > { %v742_v34 = vsel %vm468_vm1, %v1938_v3, -inf  ;;  %v729_v4 = vrot.slane %v728_v33, 4  ;;  %v736_v6 = vrot.slane %v735_v59, 4  ;;  %v696_v11 = vrot.slane %v695_v22, 2 }
  0x7a   : > { %v743_v10 = vrot.slane %v742_v34, 4  ;;  %v703_v12 = vrot.slane %v702_v26, 2  ;;  %v710_v13 = vrot.slane %v709_v31, 2  ;;  %v717_v54 = vrot.slane %v716_v9, 2 }
  0x7b   : > { %v723_v40 = vmax.f32 %v721_v5, %v722_v50  ;;  %v730_v44 = vmax.f32 %v728_v33, %v729_v4  ;;  %v737_v19 = vmax.f32 %v735_v59, %v736_v6  ;;  %v697_v61 = vmax.f32 %v695_v22, %v696_v11 }
  0x7c   : > { %v744_v15 = vmax.f32 %v742_v34, %v743_v10  ;;  %v704_v38 = vmax.f32 %v702_v26, %v703_v12  ;;  %v711_v46 = vmax.f32 %v709_v31, %v710_v13  ;;  %v718_v3 = vmax.f32 %v716_v9, %v717_v54 }
  0x7d   : > { %v724_v53 = vrot.slane %v723_v40, 2  ;;  %v731_v55 = vrot.slane %v730_v44, 2  ;;  %v738_v41 = vrot.slane %v737_v19, 2  ;;  %v698_v30 = vrot.slane %v697_v61, 1 }
  0x7e   : > { %v745_v62 = vrot.slane %v744_v15, 2  ;;  %v705_v7 = vrot.slane %v704_v38, 1  ;;  %v712_v28 = vrot.slane %v711_v46, 1  ;;  %v719_v24 = vrot.slane %v718_v3, 1 }
  0x7f   : > { %v725_v43 = vmax.f32 %v723_v40, %v724_v53  ;;  %v732_v0 = vmax.f32 %v730_v44, %v731_v55  ;;  %v739_v16 = vmax.f32 %v737_v19, %v738_v41  ;;  %v1658_v5 = vmax.f32 %v697_v61, %v698_v30 }
  0x80   : > { %v746_v37 = vmax.f32 %v744_v15, %v745_v62  ;;  %v1660_v33 = vmax.f32 %v704_v38, %v705_v7  ;;  %v1662_v59 = vmax.f32 %v711_v46, %v712_v28  ;;  %v1664_v34 = vmax.f32 %v718_v3, %v719_v24 }
  0x81   : > { %v726_v22 = vrot.slane %v725_v43, 1  ;;  %v733_v26 = vrot.slane %v732_v0, 1  ;;  %v740_v31 = vrot.slane %v739_v16, 1  ;;  %v749_v50 = vsel %vm468_vm1, %v1428_v39, -inf }
  0x82   : > { %1939 = vst [vmem:[#allocation12_spill] sm:$0xff] %v1662_v59  ;;  %v747_v9 = vrot.slane %v746_v37, 1  ;;  %v1941_v4 = vrot.slane %v1428_v39, 2  ;;  %v1942_v61 = vrot.slane %v1428_v39, 4  ;;  %v1943_v46 = vrot.slane %v1428_v39, 6 }
  0x83   : > { %1940 = vst [vmem:[#allocation13_spill] sm:$0xff] %v1664_v34  ;;  %v1677_v12 = vmax.f32 %v725_v43, %v726_v22  ;;  %v1679_v13 = vmax.f32 %v732_v0, %v733_v26  ;;  %v1681_v54 = vmax.f32 %v739_v16, %v740_v31  ;;  %v750_v44 = vrot.slane %v749_v50, 4 }
  0x84   : > { %v756_v6 = vsel %vm468_vm1, %v1941_v4, -inf  ;;  %v763_v10 = vsel %vm468_vm1, %v1942_v61, -inf  ;;  %v770_v11 = vsel %vm468_vm1, %v1943_v46, -inf  ;;  %v1683_v40 = vmax.f32 %v746_v37, %v747_v9 }
  0x85   : > { %1944 = vst [vmem:[#allocation14_spill] sm:$0xff] %v1677_v12  ;;  %v757_v19 = vrot.slane %v756_v6, 4  ;;  %v764_v15 = vrot.slane %v763_v10, 4  ;;  %v771_v38 = vrot.slane %v770_v11, 4  ;;  %v777_v3 = vsel %vm468_vm1, %v1432_v42, -inf }
  0x86   : > { %1945 = vst [vmem:[#allocation15_spill] sm:$0xff] %v1679_v13  ;;  %v1948_v53 = vrot.slane %v1432_v42, 2  ;;  %v1949_v43 = vrot.slane %v1432_v42, 4  ;;  %v1950_v16 = vrot.slane %v1432_v42, 6  ;;  %v751_v55 = vmax.f32 %v749_v50, %v750_v44 }
  0x87   : > { %1946 = vst [vmem:[#allocation16_spill] sm:$0xff] %v1681_v54  ;;  %v758_v41 = vmax.f32 %v756_v6, %v757_v19  ;;  %v765_v62 = vmax.f32 %v763_v10, %v764_v15  ;;  %v772_v30 = vmax.f32 %v770_v11, %v771_v38  ;;  %v778_v7 = vrot.slane %v777_v3, 4 }
  0x88   : > { %1947 = vst [vmem:[#allocation17_spill] sm:$0xff] %v1683_v40  ;;  %v784_v39 = vsel %vm468_vm1, %v1948_v53, -inf  ;;  %v791_v0 = vsel %vm468_vm1, %v1949_v43, -inf  ;;  %v798_v37 = vsel %vm468_vm1, %v1950_v16, -inf  ;;  %v752_v26 = vrot.slane %v751_v55, 2 }
  0x89   : > { %v785_v28 = vrot.slane %v784_v39, 4  ;;  %v792_v24 = vrot.slane %v791_v0, 4  ;;  %v799_v22 = vrot.slane %v798_v37, 4  ;;  %v759_v31 = vrot.slane %v758_v41, 2 }
  0x8a   : > { %v766_v9 = vrot.slane %v765_v62, 2  ;;  %v773_v4 = vrot.slane %v772_v30, 2  ;;  %v779_v61 = vmax.f32 %v777_v3, %v778_v7  ;;  %v753_v40 = vmax.f32 %v751_v55, %v752_v26 }
  0x8b   : > { %v786_v46 = vmax.f32 %v784_v39, %v785_v28  ;;  %v793_v53 = vmax.f32 %v791_v0, %v792_v24  ;;  %v800_v43 = vmax.f32 %v798_v37, %v799_v22  ;;  %v760_v42 = vmax.f32 %v758_v41, %v759_v31 }
  0x8c   : > { %v767_v54 = vmax.f32 %v765_v62, %v766_v9  ;;  %v774_v16 = vmax.f32 %v772_v30, %v773_v4  ;;  %v780_v50 = vrot.slane %v779_v61, 2  ;;  %v754_v44 = vrot.slane %v753_v40, 1 }
  0x8d   : > { %v787_v6 = vrot.slane %v786_v46, 2  ;;  %v794_v10 = vrot.slane %v793_v53, 2  ;;  %v801_v11 = vrot.slane %v800_v43, 2  ;;  %v761_v19 = vrot.slane %v760_v42, 1 }
  0x8e   : > { %v768_v15 = vrot.slane %v767_v54, 1  ;;  %v775_v38 = vrot.slane %v774_v16, 1  ;;  %v781_v13 = vmax.f32 %v779_v61, %v780_v50  ;;  %v1696_v3 = vmax.f32 %v753_v40, %v754_v44 }
  0x8f   : > { %v788_v12 = vmax.f32 %v786_v46, %v787_v6  ;;  %v795_v34 = vmax.f32 %v793_v53, %v794_v10  ;;  %v802_v59 = vmax.f32 %v800_v43, %v801_v11  ;;  %v1698_v39 = vmax.f32 %v760_v42, %v761_v19 }
  0x90   : > { %v1700_v0 = vmax.f32 %v767_v54, %v768_v15  ;;  %v1702_v37 = vmax.f32 %v774_v16, %v775_v38  ;;  %v782_v55 = vrot.slane %v781_v13, 1  ;;  %v805_v7 = vsel %vm468_vm1, %v1437_v1, -inf }
  0x91   : > { %v789_v41 = vrot.slane %v788_v12, 1  ;;  %v796_v62 = vrot.slane %v795_v34, 1  ;;  %v803_v30 = vrot.slane %v802_v59, 1  ;;  %v1953_v28 = vrot.slane %v1437_v1, 2 }
  0x92   : > { %1951 = vst [vmem:[#allocation18_spill] sm:$0xff] %v1700_v0  ;;  %v1954_v40 = vrot.slane %v1437_v1, 4  ;;  %v1955_v54 = vrot.slane %v1437_v1, 6  ;;  %v1715_v31 = vmax.f32 %v781_v13, %v782_v55  ;;  %v806_v46 = vrot.slane %v805_v7, 4 }
  0x93   : > { %1952 = vst [vmem:[#allocation19_spill] sm:$0xff] %v1702_v37  ;;  %v812_v24 = vsel %vm468_vm1, %v1953_v28, -inf  ;;  %v1717_v9 = vmax.f32 %v788_v12, %v789_v41  ;;  %v1719_v4 = vmax.f32 %v795_v34, %v796_v62  ;;  %v1721_v61 = vmax.f32 %v802_v59, %v803_v30 }
  0x94   : > { %v819_v22 = vsel %vm468_vm1, %v1954_v40, -inf  ;;  %v826_v26 = vsel %vm468_vm1, %v1955_v54, -inf  ;;  %1956 = vst [vmem:[#allocation20_spill] sm:$0xff] %v1715_v31  ;;  %v813_v53 = vrot.slane %v812_v24, 4  ;;  %v833_v16 = vsel %vm468_vm1, %v1442_v47, -inf }
  0x95   : > { %1957 = vst [vmem:[#allocation21_spill] sm:$0xff] %v1717_v9  ;;  %v820_v43 = vrot.slane %v819_v22, 4  ;;  %v827_v42 = vrot.slane %v826_v26, 4  ;;  %v1960_v50 = vrot.slane %v1442_v47, 2  ;;  %v1961_v13 = vrot.slane %v1442_v47, 4 }
  0x96   : > { %1958 = vst [vmem:[#allocation22_spill] sm:$0xff] %v1719_v4  ;;  %v1962_v34 = vrot.slane %v1442_v47, 6  ;;  %v807_v6 = vmax.f32 %v805_v7, %v806_v46  ;;  %v814_v10 = vmax.f32 %v812_v24, %v813_v53  ;;  %v834_v19 = vrot.slane %v833_v16, 4 }
  0x97   : > { %1959 = vst [vmem:[#allocation23_spill] sm:$0xff] %v1721_v61  ;;  %v840_v1 = vsel %vm468_vm1, %v1960_v50, -inf  ;;  %v847_v12 = vsel %vm468_vm1, %v1961_v13, -inf  ;;  %v821_v11 = vmax.f32 %v819_v22, %v820_v43  ;;  %v828_v44 = vmax.f32 %v826_v26, %v827_v42 }
  0x98   : > { %v854_v59 = vsel %vm468_vm1, %v1962_v34, -inf  ;;  %v841_v15 = vrot.slane %v840_v1, 4  ;;  %v848_v38 = vrot.slane %v847_v12, 4  ;;  %v808_v41 = vrot.slane %v807_v6, 2 }
  0x99   : > { %v855_v55 = vrot.slane %v854_v59, 4  ;;  %v815_v62 = vrot.slane %v814_v10, 2  ;;  %v822_v30 = vrot.slane %v821_v11, 2  ;;  %v829_v28 = vrot.slane %v828_v44, 2 }
  0x9a   : > { %v835_v40 = vmax.f32 %v833_v16, %v834_v19  ;;  %v842_v54 = vmax.f32 %v840_v1, %v841_v15  ;;  %v849_v50 = vmax.f32 %v847_v12, %v848_v38  ;;  %v809_v61 = vmax.f32 %v807_v6, %v808_v41 }
  0x9b   : > { %v856_v13 = vmax.f32 %v854_v59, %v855_v55  ;;  %v816_v47 = vmax.f32 %v814_v10, %v815_v62  ;;  %v823_v4 = vmax.f32 %v821_v11, %v822_v30  ;;  %v830_v34 = vmax.f32 %v828_v44, %v829_v28 }
  0x9c   : > { %v836_v7 = vrot.slane %v835_v40, 2  ;;  %v843_v24 = vrot.slane %v842_v54, 2  ;;  %v850_v22 = vrot.slane %v849_v50, 2  ;;  %v810_v46 = vrot.slane %v809_v61, 1 }
  0x9d   : > { %v857_v26 = vrot.slane %v856_v13, 2  ;;  %v817_v53 = vrot.slane %v816_v47, 1  ;;  %v824_v43 = vrot.slane %v823_v4, 1  ;;  %v831_v42 = vrot.slane %v830_v34, 1 }
  0x9e   : > { %v837_v9 = vmax.f32 %v835_v40, %v836_v7  ;;  %v844_v31 = vmax.f32 %v842_v54, %v843_v24  ;;  %v851_v37 = vmax.f32 %v849_v50, %v850_v22  ;;  %v1734_v16 = vmax.f32 %v809_v61, %v810_v46 }
  0x9f   : > { %v858_v0 = vmax.f32 %v856_v13, %v857_v26  ;;  %v1736_v1 = vmax.f32 %v816_v47, %v817_v53  ;;  %v1738_v12 = vmax.f32 %v823_v4, %v824_v43  ;;  %v1740_v59 = vmax.f32 %v830_v34, %v831_v42 }
  0xa0   : > { %v838_v6 = vrot.slane %v837_v9, 1  ;;  %v845_v10 = vrot.slane %v844_v31, 1  ;;  %v852_v11 = vrot.slane %v851_v37, 1  ;;  %v861_v19 = vsel %vm468_vm1, %v1444_v48, -inf }
  0xa1   : > { %1963 = vst [vmem:[#allocation24_spill] sm:$0xff] %v1738_v12  ;;  %v859_v44 = vrot.slane %v858_v0, 1  ;;  %v1965_v15 = vrot.slane %v1444_v48, 2  ;;  %v1966_v61 = vrot.slane %v1444_v48, 4  ;;  %v1967_v4 = vrot.slane %v1444_v48, 6 }
  0xa2   : > { %1964 = vst [vmem:[#allocation25_spill] sm:$0xff] %v1740_v59  ;;  %v1753_v62 = vmax.f32 %v837_v9, %v838_v6  ;;  %v1755_v30 = vmax.f32 %v844_v31, %v845_v10  ;;  %v1757_v28 = vmax.f32 %v851_v37, %v852_v11  ;;  %v862_v54 = vrot.slane %v861_v19, 4 }
  0xa3   : > { %v868_v38 = vsel %vm468_vm1, %v1965_v15, -inf  ;;  %v875_v55 = vsel %vm468_vm1, %v1966_v61, -inf  ;;  %v882_v41 = vsel %vm468_vm1, %v1967_v4, -inf  ;;  %v1759_v40 = vmax.f32 %v858_v0, %v859_v44 }
  0xa4   : > { %1968 = vst [vmem:[#allocation26_spill] sm:$0xff] %v1753_v62  ;;  %v869_v50 = vrot.slane %v868_v38, 4  ;;  %v876_v13 = vrot.slane %v875_v55, 4  ;;  %v883_v47 = vrot.slane %v882_v41, 4  ;;  %v889_v34 = vsel %vm468_vm1, %v1446_v49, -inf }
  0xa5   : > { %1969 = vst [vmem:[#allocation27_spill] sm:$0xff] %v1755_v30  ;;  %v1972_v7 = vrot.slane %v1446_v49, 2  ;;  %v1973_v9 = vrot.slane %v1446_v49, 4  ;;  %v1974_v37 = vrot.slane %v1446_v49, 6  ;;  %v863_v24 = vmax.f32 %v861_v19, %v862_v54 }
  0xa6   : > { %1970 = vst [vmem:[#allocation28_spill] sm:$0xff] %v1757_v28  ;;  %v870_v22 = vmax.f32 %v868_v38, %v869_v50  ;;  %v877_v26 = vmax.f32 %v875_v55, %v876_v13  ;;  %v884_v46 = vmax.f32 %v882_v41, %v883_v47  ;;  %v890_v53 = vrot.slane %v889_v34, 4 }
  0xa7   : > { %1971 = vst [vmem:[#allocation29_spill] sm:$0xff] %v1759_v40  ;;  %v896_v48 = vsel %vm468_vm1, %v1972_v7, -inf  ;;  %v903_v31 = vsel %vm468_vm1, %v1973_v9, -inf  ;;  %v910_v0 = vsel %vm468_vm1, %v1974_v37, -inf  ;;  %v864_v10 = vrot.slane %v863_v24, 2 }
  0xa8   : > { %v897_v43 = vrot.slane %v896_v48, 4  ;;  %v904_v42 = vrot.slane %v903_v31, 4  ;;  %v911_v6 = vrot.slane %v910_v0, 4  ;;  %v871_v11 = vrot.slane %v870_v22, 2 }
  0xa9   : > { %v878_v44 = vrot.slane %v877_v26, 2  ;;  %v885_v15 = vrot.slane %v884_v46, 2  ;;  %v891_v61 = vmax.f32 %v889_v34, %v890_v53  ;;  %v865_v40 = vmax.f32 %v863_v24, %v864_v10 }
  0xaa   : > { %v898_v4 = vmax.f32 %v896_v48, %v897_v43  ;;  %v905_v7 = vmax.f32 %v903_v31, %v904_v42  ;;  %v912_v9 = vmax.f32 %v910_v0, %v911_v6  ;;  %v872_v49 = vmax.f32 %v870_v22, %v871_v11 }
  0xab   : > { %v879_v28 = vmax.f32 %v877_v26, %v878_v44  ;;  %v886_v37 = vmax.f32 %v884_v46, %v885_v15  ;;  %v892_v19 = vrot.slane %v891_v61, 2  ;;  %v866_v54 = vrot.slane %v865_v40, 1 }
  0xac   : > { %v899_v38 = vrot.slane %v898_v4, 2  ;;  %v906_v55 = vrot.slane %v905_v7, 2  ;;  %v913_v41 = vrot.slane %v912_v9, 2  ;;  %v873_v50 = vrot.slane %v872_v49, 1 }
  0xad   : > { %v880_v13 = vrot.slane %v879_v28, 1  ;;  %v887_v47 = vrot.slane %v886_v37, 1  ;;  %v893_v30 = vmax.f32 %v891_v61, %v892_v19  ;;  %v867_v34 = vmax.f32 %v865_v40, %v866_v54  ;;  %v1982_v61 = vld [vmem:[#allocation5_spill] sm:$0xff] }
  0xae   : > { %v900_v62 = vmax.f32 %v898_v4, %v899_v38  ;;  %v907_v59 = vmax.f32 %v905_v7, %v906_v55  ;;  %v914_v12 = vmax.f32 %v912_v9, %v913_v41  ;;  %v874_v48 = vmax.f32 %v872_v49, %v873_v50  ;;  %v1983_v7 = vld [vmem:[#allocation8_spill] sm:$0xff]  ;;  %v1984_v49 = vld [vmem:[#allocation11_spill] sm:$0xff] }
  0xaf   : > { %v881_v31 = vmax.f32 %v879_v28, %v880_v13  ;;  %v888_v0 = vmax.f32 %v886_v37, %v887_v47  ;;  %v894_v24 = vrot.slane %v893_v30, 1  ;;  %v982_v28 = vsel %vm981_vm2, %v1508_v27, %v1506_v29  ;;  %v1985_v38 = vld [vmem:[#allocation12_spill] sm:$0xff]  ;;  %v1986_v13 = vld [vmem:[#allocation13_spill] sm:$0xff] }
  0xb0   : > { %v901_v22 = vrot.slane %v900_v62, 1  ;;  %v908_v26 = vrot.slane %v907_v59, 1  ;;  %v915_v46 = vrot.slane %v914_v12, 1  ;;  %v984_v40 = vsel %vm983_vm3, %v1510_v23, %v982_v28  ;;  %v1992_v28 = vld [vmem:[#allocation15_spill] sm:$0xff] }
  0xb1   : > { %v895_v53 = vmax.f32 %v893_v30, %v894_v24  ;;  %v995_v30 = vsel %vm981_vm2, %v1546_v14, %v1544_v52  ;;  %v986_v29 = vsel %vm985_vm4, %v1512_v21, %v984_v40  ;;  %v1016_v19 = vsel %vm981_vm2, %v1660_v33, %v1658_v5  ;;  %v1987_v33 = vld [vmem:[#allocation18_spill] sm:$0xff]  ;;  %v1988_v24 = vld [vmem:[#allocation24_spill] sm:$0xff] }
  0xb2   : > { %v902_v43 = vmax.f32 %v900_v62, %v901_v22  ;;  %v1772_v42 = vmax.f32 %v907_v59, %v908_v26  ;;  %v1774_v6 = vmax.f32 %v914_v12, %v915_v46  ;;  %v1002_v12 = vsel %vm981_vm2, %v1584_v20, %v1582_v60 }
  0xb3   : > { %v1009_v59 = vsel %vm981_vm2, %v1622_v25, %v1620_v51  ;;  %v996_v27 = vsel %vm983_vm3, %v1548_v57, %v995_v30  ;;  %v1003_v23 = vsel %vm983_vm3, %v1586_v63, %v1002_v12  ;;  %v988_v14 = vsel %vm987_vm5, %v1525_v18, %v986_v29  ;;  %v1975_v51 = vld [vmem:[#allocation3_spill] sm:$0xff]  ;;  %v1994_v12 = vld [vmem:[#allocation26_spill] sm:$0xff] }
  0xb4   : > { %v1010_v52 = vsel %vm983_vm3, %v1624_v56, %v1009_v59  ;;  %v997_v60 = vsel %vm985_vm4, %v1550_v58, %v996_v27  ;;  %v1004_v20 = vsel %vm985_vm4, %v1588_v2, %v1003_v23  ;;  %v990_v57 = vsel %vm989_vm6, %v1527_v32, %v988_v14  ;;  %v1976_v56 = vld [vmem:[#allocation6_spill] sm:$0xff]  ;;  %v1995_v27 = vld [vmem:[#allocation16_spill] sm:$0xff]  ;;  %v1996_v23 = vld [vmem:[#allocation21_spill] sm:$0xff] }
  0xb5   : > { %v1011_v21 = vsel %vm985_vm4, %v1626_v8, %v1010_v52  ;;  %v998_v18 = vsel %vm987_vm5, %v1563_v35, %v997_v60  ;;  %v1005_v58 = vsel %vm987_vm5, %v1601_v17, %v1004_v20  ;;  %v992_v2 = vsel %vm991_vm7, %v1529_v36, %v990_v57  ;;  %v1977_v8 = vld [vmem:[#allocation9_spill] sm:$0xff]  ;;  %v1978_v35 = vld [vmem:[#allocation2_spill] sm:$0xff]  ;;  %v1979_v17 = vld [vmem:[#allocation4_spill] sm:$0xff] }
  0xb6   : > { %v1012_v63 = vsel %vm987_vm5, %v1639_v45, %v1011_v21  ;;  %v999_v25 = vsel %vm989_vm6, %v1975_v51, %v998_v18  ;;  %v1006_v32 = vsel %vm989_vm6, %v1976_v56, %v1005_v58  ;;  %v994_v10 = vsel %vm993_vm8, %v1978_v35, %v992_v2  ;;  %v1980_v45 = vld [vmem:[#allocation7_spill] sm:$0xff]  ;;  %v1981_v36 = vld [vmem:[#allocation10_spill] sm:$0xff]  ;;  %v1998_v21 = vld [vmem:[#allocation17_spill] sm:$0xff] }
  0xb7   : > { %v1013_v62 = vsel %vm989_vm6, %v1977_v8, %v1012_v63  ;;  %v1000_v11 = vsel %vm991_vm7, %v1979_v17, %v999_v25  ;;  %v1007_v44 = vsel %vm991_vm7, %v1980_v45, %v1006_v32  ;;  %1052 = vst.msk [vmem:[%s1810_s25] sm:$0xff] %vm307_vm0, %v994_v10  ;;  %v1017_v55 = vsel %vm983_vm3, %v1985_v38, %v1016_v19  ;;  %v1997_v14 = vld [vmem:[#allocation27_spill] sm:$0xff]  ;;  %v1999_v18 = vld [vmem:[#allocation22_spill] sm:$0xff]  ;;  %v2000_v63 = vld [vmem:[#allocation28_spill] sm:$0xff] }
  0xb8   : > { %v1014_v15 = vsel %vm991_vm7, %v1981_v36, %v1013_v62  ;;  %v1001_v4 = vsel %vm993_vm8, %v1982_v61, %v1000_v11  ;;  %v1008_v9 = vsel %vm993_vm8, %v1983_v7, %v1007_v44  ;;  %v1023_v41 = vsel %vm981_vm2, %v1698_v39, %v1696_v3  ;;  %v1989_v3 = vld [vmem:[#allocation14_spill] sm:$0xff]  ;;  %v2001_v51 = vld [vmem:[#allocation23_spill] sm:$0xff]  ;;  %v2002_v56 = vld [vmem:[#allocation29_spill] sm:$0xff] }
  0xb9   : > { %v1015_v37 = vsel %vm993_vm8, %v1984_v49, %v1014_v15  ;;  %v1030_v54 = vsel %vm981_vm2, %v1736_v1, %v1734_v16  ;;  %v1037_v50 = vsel %vm981_vm2, %v874_v48, %v867_v34  ;;  %1053 = vst.msk [vmem:[%s1810_s25 + $0x8] sm:$0xff] %vm307_vm0, %v1001_v4  ;;  %v1018_v5 = vsel %vm985_vm4, %v1986_v13, %v1017_v55  ;;  %v1990_v16 = vld [vmem:[#allocation19_spill] sm:$0xff]  ;;  %v1991_v34 = vld [vmem:[#allocation25_spill] sm:$0xff] }
  0xba   : > { %v1024_v47 = vsel %vm983_vm3, %v1987_v33, %v1023_v41  ;;  %v1031_v22 = vsel %vm983_vm3, %v1988_v24, %v1030_v54  ;;  %v1038_v26 = vsel %vm983_vm3, %v881_v31, %v1037_v50  ;;  %1054 = vst.msk [vmem:[%s1810_s25 + $0x10] sm:$0xff] %vm307_vm0, %v1008_v9  ;;  %v1019_v39 = vsel %vm987_vm5, %v1989_v3, %v1018_v5  ;;  %v1993_v31 = vld [vmem:[#allocation20_spill] sm:$0xff] }
  0xbb   : > { %v1025_v1 = vsel %vm985_vm4, %v1990_v16, %v1024_v47  ;;  %v1032_v48 = vsel %vm985_vm4, %v1991_v34, %v1031_v22  ;;  %v1039_v46 = vsel %vm985_vm4, %v888_v0, %v1038_v26  ;;  %1055 = vst.msk [vmem:[%s1810_s25 + $0x18] sm:$0xff] %vm307_vm0, %v1015_v37  ;;  %v1020_v40 = vsel %vm989_vm6, %v1992_v28, %v1019_v39 }
  0xbc   : > { %v1026_v30 = vsel %vm987_vm5, %v1993_v31, %v1025_v1  ;;  %v1033_v59 = vsel %vm987_vm5, %v1994_v12, %v1032_v48  ;;  %v1040_v29 = vsel %vm987_vm5, %v895_v53, %v1039_v46  ;;  %v1021_v0 = vsel %vm991_vm7, %v1995_v27, %v1020_v40 }
  0xbd   : > { %v1027_v52 = vsel %vm989_vm6, %v1996_v23, %v1026_v30  ;;  %v1034_v60 = vsel %vm989_vm6, %v1997_v14, %v1033_v59  ;;  %v1041_v20 = vsel %vm989_vm6, %v902_v43, %v1040_v29  ;;  %v1022_v57 = vsel %vm993_vm8, %v1998_v21, %v1021_v0 }
  0xbe   : > { %v1028_v58 = vsel %vm991_vm7, %v1999_v18, %v1027_v52  ;;  %v1035_v53 = vsel %vm991_vm7, %v2000_v63, %v1034_v60  ;;  %v1042_v2 = vsel %vm991_vm7, %v1772_v42, %v1041_v20  ;;  %1056 = vst.msk [vmem:[%s1810_s25 + $0x20] sm:$0xff] %vm307_vm0, %v1022_v57 }
  0xbf   : > { %v1029_v25 = vsel %vm993_vm8, %v2001_v51, %v1028_v58  ;;  %v1036_v32 = vsel %vm993_vm8, %v2002_v56, %v1035_v53  ;;  %v1043_v43 = vsel %vm993_vm8, %v1774_v6, %v1042_v2 }
  0xc0   : > { %1057 = vst.msk [vmem:[%s1810_s25 + $0x28] sm:$0xff] %vm307_vm0, %v1029_v25 }
  0xc1   : > { %1058 = vst.msk [vmem:[%s1810_s25 + $0x30] sm:$0xff] %vm307_vm0, %v1036_v32 }
  0xc2   : > { %1059 = vst.msk [vmem:[%s1810_s25 + $0x38] sm:$0xff] %vm307_vm0, %v1043_v43 }
  0xc3 PF: > { %s13_s12 = sadd.s32 1, %s1144_s12  }
  0xc4   : > { %p10_p4 = scmp.ge.s32.totalorder %s13_s12, 4  }
  0xc6   :  { %12 = sbr.rel (!%p10_p4) target bundleno = 1 (0x1), region = 62 }

// kernel: resblock_pallas.3
= control target key start
LH: loop header
LB: loop body
LE: loop exit
PB: predicated region body
PF: predicated region fallthrough
CT: control target
= control target key end

     0   :  { %s1840_s18 = smov 0   ;;  %s2602_s0 = inlined_call_operand.vmem [shape: f32[2,16,16,4], index: 0, kind: input, shape index: {}]   ;;  %s2603_s1 = inlined_call_operand.vmem [shape: f32[3,12,4], index: 1, kind: input, shape index: {}]   ;;  %s2604_s2 = inlined_call_operand.vmem [shape: f32[1,4], index: 2, kind: input, shape index: {}]   ;;  %s2605_s3 = inlined_call_operand.vmem [shape: f32[2,16,16,4], index: 3, kind: output, shape index: {0}]   ;;  %s2606_s4 = inlined_call_operand.vmem [shape: f32[2,1,4], index: 4, kind: output, shape index: {1}]   ;;  %s2607_s5 = inlined_call_operand.vmem [shape: f32[2,1,4], index: 5, kind: output, shape index: {2}]  }
   0x1 LB: > { %s1665_s19 = sadd.s32 4294967295, %s1805_s18   ;;  %p1669_p0 = scmp.ge.s32.totalorder %s1805_s18, 1  ;;  %s1805_s18 = sphi %s1840_s18, %s16_s18  }
   0x2   : > { %p192_p1 = scmp.lt.s32.totalorder %s1805_s18, 3 }
   0x4   : > { %p193_p2 = pnand %p1669_p0, %p192_p1 }
   0x5   : > { %p226_p3 = scmp.lt.s32.totalorder (!%p193_p2), %s1665_s19, 1  ;;  %s1808_s24 = smov (!%p193_p2), 4  }
   0x6   : > { %196 = sbr.rel (%p193_p2) target bundleno = 559 (0x22f), region = 32  ;;  %s1809_s25 = smov (!%p193_p2), 8  }
   0xb   : > { %vm274_vm0 = vcmask 31744   ;;  %v1807_v0 = vmov 0.0   ;;  %s2609_s19 = smov (!%p226_p3, %s1665_s19), 1  ;;  %vm283_vm1 = vcmask 24576   ;;  %vm277_vm2 = vcmask 25600   ;;  %v1674_v62 = vld [vmem:[%s2603_s1 + $0x10] sm:$0xff] }
   0xc   : > { %275 = vst.msk [vmem:[#allocation2] sm:$0xff] %vm274_vm0, %v1807_v0  ;;  %s1779_s20 = sshll.u32 %s2609_s19, 8  ;;  %v1675_v58 = vld [vmem:[%s2603_s1 + $0x18] sm:$0xf]  ;;  %vm924_vm3 = vcmask 1043456   ;;  %v822_v63 = vld [vmem:[%s2603_s1] sm:$0xff]  ;;  %s238_s22 = scalar_lea.vmem %s2606_s4, %s2609_s19 }
   0xd   : > { %276 = vst.msk [vmem:[#allocation2 + $0x8] sm:$0xff] %vm274_vm0, %v1807_v0  ;;  %s1864_s23 = scalar_lea.vmem %s2602_s0, %s1779_s20  ;;  %v823_v59 = vld [vmem:[%s2603_s1 + $0x8] sm:$0xf]  ;;  %1676 = vmatpush.msk.msra.mxu0 %vm924_vm3, %v1675_v58  ;;  %1781 = vmatpush.msk.msra.mxu3 %vm924_vm3, %v1675_v58  ;;  %vm785_vm4 = vcmask 64512   ;;  %vm827_vm5 = vcmask 97280   ;;  %s2260_s17 = scalar_lea.vmem %s2605_s3, %s1779_s20 }
   0xe   : > { %280 = vst.msk [vmem:[#allocation2 + $0x198] sm:$0xff] %vm274_vm0, %v1807_v0  ;;  %v244_v1 = vld [vmem:[%s1864_s23 + $0x10] sm:$0xff]  ;;  %v242_v2 = vld [vmem:[%s1864_s23] sm:$0xff]  ;;  %v245_v3 = vld [vmem:[%s1864_s23 + $0x18] sm:$0xff]  ;;  %1709 = vmatpush.msk.msra.mxu1 %vm924_vm3, %v823_v59 }
   0xf   : > { %281 = vst.msk [vmem:[#allocation2 + $0x1a0] sm:$0xff] %vm274_vm0, %v1807_v0  ;;  %v243_v11 = vld [vmem:[%s1864_s23 + $0x8] sm:$0xff]  ;;  %v246_v12 = vld [vmem:[%s1864_s23 + $0x20] sm:$0xff]  ;;  %v268_v16 = vld [vmem:[%s1864_s23 + $0xd0] sm:$0xff]  ;;  %943 = vmatpush.msra.mxu0 %v1674_v62  ;;  %1782 = vmatpush.msra.mxu3 %v1674_v62 }
  0x10   : > { %304 = vst.msk [vmem:[#allocation2 + $0x41] sm:$0x1] %vm283_vm1, %v1807_v0  ;;  %v266_v13 = vld [vmem:[%s1864_s23 + $0xc0] sm:$0xff]  ;;  %v267_v14 = vld [vmem:[%s1864_s23 + $0xc8] sm:$0xff]  ;;  %v248_v17 = vld [vmem:[%s1864_s23 + $0x30] sm:$0xff]  ;;  %1065 = vmatpush.msra.mxu1 %v822_v63 }
  0x11   : > { %284 = vst.msk [vmem:[#allocation2] sm:$0x1] %vm283_vm1, %v1807_v0  ;;  %v247_v15 = vld [vmem:[%s1864_s23 + $0x28] sm:$0xff]  ;;  %v249_v19 = vld [vmem:[%s1864_s23 + $0x38] sm:$0xff]  ;;  %v250_v27 = vld [vmem:[%s1864_s23 + $0x40] sm:$0xff]  ;;  %1783 = vmatpush.msk.msrb.mxu3 %vm924_vm3, %v823_v59 }
  0x12   : > { %323 = vst.msk [vmem:[#allocation2 + $0x31] sm:$0xff] %vm274_vm0, %v244_v1  ;;  %v269_v23 = vld [vmem:[%s1864_s23 + $0xd8] sm:$0xff]  ;;  %v251_v30 = vld [vmem:[%s1864_s23 + $0x48] sm:$0xff]  ;;  %v270_v32 = vld [vmem:[%s1864_s23 + $0xe0] sm:$0xff] }
  0x13   : > { %321 = vst.msk [vmem:[#allocation2 + $0x19] sm:$0xff] %vm274_vm0, %v242_v2  ;;  %v271_v33 = vld [vmem:[%s1864_s23 + $0xe8] sm:$0xff]  ;;  %v252_v39 = vld [vmem:[%s1864_s23 + $0x50] sm:$0xff]  ;;  %v273_v44 = vld [vmem:[%s1864_s23 + $0xf8] sm:$0xff]  ;;  %1784 = vmatpush.msrb.mxu3 %v822_v63 }
  0x14   : > { %v389_v4 = vld [vmem:[#allocation2 + $0x1] sm:$0xff]  ;;  %324 = vst.msk [vmem:[#allocation2 + $0x39] sm:$0xff] %vm274_vm0, %v245_v3  ;;  %v272_v41 = vld [vmem:[%s1864_s23 + $0xf0] sm:$0xff]  ;;  %v253_v46 = vld [vmem:[%s1864_s23 + $0x58] sm:$0xff] }
  0x15   : > { %497 = vrot.lane.b32.xlu1 %v389_v4, %s1808_s24  ;;  %285 = vst.msk [vmem:[#allocation2 + $0x18] sm:$0x1] %vm283_vm1, %v1807_v0  ;;  %v425_v7 = vld [vmem:[#allocation2 + $0x2] sm:$0xff]  ;;  %v264_v52 = vld [vmem:[%s1864_s23 + $0xb0] sm:$0xff]  ;;  %v265_v1 = vld [vmem:[%s1864_s23 + $0xb8] sm:$0xff] }
  0x16   : > { %286 = vst.msk [vmem:[#allocation2 + $0x30] sm:$0x1] %vm283_vm1, %v1807_v0  ;;  %641 = vrot.lane.b32.xlu2 %v425_v7, %s1809_s25  ;;  %v254_v54 = vld [vmem:[%s1864_s23 + $0x60] sm:$0xff]  ;;  %v255_v55 = vld [vmem:[%s1864_s23 + $0x68] sm:$0xff] }
  0x17   : > { %287 = vst.msk [vmem:[#allocation2 + $0x48] sm:$0x1] %vm283_vm1, %v1807_v0  ;;  %v2031_v61 = vld [vmem:[%s2603_s1 + $0x28] sm:$0xf] }
  0x18   : > { %288 = vst.msk [vmem:[#allocation2 + $0x60] sm:$0x1] %vm283_vm1, %v1807_v0  ;;  %1744 = vmatpush.msk.msra.mxu2 %vm924_vm3, %v2031_v61  ;;  %v353_v2 = vld [vmem:[#allocation2] sm:$0xff] }
  0x19   : > { %v393_v5 = vld [vmem:[#allocation2 + $0x31] sm:$0xff]  ;;  %289 = vst.msk [vmem:[#allocation2 + $0x78] sm:$0x1] %vm283_vm1, %v1807_v0 }
  0x1a   : > { %505 = vrot.lane.b32.xlu0 %v393_v5, %s1808_s24  ;;  %v391_v6 = vld [vmem:[#allocation2 + $0x19] sm:$0xff]  ;;  %290 = vst.msk [vmem:[#allocation2 + $0x90] sm:$0x1] %vm283_vm1, %v1807_v0 }
  0x1b   : > { %291 = vst.msk [vmem:[#allocation2 + $0xa8] sm:$0x1] %vm283_vm1, %v1807_v0  ;;  %v429_v8 = vld [vmem:[#allocation2 + $0x32] sm:$0xff]  ;;  %v430_v9 = vld [vmem:[#allocation2 + $0x3a] sm:$0xff] }
  0x1c   : > { %292 = vst.msk [vmem:[#allocation2 + $0xc0] sm:$0x1] %vm283_vm1, %v1807_v0  ;;  %v394_v10 = vld [vmem:[#allocation2 + $0x39] sm:$0xff] }
  0x1d   : > { %501 = vrot.lane.b32.xlu1 %v391_v6, %s1808_s24  ;;  %293 = vst.msk [vmem:[#allocation2 + $0xd8] sm:$0x1] %vm283_vm1, %v1807_v0 }
  0x1e   : > { %294 = vst.msk [vmem:[#allocation2 + $0xf0] sm:$0x1] %vm283_vm1, %v1807_v0 }
  0x1f   : > { %295 = vst.msk [vmem:[#allocation2 + $0x108] sm:$0x1] %vm283_vm1, %v1807_v0 }
  0x20   : > { %296 = vst.msk [vmem:[#allocation2 + $0x120] sm:$0x1] %vm283_vm1, %v1807_v0 }
  0x21   : > { %297 = vst.msk [vmem:[#allocation2 + $0x138] sm:$0x1] %vm283_vm1, %v1807_v0 }
  0x22   : > { %649 = vrot.lane.b32.xlu0 %v429_v8, %s1809_s25  ;;  %298 = vst.msk [vmem:[#allocation2 + $0x150] sm:$0x1] %vm283_vm1, %v1807_v0 }
  0x23   : > { %299 = vst.msk [vmem:[#allocation2 + $0x168] sm:$0x1] %vm283_vm1, %v1807_v0 }
  0x24   : > { %300 = vst.msk [vmem:[#allocation2 + $0x180] sm:$0x1] %vm283_vm1, %v1807_v0 }
  0x25   : > { %651 = vrot.lane.b32.xlu1 %v430_v9, %s1809_s25  ;;  %301 = vst.msk [vmem:[#allocation2 + $0x198] sm:$0x1] %vm283_vm1, %v1807_v0 }
  0x26   : > { %303 = vst.msk [vmem:[#allocation2 + $0x29] sm:$0x1] %vm283_vm1, %v1807_v0 }
  0x27   : > { %305 = vst.msk [vmem:[#allocation2 + $0x59] sm:$0x1] %vm283_vm1, %v1807_v0 }
  0x28   : > { %306 = vst.msk [vmem:[#allocation2 + $0x71] sm:$0x1] %vm283_vm1, %v1807_v0 }
  0x29   : > { %307 = vst.msk [vmem:[#allocation2 + $0x89] sm:$0x1] %vm283_vm1, %v1807_v0 }
  0x2a   : > { %308 = vst.msk [vmem:[#allocation2 + $0xa1] sm:$0x1] %vm283_vm1, %v1807_v0  ;;  %507 = vrot.lane.b32.xlu0 %v394_v10, %s1808_s24  ;;  %v256_v10 = vld [vmem:[%s1864_s23 + $0x70] sm:$0xff] }
  0x2b   : > { %309 = vst.msk [vmem:[#allocation2 + $0xb9] sm:$0x1] %vm283_vm1, %v1807_v0 }
  0x2c   : > { %310 = vst.msk [vmem:[#allocation2 + $0xd1] sm:$0x1] %vm283_vm1, %v1807_v0 }
  0x2d   : > { %311 = vst.msk [vmem:[#allocation2 + $0xe9] sm:$0x1] %vm283_vm1, %v1807_v0 }
  0x2e   : > { %312 = vst.msk [vmem:[#allocation2 + $0x101] sm:$0x1] %vm283_vm1, %v1807_v0 }
  0x2f   : > { %313 = vst.msk [vmem:[#allocation2 + $0x119] sm:$0x1] %vm283_vm1, %v1807_v0 }
  0x30   : > { %314 = vst.msk [vmem:[#allocation2 + $0x131] sm:$0x1] %vm283_vm1, %v1807_v0 }
  0x31   : > { %315 = vst.msk [vmem:[#allocation2 + $0x149] sm:$0x1] %vm283_vm1, %v1807_v0 }
  0x32   : > { %316 = vst.msk [vmem:[#allocation2 + $0x161] sm:$0x1] %vm283_vm1, %v1807_v0 }
  0x33   : > { %317 = vst.msk [vmem:[#allocation2 + $0x179] sm:$0x1] %vm283_vm1, %v1807_v0 }
  0x34   : > { %318 = vst.msk [vmem:[#allocation2 + $0x191] sm:$0x1] %vm283_vm1, %v1807_v0 }
  0x35   : > { %278 = vst.msk [vmem:[#allocation2 + $0x10] sm:$0x3] %vm277_vm2, %v1807_v0 }
  0x36   : > { %302 = vst.msk [vmem:[#allocation2 + $0x11] sm:$0x1] %vm283_vm1, %v1807_v0 }
  0x37   : > { %282 = vst.msk [vmem:[#allocation2 + $0x1a8] sm:$0x3] %vm277_vm2, %v1807_v0 }
  0x38   : > { %319 = vst.msk [vmem:[#allocation2 + $0x1a9] sm:$0x1] %vm283_vm1, %v1807_v0  ;;  %v2044_v0 = vld [vmem:[%s2603_s1 + $0x20] sm:$0xff] }
  0x39   : > { %322 = vst.msk [vmem:[#allocation2 + $0x21] sm:$0xff] %vm274_vm0, %v243_v11  ;;  %1190 = vmatpush.msra.mxu2 %v2044_v0 }
  0x3a   : > { %325 = vst.msk [vmem:[#allocation2 + $0x49] sm:$0xff] %vm274_vm0, %v246_v12 }
  0x3b   : > { %345 = vst.msk [vmem:[#allocation2 + $0x139] sm:$0xff] %vm274_vm0, %v266_v13 }
  0x3c   : > { %346 = vst.msk [vmem:[#allocation2 + $0x141] sm:$0xff] %vm274_vm0, %v267_v14  ;;  %v390_v25 = vld [vmem:[#allocation2 + $0x9] sm:$0xff] }
  0x3d   : > { %v426_v18 = vld [vmem:[#allocation2 + $0xa] sm:$0xff]  ;;  %326 = vst.msk [vmem:[#allocation2 + $0x51] sm:$0xff] %vm274_vm0, %v247_v15 }
  0x3e   : > { %643 = vrot.lane.b32.xlu1 %v426_v18, %s1809_s25  ;;  %347 = vst.msk [vmem:[#allocation2 + $0x151] sm:$0xff] %vm274_vm0, %v268_v16  ;;  %v357_v14 = vld [vmem:[#allocation2 + $0x30] sm:$0xff] }
  0x3f   : > { %327 = vst.msk [vmem:[#allocation2 + $0x61] sm:$0xff] %vm274_vm0, %v248_v17  ;;  %v257_v17 = vld [vmem:[%s1864_s23 + $0x78] sm:$0xff] }
  0x40   : > { %v392_v20 = vld [vmem:[#allocation2 + $0x21] sm:$0xff]  ;;  %328 = vst.msk [vmem:[#allocation2 + $0x69] sm:$0xff] %vm274_vm0, %v249_v19 }
  0x41   : > { %v427_v21 = vld [vmem:[#allocation2 + $0x1a] sm:$0xff]  ;;  %503 = vrot.lane.b32.xlu0 %v392_v20, %s1808_s24  ;;  %348 = vst.msk [vmem:[#allocation2 + $0x159] sm:$0xff] %vm274_vm0, %v269_v23  ;;  %v395_v24 = vld [vmem:[#allocation2 + $0x49] sm:$0xff] }
  0x42   : > { %645 = vrot.lane.b32.xlu2 %v427_v21, %s1809_s25  ;;  %v415_v22 = vld [vmem:[#allocation2 + $0x139] sm:$0xff]  ;;  %329 = vst.msk [vmem:[#allocation2 + $0x79] sm:$0xff] %vm274_vm0, %v250_v27  ;;  %v428_v29 = vld [vmem:[#allocation2 + $0x22] sm:$0xff] }
  0x43   : > { %v451_v28 = vld [vmem:[#allocation2 + $0x13a] sm:$0xff]  ;;  %330 = vst.msk [vmem:[#allocation2 + $0x81] sm:$0xff] %vm274_vm0, %v251_v30  ;;  %v452_v31 = vld [vmem:[#allocation2 + $0x142] sm:$0xff] }
  0x44   : > { %v396_v26 = vld [vmem:[#allocation2 + $0x51] sm:$0xff]  ;;  %349 = vst.msk [vmem:[#allocation2 + $0x169] sm:$0xff] %vm274_vm0, %v270_v32  ;;  %v416_v38 = vld [vmem:[#allocation2 + $0x141] sm:$0xff] }
  0x45   : > { %350 = vst.msk [vmem:[#allocation2 + $0x171] sm:$0xff] %vm274_vm0, %v271_v33  ;;  %v432_v34 = vld [vmem:[#allocation2 + $0x52] sm:$0xff]  ;;  %v431_v35 = vld [vmem:[#allocation2 + $0x4a] sm:$0xff]  ;;  %v258_v30 = vld [vmem:[%s1864_s23 + $0x80] sm:$0xff] }
  0x46   : > { %549 = vrot.lane.b32.xlu1 %v415_v22, %s1808_s24  ;;  %v417_v37 = vld [vmem:[#allocation2 + $0x151] sm:$0xff]  ;;  %331 = vst.msk [vmem:[#allocation2 + $0x91] sm:$0xff] %vm274_vm0, %v252_v39  ;;  %v397_v43 = vld [vmem:[#allocation2 + $0x61] sm:$0xff] }
  0x47   : > { %v433_v36 = vld [vmem:[#allocation2 + $0x62] sm:$0xff]  ;;  %351 = vst.msk [vmem:[#allocation2 + $0x181] sm:$0xff] %vm274_vm0, %v272_v41  ;;  %v434_v51 = vld [vmem:[#allocation2 + $0x6a] sm:$0xff]  ;;  %v355_v22 = vld [vmem:[#allocation2 + $0x18] sm:$0xff] }
  0x48   : > { %v418_v40 = vld [vmem:[#allocation2 + $0x159] sm:$0xff]  ;;  %v398_v42 = vld [vmem:[#allocation2 + $0x69] sm:$0xff]  ;;  %352 = vst.msk [vmem:[#allocation2 + $0x189] sm:$0xff] %vm274_vm0, %v273_v44 }
  0x49   : > { %509 = vrot.lane.b32.xlu0 %v395_v24, %s1808_s24  ;;  %v399_v45 = vld [vmem:[#allocation2 + $0x79] sm:$0xff]  ;;  %332 = vst.msk [vmem:[#allocation2 + $0x99] sm:$0xff] %vm274_vm0, %v253_v46  ;;  %v354_v41 = vld [vmem:[#allocation2 + $0x8] sm:$0xff]  ;;  %v260_v44 = vld [vmem:[%s1864_s23 + $0x90] sm:$0xff] }
  0x4a   : > { %499 = vrot.lane.b32.xlu2 %v390_v25, %s1808_s24  ;;  %v454_v47 = vld [vmem:[#allocation2 + $0x15a] sm:$0xff]  ;;  %v453_v48 = vld [vmem:[#allocation2 + $0x152] sm:$0xff]  ;;  %v436_v53 = vld [vmem:[#allocation2 + $0x82] sm:$0xff]  ;;  %343 = vst.msk [vmem:[#allocation2 + $0x121] sm:$0xff] %vm274_vm0, %v264_v52 }
  0x4b   : > { %v435_v50 = vld [vmem:[#allocation2 + $0x7a] sm:$0xff]  ;;  %333 = vst.msk [vmem:[#allocation2 + $0xa9] sm:$0xff] %vm274_vm0, %v254_v54  ;;  %v419_v57 = vld [vmem:[#allocation2 + $0x169] sm:$0xff] }
  0x4c   : > { %v455_v49 = vld [vmem:[#allocation2 + $0x16a] sm:$0xff]  ;;  %334 = vst.msk [vmem:[#allocation2 + $0xb1] sm:$0xff] %vm274_vm0, %v255_v55  ;;  %v400_v4 = vld [vmem:[#allocation2 + $0x81] sm:$0xff]  ;;  %v456_v13 = vld [vmem:[#allocation2 + $0x172] sm:$0xff] }
  0x4d   : > { %v420_v56 = vld [vmem:[#allocation2 + $0x171] sm:$0xff]  ;;  %344 = vst.msk [vmem:[#allocation2 + $0x129] sm:$0xff] %vm274_vm0, %v265_v1  ;;  %v262_v1 = vld [vmem:[%s1864_s23 + $0xa0] sm:$0xff] }
  0x4e   : > { %511 = vrot.lane.b32.xlu1 %v396_v26, %s1808_s24  ;;  %v421_v60 = vld [vmem:[#allocation2 + $0x181] sm:$0xff]  ;;  %v401_v3 = vld [vmem:[#allocation2 + $0x91] sm:$0xff]  ;;  %335 = vst.msk [vmem:[#allocation2 + $0xc1] sm:$0xff] %vm274_vm0, %v256_v10 }
  0x4f   : > { %v457_v12 = vld [vmem:[#allocation2 + $0x182] sm:$0xff]  ;;  %v458_v15 = vld [vmem:[#allocation2 + $0x18a] sm:$0xff]  ;;  %336 = vst.msk [vmem:[#allocation2 + $0xc9] sm:$0xff] %vm274_vm0, %v257_v17  ;;  %v358_v25 = vld [vmem:[#allocation2 + $0x38] sm:$0xff] }
  0x50   : > { %v402_v9 = vld [vmem:[#allocation2 + $0x99] sm:$0xff]  ;;  %337 = vst.msk [vmem:[#allocation2 + $0xd9] sm:$0xff] %vm274_vm0, %v258_v30  ;;  %v381_v30 = vld [vmem:[#allocation2 + $0x150] sm:$0xff] }
  0x51   : > { %693 = vrot.lane.b32.xlu0 %v451_v28, %s1809_s25  ;;  %v438_v21 = vld [vmem:[#allocation2 + $0x9a] sm:$0xff]  ;;  %v437_v23 = vld [vmem:[#allocation2 + $0x92] sm:$0xff]  ;;  %339 = vst.msk [vmem:[#allocation2 + $0xf1] sm:$0xff] %vm274_vm0, %v260_v44 }
  0x52   : > { %647 = vrot.lane.b32.xlu2 %v428_v29, %s1809_s25  ;;  %341 = vst.msk [vmem:[#allocation2 + $0x109] sm:$0xff] %vm274_vm0, %v262_v1 }
  0x53   : > { %v439_v26 = vld [vmem:[#allocation2 + $0xaa] sm:$0xff]  ;;  %v440_v58 = vld [vmem:[#allocation2 + $0xb2] sm:$0xff] }
  0x54   : > { %v404_v39 = vld [vmem:[#allocation2 + $0xb1] sm:$0xff] }
  0x56   : > { %695 = vrot.lane.b32.xlu1 %v452_v31, %s1809_s25  ;;  %v259_v31 = vld [vmem:[%s1864_s23 + $0x88] sm:$0xff] }
  0x57   : > { %338 = vst.msk [vmem:[#allocation2 + $0xe1] sm:$0xff] %vm274_vm0, %v259_v31 }
  0x58   : > { %v409_v17 = vld [vmem:[#allocation2 + $0xf1] sm:$0xff] }
  0x59   : > { %655 = vrot.lane.b32.xlu0 %v432_v34, %s1809_s25  ;;  %v413_v34 = vld [vmem:[#allocation2 + $0x121] sm:$0xff] }
  0x5a   : > { %653 = vrot.lane.b32.xlu2 %v431_v35, %s1809_s25  ;;  %v422_v35 = vld [vmem:[#allocation2 + $0x189] sm:$0xff] }
  0x5e   : > { %657 = vrot.lane.b32.xlu1 %v433_v36, %s1809_s25 }
  0x61   : > { %553 = vrot.lane.b32.xlu0 %v417_v37, %s1808_s24  ;;  %v414_v37 = vld [vmem:[#allocation2 + $0x129] sm:$0xff] }
  0x62   : > { %551 = vrot.lane.b32.xlu2 %v416_v38, %s1808_s24 }
  0x66   : > { %555 = vrot.lane.b32.xlu1 %v418_v40, %s1808_s24  ;;  %v403_v40 = vld [vmem:[#allocation2 + $0xa9] sm:$0xff] }
  0x69   : > { %515 = vrot.lane.b32.xlu0 %v398_v42, %s1808_s24  ;;  %v405_v42 = vld [vmem:[#allocation2 + $0xc1] sm:$0xff] }
  0x6a   : > { %513 = vrot.lane.b32.xlu2 %v397_v43, %s1808_s24 }
  0x6e   : > { %517 = vrot.lane.b32.xlu1 %v399_v45, %s1808_s24  ;;  %v261_v45 = vld [vmem:[%s1864_s23 + $0x98] sm:$0xff] }
  0x6f   : > { %340 = vst.msk [vmem:[#allocation2 + $0xf9] sm:$0xff] %vm274_vm0, %v261_v45  ;;  %v382_v45 = vld [vmem:[#allocation2 + $0x158] sm:$0xff] }
  0x70   : > { %v642_v7 = vpop.permute.xlu2 %641 }
  0x71   : > { %699 = vrot.lane.b32.xlu0 %v454_v47, %s1809_s25  ;;  %v450_v47 = vld [vmem:[#allocation2 + $0x12a] sm:$0xff] }
  0x72   : > { %697 = vrot.lane.b32.xlu2 %v453_v48, %s1809_s25  ;;  %v449_v48 = vld [vmem:[#allocation2 + $0x122] sm:$0xff] }
  0x76   : > { %701 = vrot.lane.b32.xlu1 %v455_v49, %s1809_s25 }
  0x79   : > { %661 = vrot.lane.b32.xlu0 %v435_v50, %s1809_s25 }
  0x7a   : > { %659 = vrot.lane.b32.xlu2 %v434_v51, %s1809_s25  ;;  %v356_v51 = vld [vmem:[#allocation2 + $0x20] sm:$0xff] }
  0x7e   : > { %663 = vrot.lane.b32.xlu1 %v436_v53, %s1809_s25  ;;  %v442_v53 = vld [vmem:[#allocation2 + $0xca] sm:$0xff] }
  0x81   : > { %559 = vrot.lane.b32.xlu0 %v420_v56, %s1808_s24 }
  0x82   : > { %557 = vrot.lane.b32.xlu2 %v419_v57, %s1808_s24  ;;  %v406_v57 = vld [vmem:[#allocation2 + $0xc9] sm:$0xff] }
  0x86   : > { %561 = vrot.lane.b32.xlu1 %v421_v60, %s1808_s24  ;;  %v359_v60 = vld [vmem:[#allocation2 + $0x48] sm:$0xff] }
  0x87   : > { %v498_v5 = vpop.permute.xlu1 %497 }
  0x88   : > { %v749_v6 = vsel %vm274_vm0, %v353_v2, %v498_v5  ;;  %v379_v5 = vld [vmem:[#allocation2 + $0x138] sm:$0xff] }
  0x89   : > { %521 = vrot.lane.b32.xlu0 %v401_v3, %s1808_s24  ;;  %v786_v8 = vsel %vm785_vm4, %v749_v6, %v642_v7  ;;  %v408_v3 = vld [vmem:[#allocation2 + $0xe1] sm:$0xff] }
  0x8a   : > { %519 = vrot.lane.b32.xlu2 %v400_v4, %s1808_s24  ;;  %1710 = vmatmul.msk.f32.vlgmr.msra.gmra.mxu1 %vm827_vm5, %v786_v8  ;;  %v443_v6 = vld [vmem:[#allocation2 + $0xda] sm:$0xff]  ;;  %v441_v7 = vld [vmem:[#allocation2 + $0xc2] sm:$0xff] }
  0x8c   : > { %v506_v11 = vpop.permute.xlu0 %505 }
  0x8d   : > { %v753_v18 = vsel %vm274_vm0, %v357_v14, %v506_v11  ;;  %v445_v14 = vld [vmem:[#allocation2 + $0xf2] sm:$0xff] }
  0x8e   : > { %523 = vrot.lane.b32.xlu1 %v402_v9, %s1808_s24 }
  0x8f   : > { %v502_v16 = vpop.permute.xlu1 %501 }
  0x90   : > { %v751_v24 = vsel %vm274_vm0, %v355_v22, %v502_v16  ;;  %v360_v16 = vld [vmem:[#allocation2 + $0x50] sm:$0xff] }
  0x91   : > { %705 = vrot.lane.b32.xlu0 %v457_v12, %s1809_s25  ;;  %v380_v12 = vld [vmem:[#allocation2 + $0x140] sm:$0xff] }
  0x92   : > { %703 = vrot.lane.b32.xlu2 %v456_v13, %s1809_s25 }
  0x94   : > { %v650_v19 = vpop.permute.xlu0 %649 }
  0x95   : > { %v2066_v20 = vsel %vm785_vm4, %v753_v18, %v650_v19  ;;  %v407_v18 = vld [vmem:[#allocation2 + $0xd9] sm:$0xff] }
  0x96   : > { %707 = vrot.lane.b32.xlu1 %v458_v15, %s1809_s25  ;;  %1745 = vmatmul.msk.f32.vlgmr.msra.gmra.mxu2 %vm827_vm5, %v2066_v20  ;;  %v263_v15 = vld [vmem:[%s1864_s23 + $0xa8] sm:$0xff] }
  0x97   : > { %v652_v32 = vpop.permute.xlu1 %651  ;;  %342 = vst.msk [vmem:[#allocation2 + $0x111] sm:$0xff] %vm274_vm0, %v263_v15 }
  0x99   : > { %667 = vrot.lane.b32.xlu0 %v438_v21, %s1809_s25 }
  0x9a   : > { %665 = vrot.lane.b32.xlu2 %v437_v23, %s1809_s25 }
  0x9c   : > { %v646_v27 = vpop.permute.xlu2 %645  ;;  %v508_v29 = vpop.permute.xlu0 %507 }
  0x9d   : > { %v788_v28 = vsel %vm785_vm4, %v751_v24, %v646_v27  ;;  %v754_v33 = vsel %vm274_vm0, %v358_v25, %v508_v29  ;;  %v361_v25 = vld [vmem:[#allocation2 + $0x60] sm:$0xff]  ;;  %v411_v27 = vld [vmem:[#allocation2 + $0x109] sm:$0xff] }
  0x9e   : > { %1677 = vmatmul.msk.f32.vlgmr.msra.gmra.mxu0 %vm827_vm5, %v788_v28  ;;  %669 = vrot.lane.b32.xlu1 %v439_v26, %s1809_s25  ;;  %v2082_v36 = vsel %vm785_vm4, %v754_v33, %v652_v32 }
  0x9f   : > { %1746 = vmatmul.msk.f32.gmra.mxu2 %vm827_vm5, %v2082_v36 }
  0xa1   : > { %545 = vrot.lane.b32.xlu0 %v413_v34, %s1808_s24 }
  0xa2   : > { %563 = vrot.lane.b32.xlu2 %v422_v35, %s1808_s24  ;;  %v448_v35 = vld [vmem:[#allocation2 + $0x112] sm:$0xff] }
  0xa4   : > { %v500_v38 = vpop.permute.xlu2 %499 }
  0xa5   : > { %v750_v46 = vsel %vm274_vm0, %v354_v41, %v500_v38  ;;  %v412_v38 = vld [vmem:[#allocation2 + $0x111] sm:$0xff] }
  0xa6   : > { %547 = vrot.lane.b32.xlu1 %v414_v37, %s1808_s24 }
  0xa9   : > { %527 = vrot.lane.b32.xlu0 %v404_v39, %s1808_s24  ;;  %v410_v39 = vld [vmem:[#allocation2 + $0xf9] sm:$0xff] }
  0xaa   : > { %525 = vrot.lane.b32.xlu2 %v403_v40, %s1808_s24  ;;  %v362_v40 = vld [vmem:[#allocation2 + $0x68] sm:$0xff] }
  0xac   : > { %v648_v43 = vpop.permute.xlu2 %647 }
  0xae   : > { %529 = vrot.lane.b32.xlu1 %v405_v42, %s1808_s24 }
  0xb0   : > { %v644_v49 = vpop.permute.xlu1 %643 }
  0xb1   : > { %v787_v50 = vsel %vm785_vm4, %v750_v46, %v644_v49  ;;  %691 = vrot.lane.b32.xlu0 %v450_v47, %s1809_s25  ;;  %v447_v46 = vld [vmem:[#allocation2 + $0x10a] sm:$0xff] }
  0xb2   : > { %689 = vrot.lane.b32.xlu2 %v449_v48, %s1809_s25  ;;  %1711 = vmatmul.msk.f32.gmra.mxu1 %vm827_vm5, %v787_v50 }
  0xb3   : > { %v504_v52 = vpop.permute.xlu0 %503 }
  0xb4   : > { %v654_v54 = vpop.permute.xlu2 %653  ;;  %v752_v55 = vsel %vm274_vm0, %v356_v51, %v504_v52  ;;  %v383_v51 = vld [vmem:[#allocation2 + $0x168] sm:$0xff] }
  0xb5   : > { %v789_v56 = vsel %vm785_vm4, %v752_v55, %v648_v43 }
  0xb6   : > { %1678 = vmatmul.msk.f32.gmra.mxu0 %vm827_vm5, %v789_v56  ;;  %675 = vrot.lane.b32.xlu1 %v442_v53, %s1809_s25  ;;  %v363_v53 = vld [vmem:[#allocation2 + $0x78] sm:$0xff] }
  0xb8   : > { %v550_v59 = vpop.permute.xlu1 %549 }
  0xb9   : > { %531 = vrot.lane.b32.xlu0 %v406_v57, %s1808_s24  ;;  %v775_v9 = vsel %vm274_vm0, %v379_v5, %v550_v59 }
  0xba   : > { %671 = vrot.lane.b32.xlu2 %v440_v58, %s1809_s25  ;;  %1712 = vmatmul.msk.f32.gmra.mxu1 %vm827_vm5, %v788_v28  ;;  %v444_v28 = vld [vmem:[#allocation2 + $0xe2] sm:$0xff] }
  0xbb   : > { %v510_v62 = vpop.permute.xlu0 %509 }
  0xbc   : > { %v552_v63 = vpop.permute.xlu2 %551  ;;  %v755_v2 = vsel %vm274_vm0, %v359_v60, %v510_v62  ;;  %v364_v60 = vld [vmem:[#allocation2 + $0x80] sm:$0xff] }
  0xbd   : > { %v2113_v4 = vsel %vm785_vm4, %v755_v2, %v654_v54  ;;  %v776_v19 = vsel %vm274_vm0, %v380_v12, %v552_v63  ;;  %v384_v2 = vld [vmem:[#allocation2 + $0x170] sm:$0xff] }
  0xbe   : > { %1679 = vmatmul.msk.f32.gmra.mxu0 %vm827_vm5, %v2066_v20  ;;  %1747 = vmatmul.msk.f32.gmra.mxu2 %vm827_vm5, %v2113_v4 }
  0xbf   : > { %535 = vrot.lane.b32.xlu1 %v408_v3, %s1808_s24 }
  0xc0   : > { %v512_v8 = vpop.permute.xlu1 %511 }
  0xc1   : > { %677 = vrot.lane.b32.xlu0 %v443_v6, %s1809_s25  ;;  %v756_v22 = vsel %vm274_vm0, %v360_v16, %v512_v8  ;;  %v385_v16 = vld [vmem:[#allocation2 + $0x180] sm:$0xff] }
  0xc2   : > { %673 = vrot.lane.b32.xlu2 %v441_v7, %s1809_s25  ;;  %1713 = vmatmul.msk.f32.gmra.mxu1 %vm827_vm5, %v789_v56 }
  0xc3   : > { %v694_v10 = vpop.permute.xlu0 %693 }
  0xc4   : > { %v514_v11 = vpop.permute.xlu2 %513  ;;  %v2125_v13 = vsel %vm785_vm4, %v775_v9, %v694_v10  ;;  %v365_v9 = vld [vmem:[#allocation2 + $0x90] sm:$0xff]  ;;  %v459_v10 = vld [vmem:[#allocation2 + $0x19a] sm:$0xff] }
  0xc5   : > { %1701 = vmatmul.msk.f32.vlgmr.msra.gmra.mxu3 %vm827_vm5, %v2125_v13 }
  0xc6   : > { %1680 = vmatmul.msk.f32.gmra.mxu0 %vm827_vm5, %v2082_v36  ;;  %1785 = vmatpush.msk.msra.mxu3 %vm924_vm3, %v2031_v61 }
  0xc7   : > { %681 = vrot.lane.b32.xlu1 %v445_v14, %s1809_s25 }
  0xc8   : > { %v696_v21 = vpop.permute.xlu1 %695  ;;  %1786 = vmatpush.msra.mxu3 %v2044_v0  ;;  %v446_v0 = vld [vmem:[#allocation2 + $0xfa] sm:$0xff] }
  0xc9   : > { %537 = vrot.lane.b32.xlu0 %v409_v17, %s1808_s24  ;;  %v2144_v23 = vsel %vm785_vm4, %v776_v19, %v696_v21  ;;  %v424_v19 = vld [vmem:[#allocation2 + $0x1a1] sm:$0xff] }
  0xca   : > { %533 = vrot.lane.b32.xlu2 %v407_v18, %s1808_s24  ;;  %1714 = vmatmul.msk.f32.gmra.mxu1 %vm827_vm5, %v2066_v20  ;;  %v757_v20 = vsel %vm274_vm0, %v361_v25, %v514_v11  ;;  %v366_v25 = vld [vmem:[#allocation2 + $0x98] sm:$0xff] }
  0xcb   : > { %v656_v61 = vpop.permute.xlu0 %655 }
  0xcc   : > { %v698_v24 = vpop.permute.xlu2 %697  ;;  %v793_v26 = vsel %vm785_vm4, %v756_v22, %v656_v61 }
  0xcd   : > { %1748 = vmatmul.msk.f32.gmra.mxu2 %vm827_vm5, %v793_v26  ;;  %1702 = vmatmul.msk.f32.gmra.mxu3 %vm827_vm5, %v2144_v23 }
  0xce   : > { %1681 = vmatmul.msk.f32.gmra.mxu0 %vm827_vm5, %v2113_v4 }
  0xcf   : > { %541 = vrot.lane.b32.xlu1 %v411_v27, %s1808_s24 }
  0xd0   : > { %v658_v29 = vpop.permute.xlu1 %657 }
  0xd1   : > { %683 = vrot.lane.b32.xlu0 %v446_v0, %s1809_s25  ;;  %v794_v31 = vsel %vm785_vm4, %v757_v20, %v658_v29  ;;  %v367_v29 = vld [vmem:[#allocation2 + $0xa8] sm:$0xff] }
  0xd2   : > { %679 = vrot.lane.b32.xlu2 %v444_v28, %s1809_s25  ;;  %1715 = vmatmul.msk.f32.gmra.mxu1 %vm827_vm5, %v2082_v36 }
  0xd3   : > { %v554_v32 = vpop.permute.xlu0 %553 }
  0xd4   : > { %v660_v33 = vpop.permute.xlu2 %659  ;;  %v777_v34 = vsel %vm274_vm0, %v381_v30, %v554_v32 }
  0xd5   : > { %1749 = vmatmul.msk.f32.gmra.mxu2 %vm827_vm5, %v794_v31  ;;  %v2162_v37 = vsel %vm785_vm4, %v777_v34, %v698_v24  ;;  %v386_v24 = vld [vmem:[#allocation2 + $0x188] sm:$0xff] }
  0xd6   : > { %1682 = vmatmul.msk.f32.gmra.mxu0 %vm827_vm5, %v793_v26  ;;  %1703 = vmatmul.msk.f32.gmra.mxu3 %vm827_vm5, %v2162_v37 }
  0xd7   : > { %687 = vrot.lane.b32.xlu1 %v448_v35, %s1809_s25  ;;  %v377_v35 = vld [vmem:[#allocation2 + $0x120] sm:$0xff] }
  0xd8   : > { %v556_v36 = vpop.permute.xlu1 %555 }
  0xd9   : > { %543 = vrot.lane.b32.xlu0 %v412_v38, %s1808_s24  ;;  %v778_v48 = vsel %vm274_vm0, %v382_v45, %v556_v36 }
  0xda   : > { %539 = vrot.lane.b32.xlu2 %v410_v39, %s1808_s24  ;;  %1716 = vmatmul.msk.f32.gmra.mxu1 %vm827_vm5, %v2113_v4 }
  0xdb   : > { %v516_v41 = vpop.permute.xlu0 %515 }
  0xdc   : > { %v558_v42 = vpop.permute.xlu2 %557  ;;  %v758_v43 = vsel %vm274_vm0, %v362_v40, %v516_v41 }
  0xdd   : > { %v795_v44 = vsel %vm785_vm4, %v758_v43, %v660_v33  ;;  %v779_v54 = vsel %vm274_vm0, %v383_v51, %v558_v42  ;;  %v423_v33 = vld [vmem:[#allocation2 + $0x199] sm:$0xff] }
  0xde   : > { %1683 = vmatmul.msk.f32.gmra.mxu0 %vm827_vm5, %v794_v31  ;;  %1750 = vmatmul.msk.f32.gmra.mxu2 %vm827_vm5, %v795_v44 }
  0xdf   : > { %567 = vrot.lane.b32.xlu1 %v424_v19, %s1808_s24 }
  0xe0   : > { %v518_v47 = vpop.permute.xlu1 %517 }
  0xe1   : > { %v759_v56 = vsel %vm274_vm0, %v363_v53, %v518_v47  ;;  %709 = vrot.lane.b32.xlu0 %v459_v10, %s1809_s25  ;;  %v371_v10 = vld [vmem:[#allocation2 + $0xd8] sm:$0xff] }
  0xe2   : > { %685 = vrot.lane.b32.xlu2 %v447_v46, %s1809_s25  ;;  %1717 = vmatmul.msk.f32.gmra.mxu1 %vm827_vm5, %v793_v26 }
  0xe3   : > { %v700_v49 = vpop.permute.xlu0 %699 }
  0xe4   : > { %v520_v50 = vpop.permute.xlu2 %519  ;;  %v2180_v52 = vsel %vm785_vm4, %v778_v48, %v700_v49  ;;  %v2248_v49 = vld [vmem:[%s2604_s2] ss:$0 sm:$0xff] }
  0xe5   : > { %1704 = vmatmul.msk.f32.gmra.mxu3 %vm827_vm5, %v2180_v52  ;;  %v760_v63 = vsel %vm274_vm0, %v364_v60, %v520_v50  ;;  %v460_v50 = vld [vmem:[#allocation2 + $0x1a2] sm:$0xff] }
  0xe6   : > { %1684 = vmatmul.msk.f32.gmra.mxu0 %vm827_vm5, %v795_v44 }
  0xe8   : > { %v702_v55 = vpop.permute.xlu1 %701 }
  0xe9   : > { %v2189_v57 = vsel %vm785_vm4, %v779_v54, %v702_v55  ;;  %v378_v55 = vld [vmem:[#allocation2 + $0x128] sm:$0xff] }
  0xea   : > { %1718 = vmatmul.msk.f32.gmra.mxu1 %vm827_vm5, %v794_v31  ;;  %565 = vrot.lane.b32.xlu2 %v423_v33, %s1808_s24 }
  0xeb   : > { %v662_v58 = vpop.permute.xlu0 %661 }
  0xec   : > { %v704_v59 = vpop.permute.xlu2 %703  ;;  %v796_v62 = vsel %vm785_vm4, %v759_v56, %v662_v58  ;;  %v369_v56 = vld [vmem:[#allocation2 + $0xc0] sm:$0xff] }
  0xed   : > { %1751 = vmatmul.msk.f32.gmra.mxu2 %vm827_vm5, %v796_v62  ;;  %1705 = vmatmul.msk.f32.gmra.mxu3 %vm827_vm5, %v2189_v57 }
  0xee   : > { %1685 = vmatmul.msk.f32.gmra.mxu0 %vm827_vm5, %v796_v62 }
  0xf0   : > { %v664_v1 = vpop.permute.xlu1 %663 }
  0xf1   : > { %v797_v3 = vsel %vm785_vm4, %v760_v63, %v664_v1 }
  0xf2   : > { %1719 = vmatmul.msk.f32.gmra.mxu1 %vm827_vm5, %v795_v44  ;;  %v368_v44 = vld [vmem:[#allocation2 + $0xb0] sm:$0xff]  ;;  %711 = vrot.lane.b32.xlu2 %v460_v50, %s1809_s25  ;;  %s241_s25 = scalar_lea.vmem %s2607_s5, %s2609_s19 }
  0xf3   : > { %v560_v4 = vpop.permute.xlu0 %559 }
  0xf4   : > { %v666_v5 = vpop.permute.xlu2 %665  ;;  %v780_v6 = vsel %vm274_vm0, %v384_v2, %v560_v4  ;;  %v370_v4 = vld [vmem:[#allocation2 + $0xc8] sm:$0xff] }
  0xf5   : > { %1752 = vmatmul.msk.f32.gmra.mxu2 %vm827_vm5, %v797_v3  ;;  %v2202_v7 = vsel %vm785_vm4, %v780_v6, %v704_v59 }
  0xf6   : > { %1686 = vmatmul.msk.f32.gmra.mxu0 %vm827_vm5, %v797_v3  ;;  %1706 = vmatmul.msk.f32.gmra.mxu3 %vm827_vm5, %v2202_v7 }
  0xf8   : > { %v562_v8 = vpop.permute.xlu1 %561 }
  0xf9   : > { %v781_v18 = vsel %vm274_vm0, %v385_v16, %v562_v8 }
  0xfa   : > { %1720 = vmatmul.msk.f32.gmra.mxu1 %vm827_vm5, %v796_v62 }
  0xfb   : > { %v522_v11 = vpop.permute.xlu0 %521 }
  0xfc   : > { %v564_v12 = vpop.permute.xlu2 %563  ;;  %v761_v14 = vsel %vm274_vm0, %v365_v9, %v522_v11 }
  0xfd   : > { %v798_v15 = vsel %vm785_vm4, %v761_v14, %v666_v5  ;;  %v782_v26 = vsel %vm274_vm0, %v386_v24, %v564_v12 }
  0xfe   : > { %1687 = vmatmul.msk.f32.gmra.mxu0 %vm827_vm5, %v798_v15  ;;  %1753 = vmatmul.msk.f32.gmra.mxu2 %vm827_vm5, %v798_v15 }
 0x100   : > { %v524_v17 = vpop.permute.xlu1 %523 }
 0x101   : > { %v762_v0 = vsel %vm274_vm0, %v366_v25, %v524_v17 }
 0x102   : > { %1721 = vmatmul.msk.f32.gmra.mxu1 %vm827_vm5, %v797_v3 }
 0x103   : > { %v706_v21 = vpop.permute.xlu0 %705 }
 0x104   : > { %v526_v22 = vpop.permute.xlu2 %525  ;;  %v2217_v61 = vsel %vm785_vm4, %v781_v18, %v706_v21  ;;  %v372_v21 = vld [vmem:[#allocation2 + $0xe0] sm:$0xff] }
 0x105   : > { %1707 = vmatmul.msk.f32.gmra.mxu3 %vm827_vm5, %v2217_v61  ;;  %v763_v32 = vsel %vm274_vm0, %v367_v29, %v526_v22 }
 0x107   : > { %v1067_v43 = vpop.f32.mrf.mxu1 }
 0x108   : > { %v708_v27 = vpop.permute.xlu1 %707 }
 0x109   : > { %v2225_v20 = vsel %vm785_vm4, %v782_v26, %v708_v27 }
 0x10a   : > { %1722 = vmatmul.msk.f32.gmra.mxu1 %vm827_vm5, %v798_v15 }
 0x10b   : > { %v668_v28 = vpop.permute.xlu0 %667 }
 0x10c   : > { %v799_v30 = vsel %vm785_vm4, %v762_v0, %v668_v28  ;;  %v690_v31 = vpop.permute.xlu2 %689 }
 0x10d   : > { %1688 = vmatmul.msk.f32.gmra.mxu0 %vm827_vm5, %v799_v30  ;;  %1754 = vmatmul.msk.f32.gmra.mxu2 %vm827_vm5, %v799_v30 }
 0x10e   : > { %1708 = vmatmul.msk.f32.gmra.mxu3 %vm827_vm5, %v2225_v20 }
 0x110   : > { %v670_v34 = vpop.permute.xlu1 %669 }
 0x111   : > { %v800_v38 = vsel %vm785_vm4, %v763_v32, %v670_v34 }
 0x112   : > { %1723 = vmatmul.msk.f32.gmra.mxu1 %vm827_vm5, %v799_v30 }
 0x113   : > { %v546_v39 = vpop.permute.xlu0 %545 }
 0x114   : > { %v773_v36 = vsel %vm274_vm0, %v377_v35, %v546_v39  ;;  %v672_v41 = vpop.permute.xlu2 %671 }
 0x115   : > { %v2238_v40 = vsel %vm785_vm4, %v773_v36, %v690_v31  ;;  %1689 = vmatmul.msk.f32.gmra.mxu0 %vm827_vm5, %v800_v38  ;;  %1755 = vmatmul.msk.f32.gmra.mxu2 %vm827_vm5, %v800_v38  ;;  %v373_v36 = vld [vmem:[#allocation2 + $0xf0] sm:$0xff] }
 0x116   : > { %1734 = vmatmul.msk.f32.vlgmr.msrb.gmra.mxu3 %vm827_vm5, %v2238_v40 }
 0x118   : > { %v548_v42 = vpop.permute.xlu1 %547 }
 0x119   : > { %v1192_v46 = vpop.f32.mrf.mxu2  ;;  %v774_v62 = vsel %vm274_vm0, %v378_v55, %v548_v42 }
 0x11a   : > { %1724 = vmatmul.msk.f32.gmra.mxu1 %vm827_vm5, %v800_v38 }
 0x11b   : > { %v945_v45 = vpop.f32.mrf.mxu0  ;;  %v528_v47 = vpop.permute.xlu0 %527 }
 0x11c   : > { %v1068_v48 = vadd.f32 %v1067_v43, %v945_v45  ;;  %v764_v51 = vsel %vm274_vm0, %v368_v44, %v528_v47  ;;  %v674_v60 = vpop.permute.xlu2 %673 }
 0x11d   : > { %v801_v53 = vsel %vm785_vm4, %v764_v51, %v672_v41 }
 0x11e   : > { %v1288_v54 = vadd.f32 %v1192_v46, %v1068_v48  ;;  %1690 = vmatmul.msk.f32.gmra.mxu0 %vm827_vm5, %v801_v53  ;;  %1756 = vmatmul.msk.f32.gmra.mxu2 %vm827_vm5, %v801_v53 }
 0x120   : > { %v1324_v58 = vadd.f32 %v2248_v49, %v1288_v54  ;;  %v530_v59 = vpop.permute.xlu1 %529 }
 0x121   : > { %v765_v63 = vsel %vm274_vm0, %v369_v56, %v530_v59 }
 0x122   : > { %1528 = vst.msk [vmem:[%s2260_s17] sm:$0xff] %vm274_vm0, %v1324_v58  ;;  %1725 = vmatmul.msk.f32.gmra.mxu1 %vm827_vm5, %v801_v53  ;;  %v802_v2 = vsel %vm785_vm4, %v765_v63, %v674_v60  ;;  %v1195_v19 = vpop.f32.mrf.mxu2  ;;  %v1426_v26 = vmul.f32 %v1324_v58, %v1324_v58  ;;  %v1356_v29 = vsel %vm274_vm0, %v1324_v58, 0.0  ;;  %v374_v53 = vld [vmem:[#allocation2 + $0xf8] sm:$0xff] }
 0x123   : > { %v692_v1 = vpop.permute.xlu0 %691 }
 0x124   : > { %v2270_v3 = vsel %vm785_vm4, %v774_v62, %v692_v1  ;;  %v534_v11 = vpop.permute.xlu2 %533  ;;  %v1458_v35 = vsel %vm274_vm0, %v1426_v26, 0.0 }
 0x125   : > { %1735 = vmatmul.msk.f32.gmra.mxu3 %vm827_vm5, %v2270_v3  ;;  %v767_v14 = vsel %vm274_vm0, %v371_v10, %v534_v11 }
 0x126   : > { %1691 = vmatmul.msk.f32.gmra.mxu0 %vm827_vm5, %v802_v2  ;;  %1757 = vmatmul.msk.f32.gmra.mxu2 %vm827_vm5, %v802_v2 }
 0x128   : > { %v676_v5 = vpop.permute.xlu1 %675 }
 0x12a   : > { %1726 = vmatmul.msk.f32.gmra.mxu1 %vm827_vm5, %v802_v2 }
 0x12b   : > { %v532_v6 = vpop.permute.xlu0 %531 }
 0x12c   : > { %v766_v8 = vsel %vm274_vm0, %v370_v4, %v532_v6  ;;  %v680_v28 = vpop.permute.xlu2 %679 }
 0x12d   : > { %1736 = vmatmul.msk.f32.gmra.mxu3 %vm827_vm5, %v2125_v13  ;;  %v803_v9 = vsel %vm785_vm4, %v766_v8, %v676_v5  ;;  %v375_v5 = vld [vmem:[#allocation2 + $0x108] sm:$0xff] }
 0x12e   : > { %1692 = vmatmul.msk.f32.gmra.mxu0 %vm827_vm5, %v803_v9  ;;  %1758 = vmatmul.msk.f32.gmra.mxu2 %vm827_vm5, %v803_v9 }
 0x12f   : > { %v1070_v12 = vpop.f32.mrf.mxu1 }
 0x131   : > { %v536_v22 = vpop.permute.xlu1 %535 }
 0x132   : > { %1727 = vmatmul.msk.f32.gmra.mxu1 %vm827_vm5, %v803_v9  ;;  %v768_v0 = vsel %vm274_vm0, %v372_v21, %v536_v22  ;;  %v376_v22 = vld [vmem:[#allocation2 + $0x110] sm:$0xff] }
 0x133   : > { %v948_v15 = vpop.f32.mrf.mxu0  ;;  %v678_v16 = vpop.permute.xlu0 %677  ;;  %v805_v33 = vsel %vm785_vm4, %v768_v0, %v680_v28 }
 0x134   : > { %v1071_v17 = vadd.f32 %v1070_v12, %v948_v15  ;;  %v804_v18 = vsel %vm785_vm4, %v767_v14, %v678_v16  ;;  %v540_v54 = vpop.permute.xlu2 %539 }
 0x135   : > { %1737 = vmatmul.msk.f32.gmra.mxu3 %vm827_vm5, %v2144_v23  ;;  %v770_v62 = vsel %vm274_vm0, %v374_v53, %v540_v54 }
 0x136   : > { %v1289_v24 = vadd.f32 %v1195_v19, %v1071_v17  ;;  %1693 = vmatmul.msk.f32.gmra.mxu0 %vm827_vm5, %v804_v18  ;;  %1759 = vmatmul.msk.f32.gmra.mxu2 %vm827_vm5, %v804_v18 }
 0x137   : > { %v1073_v25 = vpop.f32.mrf.mxu1 }
 0x138   : > { %v1325_v27 = vadd.f32 %v2248_v49, %v1289_v24 }
 0x139   : > { %v682_v45 = vpop.permute.xlu1 %681 }
 0x13a   : > { %v1357_v30 = vsel %vm274_vm0, %v1325_v27, 0.0  ;;  %v1427_v31 = vmul.f32 %v1325_v27, %v1325_v27  ;;  %1529 = vst.msk [vmem:[%s2260_s17 + $0x8] sm:$0xff] %vm274_vm0, %v1325_v27  ;;  %1728 = vmatmul.msk.f32.gmra.mxu1 %vm827_vm5, %v804_v18 }
 0x13b   : > { %v951_v32 = vpop.f32.mrf.mxu0  ;;  %v1358_v34 = vadd.f32 %v1357_v30, %v1356_v29  ;;  %v538_v41 = vpop.permute.xlu0 %537 }
 0x13c   : > { %v1459_v38 = vsel %vm274_vm0, %v1427_v31, 0.0  ;;  %v1074_v43 = vadd.f32 %v1073_v25, %v951_v32  ;;  %v769_v44 = vsel %vm274_vm0, %v373_v36, %v538_v41  ;;  %v686_v12 = vpop.permute.xlu2 %685 }
 0x13d   : > { %1738 = vmatmul.msk.f32.gmra.mxu3 %vm827_vm5, %v2162_v37  ;;  %v1460_v39 = vadd.f32 %v1459_v38, %v1458_v35  ;;  %v806_v50 = vsel %vm785_vm4, %v769_v44, %v682_v45 }
 0x13e   : > { %1694 = vmatmul.msk.f32.gmra.mxu0 %vm827_vm5, %v805_v33  ;;  %1760 = vmatmul.msk.f32.gmra.mxu2 %vm827_vm5, %v805_v33 }
 0x13f   : > { %v1076_v42 = vpop.f32.mrf.mxu1 }
 0x141   : > { %v1198_v46 = vpop.f32.mrf.mxu2  ;;  %v542_v6 = vpop.permute.xlu1 %541 }
 0x142   : > { %v1290_v47 = vadd.f32 %v1198_v46, %v1074_v43  ;;  %1729 = vmatmul.msk.f32.gmra.mxu1 %vm827_vm5, %v805_v33  ;;  %v771_v11 = vsel %vm274_vm0, %v375_v5, %v542_v6 }
 0x143   : > { %v954_v48 = vpop.f32.mrf.mxu0  ;;  %v684_v63 = vpop.permute.xlu0 %683  ;;  %v808_v17 = vsel %vm785_vm4, %v771_v11, %v686_v12 }
 0x144   : > { %v1326_v51 = vadd.f32 %v2248_v49, %v1290_v47  ;;  %v807_v4 = vsel %vm785_vm4, %v770_v62, %v684_v63  ;;  %v1077_v8 = vadd.f32 %v1076_v42, %v954_v48 }
 0x145   : > { %1739 = vmatmul.msk.f32.gmra.mxu3 %vm827_vm5, %v2180_v52 }
 0x146   : > { %v1359_v55 = vsel %vm274_vm0, %v1326_v51, 0.0  ;;  %v1428_v56 = vmul.f32 %v1326_v51, %v1326_v51  ;;  %1530 = vst.msk [vmem:[%s2260_s17 + $0x10] sm:$0xff] %vm274_vm0, %v1326_v51  ;;  %1695 = vmatmul.msk.f32.gmra.mxu0 %vm827_vm5, %v806_v50  ;;  %1761 = vmatmul.msk.f32.gmra.mxu2 %vm827_vm5, %v806_v50 }
 0x147   : > { %v1360_v58 = vadd.f32 %v1359_v55, %v1358_v34  ;;  %v1079_v59 = vpop.f32.mrf.mxu1 }
 0x148   : > { %v1461_v60 = vsel %vm274_vm0, %v1428_v56, 0.0  ;;  %v2327_v18 = vpop.f32.mrf.mxu3 }
 0x149   : > { %v1462_v1 = vadd.f32 %v1461_v60, %v1460_v39  ;;  %v688_v31 = vpop.permute.xlu1 %687 }
 0x14a   : > { %1730 = vmatmul.msk.f32.gmra.mxu1 %vm827_vm5, %v806_v50 }
 0x14b   : > { %v957_v2 = vpop.f32.mrf.mxu0  ;;  %v544_v24 = vpop.permute.xlu0 %543 }
 0x14c   : > { %v1080_v26 = vadd.f32 %v1079_v59, %v957_v2  ;;  %v772_v30 = vsel %vm274_vm0, %v376_v22, %v544_v24 }
 0x14d   : > { %1740 = vmatmul.msk.f32.gmra.mxu3 %vm827_vm5, %v2189_v57  ;;  %v809_v35 = vsel %vm785_vm4, %v772_v30, %v688_v31 }
 0x14e   : > { %1696 = vmatmul.msk.f32.gmra.mxu0 %vm827_vm5, %v807_v4  ;;  %1762 = vmatmul.msk.f32.gmra.mxu2 %vm827_vm5, %v807_v4 }
 0x14f   : > { %v1082_v9 = vpop.f32.mrf.mxu1 }
 0x150   : > { %v1201_v10 = vpop.f32.mrf.mxu2  ;;  %v2346_v36 = vpop.f32.mrf.mxu3 }
 0x151   : > { %v1291_v14 = vadd.f32 %v1201_v10, %v1077_v8 }
 0x152   : > { %1731 = vmatmul.msk.f32.gmra.mxu1 %vm827_vm5, %v807_v4 }
 0x153   : > { %v1327_v15 = vadd.f32 %v2248_v49, %v1291_v14  ;;  %v960_v16 = vpop.f32.mrf.mxu0  ;;  %v710_v30 = vpop.permute.xlu0 %709 }
 0x154   : > { %v1083_v43 = vadd.f32 %v1082_v9, %v960_v16 }
 0x155   : > { %v1361_v19 = vsel %vm274_vm0, %v1327_v15, 0.0  ;;  %v1429_v21 = vmul.f32 %v1327_v15, %v1327_v15  ;;  %1531 = vst.msk [vmem:[%s2260_s17 + $0x18] sm:$0xff] %vm274_vm0, %v1327_v15  ;;  %1741 = vmatmul.msk.f32.gmra.mxu3 %vm827_vm5, %v2202_v7 }
 0x156   : > { %v1362_v25 = vadd.f32 %v1361_v19, %v1360_v58  ;;  %1697 = vmatmul.msk.f32.gmra.mxu0 %vm827_vm5, %v808_v17  ;;  %1763 = vmatmul.msk.f32.gmra.mxu2 %vm827_vm5, %v808_v17 }
 0x157   : > { %v1463_v27 = vsel %vm274_vm0, %v1429_v21, 0.0  ;;  %v1085_v0 = vpop.f32.mrf.mxu1 }
 0x158   : > { %v1464_v28 = vadd.f32 %v1463_v27, %v1462_v1  ;;  %v1204_v29 = vpop.f32.mrf.mxu2  ;;  %v387_v27 = vld [vmem:[#allocation2 + $0x198] sm:$0xff] }
 0x159   : > { %v1292_v32 = vadd.f32 %v1204_v29, %v1080_v26  ;;  %v2362_v54 = vpop.f32.mrf.mxu3 }
 0x15a   : > { %1732 = vmatmul.msk.f32.gmra.mxu1 %vm827_vm5, %v808_v17 }
 0x15b   : > { %v1328_v33 = vadd.f32 %v2248_v49, %v1292_v32  ;;  %v963_v34 = vpop.f32.mrf.mxu0 }
 0x15c   : > { %v1086_v59 = vadd.f32 %v1085_v0, %v963_v34  ;;  %v566_v0 = vpop.permute.xlu2 %565 }
 0x15d   : > { %v1363_v38 = vsel %vm274_vm0, %v1328_v33, 0.0  ;;  %v1430_v39 = vmul.f32 %v1328_v33, %v1328_v33  ;;  %1532 = vst.msk [vmem:[%s2260_s17 + $0x20] sm:$0xff] %vm274_vm0, %v1328_v33  ;;  %1769 = vmatmul.msk.f32.vlgmr.msra.gmra.mxu3 %vm827_vm5, %v2162_v37  ;;  %v783_v29 = vsel %vm274_vm0, %v387_v27, %v566_v0 }
 0x15e   : > { %v1364_v41 = vadd.f32 %v1363_v38, %v1362_v25  ;;  %1698 = vmatmul.msk.f32.gmra.mxu0 %vm827_vm5, %v809_v35  ;;  %1764 = vmatmul.msk.f32.gmra.mxu2 %vm827_vm5, %v809_v35 }
 0x15f   : > { %v1465_v42 = vsel %vm274_vm0, %v1430_v39, 0.0  ;;  %v1088_v45 = vpop.f32.mrf.mxu1  ;;  %v568_v39 = vpop.permute.xlu1 %567 }
 0x160   : > { %v1466_v44 = vadd.f32 %v1465_v42, %v1464_v28 }
 0x161   : > { %v1207_v46 = vpop.f32.mrf.mxu2 }
 0x162   : > { %v1293_v47 = vadd.f32 %v1207_v46, %v1083_v43  ;;  %1733 = vmatmul.msk.f32.gmra.mxu1 %vm827_vm5, %v809_v35  ;;  %v820_v35 = vsel %vm785_vm4, %v783_v29, %v710_v30 }
 0x163   : > { %v966_v37 = vpop.f32.mrf.mxu0 }
 0x164   : > { %v1329_v48 = vadd.f32 %v2248_v49, %v1293_v47  ;;  %v712_v43 = vpop.permute.xlu2 %711 }
 0x165   : > { %1770 = vmatmul.msk.f32.gmra.mxu3 %vm827_vm5, %v2180_v52 }
 0x166   : > { %v1365_v50 = vsel %vm274_vm0, %v1329_v48, 0.0  ;;  %v1431_v51 = vmul.f32 %v1329_v48, %v1329_v48  ;;  %1533 = vst.msk [vmem:[%s2260_s17 + $0x28] sm:$0xff] %vm274_vm0, %v1329_v48  ;;  %1699 = vmatmul.msk.f32.gmra.mxu0 %vm827_vm5, %v2238_v40  ;;  %1765 = vmatmul.msk.f32.gmra.mxu2 %vm827_vm5, %v2238_v40 }
 0x167   : > { %v1366_v53 = vadd.f32 %v1365_v50, %v1364_v41  ;;  %v1091_v58 = vpop.f32.mrf.mxu1 }
 0x168   : > { %v1467_v55 = vsel %vm274_vm0, %v1431_v51, 0.0  ;;  %v2371_v40 = vpop.f32.mrf.mxu3 }
 0x169   : > { %v1468_v56 = vadd.f32 %v1467_v55, %v1466_v44 }
 0x16b   : > { %v969_v52 = vpop.f32.mrf.mxu0 }
 0x16c   : > { %v1092_v17 = vadd.f32 %v1091_v58, %v969_v52 }
 0x16d   : > { %1771 = vmatmul.msk.f32.gmra.mxu3 %vm827_vm5, %v2189_v57 }
 0x16e   : > { %1700 = vmatmul.msk.f32.gmra.mxu0 %vm827_vm5, %v2270_v3  ;;  %1766 = vmatmul.msk.f32.gmra.mxu2 %vm827_vm5, %v2270_v3  ;;  %v1089_v3 = vadd.f32 %v1088_v45, %v966_v37 }
 0x16f   : > { %v1094_v1 = vpop.f32.mrf.mxu1 }
 0x170   : > { %v1210_v60 = vpop.f32.mrf.mxu2  ;;  %v2382_v11 = vpop.f32.mrf.mxu3 }
 0x171   : > { %v1294_v62 = vadd.f32 %v1210_v60, %v1086_v59 }
 0x173   : > { %v1330_v63 = vadd.f32 %v2248_v49, %v1294_v62  ;;  %v972_v8 = vpop.f32.mrf.mxu0 }
 0x174   : > { %v1095_v41 = vadd.f32 %v1094_v1, %v972_v8 }
 0x175   : > { %v1367_v2 = vsel %vm274_vm0, %v1330_v63, 0.0  ;;  %v1432_v4 = vmul.f32 %v1330_v63, %v1330_v63  ;;  %1534 = vst.msk [vmem:[%s2260_s17 + $0x30] sm:$0xff] %vm274_vm0, %v1330_v63  ;;  %1772 = vmatmul.msk.f32.gmra.mxu3 %vm827_vm5, %v2202_v7 }
 0x176   : > { %v1368_v57 = vadd.f32 %v1367_v2, %v1366_v53  ;;  %1767 = vmatmul.msk.f32.gmra.mxu2 %vm827_vm5, %v2125_v13 }
 0x177   : > { %v1469_v5 = vsel %vm274_vm0, %v1432_v4, 0.0  ;;  %v1097_v7 = vpop.f32.mrf.mxu1 }
 0x178   : > { %v1470_v6 = vadd.f32 %v1469_v5, %v1468_v56  ;;  %v1213_v9 = vpop.f32.mrf.mxu2 }
 0x179   : > { %v1295_v10 = vadd.f32 %v1213_v9, %v1089_v3  ;;  %v2393_v25 = vpop.f32.mrf.mxu3 }
 0x17b   : > { %v1331_v12 = vadd.f32 %v2248_v49, %v1295_v10  ;;  %v975_v22 = vpop.f32.mrf.mxu0 }
 0x17c   : > { %v1098_v56 = vadd.f32 %v1097_v7, %v975_v22 }
 0x17d   : > { %v1369_v14 = vsel %vm274_vm0, %v1331_v12, 0.0  ;;  %v1433_v15 = vmul.f32 %v1331_v12, %v1331_v12  ;;  %1535 = vst.msk [vmem:[%s2260_s17 + $0x38] sm:$0xff] %vm274_vm0, %v1331_v12  ;;  %1773 = vmatmul.msk.f32.gmra.mxu3 %vm827_vm5, %v2217_v61 }
 0x17e   : > { %v1370_v13 = vadd.f32 %v1369_v14, %v1368_v57  ;;  %1768 = vmatmul.msk.f32.gmra.mxu2 %vm827_vm5, %v2144_v23 }
 0x17f   : > { %v1471_v16 = vsel %vm274_vm0, %v1433_v15, 0.0  ;;  %v1100_v32 = vpop.f32.mrf.mxu1 }
 0x180   : > { %v1472_v19 = vadd.f32 %v1471_v16, %v1470_v6 }
 0x181   : > { %v1216_v21 = vpop.f32.mrf.mxu2 }
 0x182   : > { %v1296_v24 = vadd.f32 %v1216_v21, %v1092_v17 }
 0x184   : > { %v1332_v26 = vadd.f32 %v2248_v49, %v1296_v24 }
 0x185   : > { %1774 = vmatmul.msk.f32.gmra.mxu3 %vm827_vm5, %v2225_v20  ;;  %v388_v20 = vld [vmem:[#allocation2 + $0x1a0] sm:$0xff] }
 0x186   : > { %v1371_v61 = vsel %vm274_vm0, %v1332_v26, 0.0  ;;  %v1434_v23 = vmul.f32 %v1332_v26, %v1332_v26  ;;  %1536 = vst.msk [vmem:[%s2260_s17 + $0x40] sm:$0xff] %vm274_vm0, %v1332_v26  ;;  %v784_v42 = vsel %vm274_vm0, %v388_v20, %v568_v39 }
 0x187   : > { %v1372_v28 = vadd.f32 %v1371_v61, %v1370_v13  ;;  %v821_v47 = vsel %vm785_vm4, %v784_v42, %v712_v43  ;;  %v1103_v48 = vpop.f32.mrf.mxu1 }
 0x188   : > { %v1473_v31 = vsel %vm274_vm0, %v1434_v23, 0.0  ;;  %v2404_v38 = vpop.f32.mrf.mxu3 }
 0x189   : > { %v1474_v33 = vadd.f32 %v1473_v31, %v1472_v19 }
 0x18a   : > { %v978_v34 = vpop.f32.mrf.mxu0 }
 0x18b   : > { %v1101_v5 = vadd.f32 %v1100_v32, %v978_v34 }
 0x18d   : > { %1775 = vmatmul.msk.f32.gmra.mxu3 %vm827_vm5, %v820_v35 }
 0x18f   : > { %v1106_v1 = vpop.f32.mrf.mxu1 }
 0x190   : > { %v1219_v44 = vpop.f32.mrf.mxu2 }
 0x191   : > { %v1297_v45 = vadd.f32 %v1219_v44, %v1095_v41  ;;  %v2414_v55 = vpop.f32.mrf.mxu3 }
 0x192   : > { %v981_v46 = vpop.f32.mrf.mxu0 }
 0x193   : > { %v1333_v37 = vadd.f32 %v2248_v49, %v1297_v45  ;;  %v1104_v17 = vadd.f32 %v1103_v48, %v981_v46 }
 0x195   : > { %v1373_v50 = vsel %vm274_vm0, %v1333_v37, 0.0  ;;  %v1435_v51 = vmul.f32 %v1333_v37, %v1333_v37  ;;  %1537 = vst.msk [vmem:[%s2260_s17 + $0x48] sm:$0xff] %vm274_vm0, %v1333_v37  ;;  %1776 = vmatmul.msk.f32.gmra.mxu3 %vm827_vm5, %v821_v47 }
 0x196   : > { %v1374_v53 = vadd.f32 %v1373_v50, %v1372_v28 }
 0x197   : > { %v1475_v58 = vsel %vm274_vm0, %v1435_v51, 0.0  ;;  %v1109_v7 = vpop.f32.mrf.mxu1 }
 0x198   : > { %v1476_v52 = vadd.f32 %v1475_v58, %v1474_v33  ;;  %v1222_v59 = vpop.f32.mrf.mxu2 }
 0x199   : > { %v1298_v60 = vadd.f32 %v1222_v59, %v1098_v56  ;;  %v2422_v8 = vpop.f32.mrf.mxu3 }
 0x19b   : > { %v1334_v62 = vadd.f32 %v2248_v49, %v1298_v60  ;;  %v984_v63 = vpop.f32.mrf.mxu0 }
 0x19c   : > { %v1107_v29 = vadd.f32 %v1106_v1, %v984_v63 }
 0x19d   : > { %v1375_v2 = vsel %vm274_vm0, %v1334_v62, 0.0  ;;  %v1436_v4 = vmul.f32 %v1334_v62, %v1334_v62  ;;  %1538 = vst.msk [vmem:[%s2260_s17 + $0x50] sm:$0xff] %vm274_vm0, %v1334_v62 }
 0x19e   : > { %v1376_v57 = vadd.f32 %v1375_v2, %v1374_v53 }
 0x19f   : > { %v1477_v3 = vsel %vm274_vm0, %v1436_v4, 0.0  ;;  %v1112_v32 = vpop.f32.mrf.mxu1 }
 0x1a0   : > { %v1478_v6 = vadd.f32 %v1477_v3, %v1476_v52 }
 0x1a1   : > { %v1225_v9 = vpop.f32.mrf.mxu2 }
 0x1a2   : > { %v1299_v10 = vadd.f32 %v1225_v9, %v1101_v5 }
 0x1a3   : > { %v987_v12 = vpop.f32.mrf.mxu0 }
 0x1a4   : > { %v1335_v14 = vadd.f32 %v2248_v49, %v1299_v10  ;;  %v1110_v44 = vadd.f32 %v1109_v7, %v987_v12 }
 0x1a6   : > { %v1377_v15 = vsel %vm274_vm0, %v1335_v14, 0.0  ;;  %v1437_v13 = vmul.f32 %v1335_v14, %v1335_v14  ;;  %1539 = vst.msk [vmem:[%s2260_s17 + $0x58] sm:$0xff] %vm274_vm0, %v1335_v14 }
 0x1a7   : > { %v1378_v16 = vadd.f32 %v1377_v15, %v1376_v57  ;;  %v1115_v47 = vpop.f32.mrf.mxu1 }
 0x1a8   : > { %v1479_v19 = vsel %vm274_vm0, %v1437_v13, 0.0  ;;  %v2429_v21 = vpop.f32.mrf.mxu3 }
 0x1a9   : > { %v1480_v22 = vadd.f32 %v1479_v19, %v1478_v6  ;;  %v1228_v24 = vpop.f32.mrf.mxu2 }
 0x1aa   : > { %v1300_v26 = vadd.f32 %v1228_v24, %v1104_v17  ;;  %v1140_v24 = vadd.f32 %v2422_v8, %v2327_v18  ;;  %v1143_v18 = vadd.f32 %v2429_v21, %v2346_v36 }
 0x1ab   : > { %v990_v0 = vpop.f32.mrf.mxu0 }
 0x1ac   : > { %v1336_v27 = vadd.f32 %v2248_v49, %v1300_v26  ;;  %v1113_v53 = vadd.f32 %v1112_v32, %v990_v0 }
 0x1ae   : > { %v1379_v61 = vsel %vm274_vm0, %v1336_v27, 0.0  ;;  %v1438_v23 = vmul.f32 %v1336_v27, %v1336_v27  ;;  %1540 = vst.msk [vmem:[%s2260_s17 + $0x60] sm:$0xff] %vm274_vm0, %v1336_v27 }
 0x1af   : > { %v1380_v28 = vadd.f32 %v1379_v61, %v1378_v16  ;;  %v1118_v60 = vpop.f32.mrf.mxu1 }
 0x1b0   : > { %v1481_v30 = vsel %vm274_vm0, %v1438_v23, 0.0  ;;  %v2436_v31 = vpop.f32.mrf.mxu3 }
 0x1b1   : > { %v1482_v33 = vadd.f32 %v1481_v30, %v1480_v22  ;;  %v1231_v34 = vpop.f32.mrf.mxu2  ;;  %v1146_v36 = vadd.f32 %v2436_v31, %v2362_v54 }
 0x1b2   : > { %v1301_v35 = vadd.f32 %v1231_v34, %v1107_v29 }
 0x1b3   : > { %v993_v43 = vpop.f32.mrf.mxu0 }
 0x1b4   : > { %v1337_v20 = vadd.f32 %v2248_v49, %v1301_v35  ;;  %v1116_v63 = vadd.f32 %v1115_v47, %v993_v43 }
 0x1b6   : > { %v1381_v39 = vsel %vm274_vm0, %v1337_v20, 0.0  ;;  %v1439_v41 = vmul.f32 %v1337_v20, %v1337_v20  ;;  %1541 = vst.msk [vmem:[%s2260_s17 + $0x68] sm:$0xff] %vm274_vm0, %v1337_v20 }
 0x1b7   : > { %v2442_v42 = vadd.f32 %v1381_v39, %v1380_v28  ;;  %v1121_v5 = vpop.f32.mrf.mxu1 }
 0x1b8   : > { %v1483_v45 = vsel %vm274_vm0, %v1439_v41, 0.0  ;;  %v2445_v46 = vpop.f32.mrf.mxu3 }
 0x1b9   : > { %v2447_v48 = vadd.f32 %v1483_v45, %v1482_v33  ;;  %v1234_v37 = vpop.f32.mrf.mxu2 }
 0x1ba   : > { %v1302_v50 = vadd.f32 %v1234_v37, %v1110_v44 }
 0x1bb   : > { %v996_v58 = vpop.f32.mrf.mxu0 }
 0x1bc   : > { %v1338_v51 = vadd.f32 %v2248_v49, %v1302_v50  ;;  %v1119_v6 = vadd.f32 %v1118_v60, %v996_v58 }
 0x1be   : > { %1542 = vst.msk [vmem:[%s2260_s17 + $0x70] sm:$0xff] %vm274_vm0, %v1338_v51  ;;  %v1440_v21 = vmul.f32 %v1338_v51, %v1338_v51 }
 0x1bf   : > { %v1124_v13 = vpop.f32.mrf.mxu1 }
 0x1c0   : > { %v2452_v56 = vpop.f32.mrf.mxu3 }
 0x1c1   : > { %v1237_v52 = vpop.f32.mrf.mxu2 }
 0x1c2   : > { %v1303_v59 = vadd.f32 %v1237_v52, %v1113_v53  ;;  %v1383_v53 = vsel %vm274_vm0, %v1338_v51, 0.0 }
 0x1c3   : > { %v999_v57 = vpop.f32.mrf.mxu0 }
 0x1c4   : > { %v1339_v62 = vadd.f32 %v2248_v49, %v1303_v59  ;;  %v1122_v7 = vadd.f32 %v1121_v5, %v999_v57 }
 0x1c6   : > { %1543 = vst.msk [vmem:[%s2260_s17 + $0x78] sm:$0xff] %vm274_vm0, %v1339_v62  ;;  %v1441_v58 = vmul.f32 %v1339_v62, %v1339_v62 }
 0x1c7   : > { %v1127_v61 = vpop.f32.mrf.mxu1 }
 0x1c8   : > { %v2457_v1 = vpop.f32.mrf.mxu3  ;;  %v1487_v51 = vsel %vm274_vm0, %v1441_v58, 0.0 }
 0x1c9   : > { %v1240_v2 = vpop.f32.mrf.mxu2 }
 0x1ca   : > { %v1304_v4 = vadd.f32 %v1240_v2, %v1116_v63  ;;  %v1485_v63 = vsel %vm274_vm0, %v1440_v21, 0.0  ;;  %v1385_v2 = vsel %vm274_vm0, %v1339_v62, 0.0 }
 0x1cb   : > { %v1002_v15 = vpop.f32.mrf.mxu0  ;;  %v1486_v62 = vadd.f32 %v1485_v63, %v2447_v48 }
 0x1cc   : > { %v1340_v3 = vadd.f32 %v2248_v49, %v1304_v4  ;;  %v1125_v27 = vadd.f32 %v1124_v13, %v1002_v15  ;;  %v1384_v4 = vadd.f32 %v1383_v53, %v2442_v42 }
 0x1ce   : > { %1544 = vst.msk [vmem:[%s2260_s17 + $0x80] sm:$0xff] %vm274_vm0, %v1340_v3  ;;  %v1442_v54 = vmul.f32 %v1340_v3, %v1340_v3  ;;  %v1387_v5 = vsel %vm274_vm0, %v1340_v3, 0.0 }
 0x1cf   : > { %v1130_v41 = vpop.f32.mrf.mxu1 }
 0x1d0   : > { %v2462_v9 = vpop.f32.mrf.mxu3  ;;  %v1489_v15 = vsel %vm274_vm0, %v1442_v54, 0.0 }
 0x1d1   : > { %v1243_v10 = vpop.f32.mrf.mxu2 }
 0x1d2   : > { %v1305_v12 = vadd.f32 %v1243_v10, %v1119_v6  ;;  %v1149_v10 = vadd.f32 %v2445_v46, %v2371_v40 }
 0x1d3   : > { %v1005_v26 = vpop.f32.mrf.mxu0 }
 0x1d4   : > { %v1341_v14 = vadd.f32 %v2248_v49, %v1305_v12  ;;  %v1128_v8 = vadd.f32 %v1127_v61, %v1005_v26  ;;  %v1386_v12 = vadd.f32 %v1385_v2, %v1384_v4 }
 0x1d6   : > { %1545 = vst.msk [vmem:[%s2260_s17 + $0x88] sm:$0xff] %vm274_vm0, %v1341_v14  ;;  %v1443_v6 = vmul.f32 %v1341_v14, %v1341_v14  ;;  %v1389_v42 = vsel %vm274_vm0, %v1341_v14, 0.0 }
 0x1d7   : > { %v1133_v57 = vpop.f32.mrf.mxu1 }
 0x1d8   : > { %v2467_v16 = vpop.f32.mrf.mxu3 }
 0x1d9   : > { %v1246_v17 = vpop.f32.mrf.mxu2 }
 0x1da   : > { %v1306_v19 = vadd.f32 %v1246_v17, %v1122_v7 }
 0x1db   : > { %v1008_v34 = vpop.f32.mrf.mxu0 }
 0x1dc   : > { %v1342_v22 = vadd.f32 %v2248_v49, %v1306_v19  ;;  %v1131_v45 = vadd.f32 %v1130_v41, %v1008_v34  ;;  %v1488_v19 = vadd.f32 %v1487_v51, %v1486_v62  ;;  %v1155_v62 = vadd.f32 %v2457_v1, %v2393_v25 }
 0x1de   : > { %1546 = vst.msk [vmem:[%s2260_s17 + $0x90] sm:$0xff] %vm274_vm0, %v1342_v22  ;;  %v1444_v13 = vmul.f32 %v1342_v22, %v1342_v22  ;;  %v1490_v48 = vadd.f32 %v1489_v15, %v1488_v19 }
 0x1e0   : > { %v1264_v0 = vpop.f32.mrf.mxu3  ;;  %v1493_v14 = vsel %vm274_vm0, %v1444_v13, 0.0 }
 0x1e1   : > { %v1312_v23 = vadd.f32 %v1264_v0, %v1140_v24  ;;  %v1249_v28 = vpop.f32.mrf.mxu2  ;;  %v1388_v24 = vadd.f32 %v1387_v5, %v1386_v12  ;;  %v1391_v0 = vsel %vm274_vm0, %v1342_v22, 0.0 }
 0x1e2   : > { %v1307_v29 = vadd.f32 %v1249_v28, %v1125_v27  ;;  %v1491_v27 = vsel %vm274_vm0, %v1443_v6, 0.0 }
 0x1e3   : > { %v2475_v30 = vadd.f32 %v2248_v49, %v1312_v23  ;;  %v1011_v59 = vpop.f32.mrf.mxu0  ;;  %v1390_v61 = vadd.f32 %v1389_v42, %v1388_v24 }
 0x1e4   : > { %v1343_v32 = vadd.f32 %v2248_v49, %v1307_v29  ;;  %v1134_v7 = vadd.f32 %v1133_v57, %v1011_v59 }
 0x1e5   : > { %1552 = vst.msk [vmem:[%s2260_s17 + $0xc0] sm:$0xff] %vm274_vm0, %v2475_v30  ;;  %v1450_v5 = vmul.f32 %v2475_v30, %v2475_v30  ;;  %v1403_v42 = vsel %vm274_vm0, %v2475_v30, 0.0 }
 0x1e6   : > { %1547 = vst.msk [vmem:[%s2260_s17 + $0x98] sm:$0xff] %vm274_vm0, %v1343_v32  ;;  %v1445_v40 = vmul.f32 %v1343_v32, %v1343_v32  ;;  %v1393_v28 = vsel %vm274_vm0, %v1343_v32, 0.0 }
 0x1e8   : > { %v1267_v33 = vpop.f32.mrf.mxu3  ;;  %v1495_v22 = vsel %vm274_vm0, %v1445_v40, 0.0 }
 0x1e9   : > { %v1313_v35 = vadd.f32 %v1267_v33, %v1143_v18  ;;  %v1252_v20 = vpop.f32.mrf.mxu2  ;;  %v1392_v33 = vadd.f32 %v1391_v0, %v1390_v61 }
 0x1ea   : > { %v1308_v39 = vadd.f32 %v1252_v20, %v1128_v8  ;;  %v1492_v8 = vadd.f32 %v1491_v27, %v1490_v48 }
 0x1eb   : > { %v2486_v43 = vadd.f32 %v2248_v49, %v1313_v35  ;;  %v1014_v34 = vpop.f32.mrf.mxu0  ;;  %v1394_v41 = vadd.f32 %v1393_v28, %v1392_v33 }
 0x1ec   : > { %v1344_v44 = vadd.f32 %v2248_v49, %v1308_v39  ;;  %v1152_v39 = vadd.f32 %v2452_v56, %v2382_v11  ;;  %v1494_v32 = vadd.f32 %v1493_v14, %v1492_v8 }
 0x1ed   : > { %1553 = vst.msk [vmem:[%s2260_s17 + $0xc8] sm:$0xff] %vm274_vm0, %v2486_v43  ;;  %v1451_v13 = vmul.f32 %v2486_v43, %v2486_v43  ;;  %v1405_v25 = vsel %vm274_vm0, %v2486_v43, 0.0 }
 0x1ee   : > { %1548 = vst.msk [vmem:[%s2260_s17 + $0xa0] sm:$0xff] %vm274_vm0, %v1344_v44  ;;  %v1446_v29 = vmul.f32 %v1344_v44, %v1344_v44  ;;  %v1395_v35 = vsel %vm274_vm0, %v1344_v44, 0.0  ;;  %v1496_v53 = vadd.f32 %v1495_v22, %v1494_v32 }
 0x1ef   : > { %v1396_v58 = vadd.f32 %v1395_v35, %v1394_v41  ;;  %v1507_v40 = vsel %vm274_vm0, %v1451_v13, 0.0 }
 0x1f0   : > { %v1270_v47 = vpop.f32.mrf.mxu3  ;;  %v1497_v21 = vsel %vm274_vm0, %v1446_v29, 0.0 }
 0x1f1   : > { %v1314_v37 = vadd.f32 %v1270_v47, %v1146_v36  ;;  %v1255_v50 = vpop.f32.mrf.mxu2  ;;  %v1136_v36 = vpop.f32.mrf.mxu1  ;;  %v1498_v63 = vadd.f32 %v1497_v21, %v1496_v53  ;;  %v1161_v53 = vadd.f32 %v2467_v16, %v2414_v55 }
 0x1f2   : > { %v1309_v52 = vadd.f32 %v1255_v50, %v1131_v45  ;;  %v1137_v45 = vadd.f32 %v1136_v36, %v1014_v34 }
 0x1f3   : > { %v2498_v60 = vadd.f32 %v2248_v49, %v1314_v37 }
 0x1f4   : > { %v1345_v31 = vadd.f32 %v2248_v49, %v1309_v52 }
 0x1f5   : > { %1554 = vst.msk [vmem:[%s2260_s17 + $0xd0] sm:$0xff] %vm274_vm0, %v2498_v60  ;;  %v1452_v1 = vmul.f32 %v2498_v60, %v2498_v60 }
 0x1f6   : > { %1549 = vst.msk [vmem:[%s2260_s17 + $0xa8] sm:$0xff] %vm274_vm0, %v1345_v31  ;;  %v1447_v20 = vmul.f32 %v1345_v31, %v1345_v31  ;;  %v1397_v47 = vsel %vm274_vm0, %v1345_v31, 0.0 }
 0x1f7   : > { %v1398_v2 = vadd.f32 %v1397_v47, %v1396_v58  ;;  %v1509_v43 = vsel %vm274_vm0, %v1452_v1, 0.0 }
 0x1f8   : > { %v1273_v17 = vpop.f32.mrf.mxu3  ;;  %v1499_v59 = vsel %vm274_vm0, %v1447_v20, 0.0 }
 0x1f9   : > { %v1315_v26 = vadd.f32 %v1273_v17, %v1149_v10  ;;  %v1258_v3 = vpop.f32.mrf.mxu2  ;;  %v1500_v57 = vadd.f32 %v1499_v59, %v1498_v63 }
 0x1fa   : > { %v1310_v46 = vadd.f32 %v1258_v3, %v1134_v7  ;;  %v1505_v3 = vsel %vm274_vm0, %v1450_v5, 0.0 }
 0x1fb   : > { %v2519_v23 = vadd.f32 %v2248_v49, %v1315_v26 }
 0x1fc   : > { %v1346_v18 = vadd.f32 %v2248_v49, %v1310_v46  ;;  %v1407_v46 = vsel %vm274_vm0, %v2498_v60, 0.0 }
 0x1fd   : > { %1555 = vst.msk [vmem:[%s2260_s17 + $0xd8] sm:$0xff] %vm274_vm0, %v2519_v23  ;;  %v1453_v48 = vmul.f32 %v2519_v23, %v2519_v23  ;;  %v1409_v28 = vsel %vm274_vm0, %v2519_v23, 0.0 }
 0x1fe   : > { %1550 = vst.msk [vmem:[%s2260_s17 + $0xb0] sm:$0xff] %vm274_vm0, %v1346_v18  ;;  %v1448_v37 = vmul.f32 %v1346_v18, %v1346_v18  ;;  %v1399_v11 = vsel %vm274_vm0, %v1346_v18, 0.0  ;;  %v1158_v18 = vadd.f32 %v2462_v9, %v2404_v38 }
 0x1ff   : > { %v1400_v51 = vadd.f32 %v1399_v11, %v1398_v2  ;;  %v1511_v60 = vsel %vm274_vm0, %v1453_v48, 0.0 }
 0x200   : > { %v1276_v50 = vpop.f32.mrf.mxu3  ;;  %v1501_v4 = vsel %vm274_vm0, %v1448_v37, 0.0 }
 0x201   : > { %v1316_v44 = vadd.f32 %v1276_v50, %v1152_v39  ;;  %v1261_v52 = vpop.f32.mrf.mxu2  ;;  %v1502_v12 = vadd.f32 %v1501_v4, %v1500_v57 }
 0x202   : > { %v1311_v56 = vadd.f32 %v1261_v52, %v1137_v45 }
 0x203   : > { %v1352_v54 = vadd.f32 %v2248_v49, %v1316_v44 }
 0x204   : > { %v1347_v31 = vadd.f32 %v2248_v49, %v1311_v56 }
 0x205   : > { %1556 = vst.msk [vmem:[%s2260_s17 + $0xe0] sm:$0xff] %vm274_vm0, %v1352_v54  ;;  %v1454_v29 = vmul.f32 %v1352_v54, %v1352_v54  ;;  %v1411_v34 = vsel %vm274_vm0, %v1352_v54, 0.0 }
 0x206   : > { %v1401_v6 = vsel %vm274_vm0, %v1347_v31, 0.0  ;;  %v1449_v10 = vmul.f32 %v1347_v31, %v1347_v31  ;;  %1551 = vst.msk [vmem:[%s2260_s17 + $0xb8] sm:$0xff] %vm274_vm0, %v1347_v31 }
 0x207   : > { %v1402_v15 = vadd.f32 %v1401_v6, %v1400_v51  ;;  %v1513_v41 = vsel %vm274_vm0, %v1454_v29, 0.0 }
 0x208   : > { %v1503_v7 = vsel %vm274_vm0, %v1449_v10, 0.0  ;;  %v1279_v17 = vpop.f32.mrf.mxu3 }
 0x209   : > { %v1404_v19 = vadd.f32 %v1403_v42, %v1402_v15  ;;  %v1504_v24 = vadd.f32 %v1503_v7, %v1502_v12  ;;  %v1317_v26 = vadd.f32 %v1279_v17, %v1155_v62 }
 0x20b   : > { %v1406_v27 = vadd.f32 %v1405_v25, %v1404_v19  ;;  %v1506_v30 = vadd.f32 %v1505_v3, %v1504_v24  ;;  %v1353_v0 = vadd.f32 %v2248_v49, %v1317_v26 }
 0x20d   : > { %v1508_v61 = vadd.f32 %v1507_v40, %v1506_v30  ;;  %v1408_v14 = vadd.f32 %v1407_v46, %v1406_v27  ;;  %1557 = vst.msk [vmem:[%s2260_s17 + $0xe8] sm:$0xff] %vm274_vm0, %v1353_v0  ;;  %v1455_v22 = vmul.f32 %v1353_v0, %v1353_v0  ;;  %v1413_v23 = vsel %vm274_vm0, %v1353_v0, 0.0 }
 0x20f   : > { %v1410_v8 = vadd.f32 %v1409_v28, %v1408_v14  ;;  %v1510_v33 = vadd.f32 %v1509_v43, %v1508_v61  ;;  %v1515_v9 = vsel %vm274_vm0, %v1455_v22, 0.0 }
 0x210   : > { %v1282_v35 = vpop.f32.mrf.mxu3 }
 0x211   : > { %v1412_v20 = vadd.f32 %v1411_v34, %v1410_v8  ;;  %v1512_v39 = vadd.f32 %v1511_v60, %v1510_v33  ;;  %v1318_v32 = vadd.f32 %v1282_v35, %v1158_v18 }
 0x213   : > { %v1414_v36 = vadd.f32 %v1413_v23, %v1412_v20  ;;  %v1514_v21 = vadd.f32 %v1513_v41, %v1512_v39  ;;  %v1354_v38 = vadd.f32 %v2248_v49, %v1318_v32 }
 0x215   : > { %v1516_v45 = vadd.f32 %v1515_v9, %v1514_v21  ;;  %v1415_v47 = vsel %vm274_vm0, %v1354_v38, 0.0  ;;  %v1456_v37 = vmul.f32 %v1354_v38, %v1354_v38  ;;  %1558 = vst.msk [vmem:[%s2260_s17 + $0xf0] sm:$0xff] %vm274_vm0, %v1354_v38 }
 0x216   : > { %v1416_v50 = vadd.f32 %v1415_v47, %v1414_v36 }
 0x217   : > { %v1517_v58 = vsel %vm274_vm0, %v1456_v37, 0.0 }
 0x218   : > { %v1518_v44 = vadd.f32 %v1517_v58, %v1516_v45  ;;  %v1285_v52 = vpop.f32.mrf.mxu3 }
 0x219   : > { %v1319_v59 = vadd.f32 %v1285_v52, %v1161_v53 }
 0x21b   : > { %v1355_v11 = vadd.f32 %v2248_v49, %v1319_v59 }
 0x21d   : > { %v1417_v56 = vsel %vm274_vm0, %v1355_v11, 0.0  ;;  %v1457_v63 = vmul.f32 %v1355_v11, %v1355_v11  ;;  %1559 = vst.msk [vmem:[%s2260_s17 + $0xf8] sm:$0xff] %vm274_vm0, %v1355_v11 }
 0x21e   : > { %v1418_v2 = vadd.f32 %v1417_v56, %v1416_v50 }
 0x21f   : > { %v1519_v54 = vsel %vm274_vm0, %v1457_v63, 0.0 }
 0x220   : > { %v1419_v4 = vrot.slane %v1418_v2, 4  ;;  %v1520_v31 = vadd.f32 %v1519_v54, %v1518_v44 }
 0x222   : > { %v1420_v55 = vadd.f32 %v1419_v4, %v1418_v2  ;;  %v1521_v16 = vrot.slane %v1520_v31, 4 }
 0x224   : > { %v1421_v57 = vrot.slane %v1420_v55, 2  ;;  %v1522_v51 = vadd.f32 %v1521_v16, %v1520_v31 }
 0x226   : > { %v1422_v5 = vadd.f32 %v1421_v57, %v1420_v55  ;;  %v1523_v6 = vrot.slane %v1522_v51, 2 }
 0x228   : > { %v1423_v10 = vrot.slane %v1422_v5, 1  ;;  %v1524_v49 = vadd.f32 %v1523_v6, %v1522_v51 }
 0x22a   : > { %v1424_v62 = vadd.f32 %v1423_v10, %v1422_v5  ;;  %v1525_v12 = vrot.slane %v1524_v49, 1 }
 0x22c   : > { %1425 = vst.msk [vmem:[%s238_s22] sm:$0x1] %vm283_vm1, %v1424_v62  ;;  %v1526_v15 = vadd.f32 %v1525_v12, %v1524_v49 }
 0x22e   : > { %1527 = vst.msk [vmem:[%s241_s25] sm:$0x1] %vm283_vm1, %v1526_v15 }
 0x22f PF: > { %s16_s18 = sadd.s32 1, %s1805_s18  }
 0x230   : > { %p13_p4 = scmp.ge.s32.totalorder %s16_s18, 4  }
 0x232   :  { %15 = sbr.rel (!%p13_p4) target bundleno = 1 (0x1), region = 90 }

// kernel: resblock_pallas.4
= control target key start
LH: loop header
LB: loop body
LE: loop exit
PB: predicated region body
PF: predicated region fallthrough
CT: control target
= control target key end

     0   :  { %s2142_s27 = smov 0   ;;  %s3016_s0 = inlined_call_operand.vmem [shape: f32[2,16,16,4], index: 0, kind: input, shape index: {}]   ;;  %s3017_s1 = inlined_call_operand.vmem [shape: f32[2,16,16,4], index: 1, kind: input, shape index: {}]   ;;  %s3018_s2 = inlined_call_operand.vmem [shape: f32[1,4], index: 2, kind: input, shape index: {}]   ;;  %s3019_s3 = inlined_call_operand.vmem [shape: f32[1,4], index: 3, kind: input, shape index: {}]   ;;  %s3020_s4 = inlined_call_operand.vmem [shape: f32[3,12,8], index: 4, kind: input, shape index: {}]   ;;  %s3021_s5 = inlined_call_operand.vmem [shape: f32[1,8], index: 5, kind: input, shape index: {}]   ;;  %s3022_s6 = inlined_call_operand.vmem [shape: f32[2,16,16,8], index: 6, kind: output, shape index: {0}]   ;;  %s3023_s7 = inlined_call_operand.vmem [shape: f32[2,1,8], index: 7, kind: output, shape index: {1}]   ;;  %s3024_s8 = inlined_call_operand.vmem [shape: f32[2,1,8], index: 8, kind: output, shape index: {2}]  }
   0x1 LB: > { %s1947_s28 = sadd.s32 4294967295, %s2092_s27   ;;  %p1951_p0 = scmp.ge.s32.totalorder %s2092_s27, 1  ;;  %s2092_s27 = sphi %s2142_s27, %s19_s27  }
   0x2   : > { %p277_p1 = scmp.lt.s32.totalorder %s2092_s27, 3 }
   0x4   : > { %p278_p2 = pnand %p1951_p0, %p277_p1 }
   0x5   : > { %p322_p3 = scmp.lt.s32.totalorder (!%p278_p2), %s1947_s28, 1  ;;  %s2095_s18 = smov (!%p278_p2), 4  }
   0x6   : > { %281 = sbr.rel (%p278_p2) target bundleno = 559 (0x22f), region = 44  ;;  %s2096_s19 = smov (!%p278_p2), 8  }
   0xb   : > { %vm543_vm0 = vcmask 31744   ;;  %v2094_v0 = vmov 0.0   ;;  %s3026_s28 = smov (!%p322_p3, %s1947_s28), 1  ;;  %vm552_vm1 = vcmask 24576   ;;  %v2161_v1 = vld [vmem:[%s3018_s2] ss:$0 sm:$0xff] }
   0xc   : > { %544 = vst.msk [vmem:[#allocation2] sm:$0xff] %vm543_vm0, %v2094_v0  ;;  %s2166_s9 = sshll.u32 %s3026_s28, 8  ;;  %v2177_v2 = vld [vmem:[%s3019_s3] ss:$0 sm:$0xff]  ;;  %vm546_vm2 = vcmask 25600   ;;  %vm1193_vm3 = vcmask 1043456   ;;  %s342_s22 = scalar_lea.vmem %s3024_s8, %s3026_s28 }
   0xd   : > { %545 = vst.msk [vmem:[#allocation2 + $0x8] sm:$0xff] %vm543_vm0, %v2094_v0  ;;  %s2172_s12 = scalar_lea.vmem %s3017_s1, %s2166_s9  ;;  %s2189_s17 = scalar_lea.vmem %s3016_s0, %s2166_s9  ;;  %vm1054_vm4 = vcmask 64512   ;;  %vm1096_vm5 = vcmask 97280   ;;  %vm1694_vm6 = vcmask 57344  }
   0xe   : > { %549 = vst.msk [vmem:[#allocation2 + $0x198] sm:$0xff] %vm543_vm0, %v2094_v0  ;;  %v345_v3 = vld [vmem:[%s2172_s12 + $0x10] sm:$0xff]  ;;  %v343_v4 = vld [vmem:[%s2172_s12] sm:$0xff]  ;;  %v346_v7 = vld [vmem:[%s2172_s12 + $0x18] sm:$0xff] }
   0xf   : > { %550 = vst.msk [vmem:[#allocation2 + $0x1a0] sm:$0xff] %vm543_vm0, %v2094_v0  ;;  %v381_v5 = vmul.f32 %v2161_v1, %v345_v3  ;;  %v379_v6 = vmul.f32 %v2161_v1, %v343_v4  ;;  %v382_v8 = vmul.f32 %v2161_v1, %v346_v7  ;;  %v481_v13 = vld [vmem:[%s2189_s17 + $0x10] sm:$0xff]  ;;  %v479_v14 = vld [vmem:[%s2189_s17] sm:$0xff]  ;;  %v482_v18 = vld [vmem:[%s2189_s17 + $0x18] sm:$0xff] }
  0x10   : > { %573 = vst.msk [vmem:[#allocation2 + $0x41] sm:$0x1] %vm552_vm1, %v2094_v0  ;;  %v344_v25 = vld [vmem:[%s2172_s12 + $0x8] sm:$0xff]  ;;  %v347_v27 = vld [vmem:[%s2172_s12 + $0x20] sm:$0xff]  ;;  %v369_v53 = vld [vmem:[%s2172_s12 + $0xd0] sm:$0xff] }
  0x11   : > { %553 = vst.msk [vmem:[#allocation2] sm:$0x1] %vm552_vm1, %v2094_v0  ;;  %v417_v10 = vadd.f32 %v2177_v2, %v381_v5  ;;  %v415_v11 = vadd.f32 %v2177_v2, %v379_v6  ;;  %v418_v15 = vadd.f32 %v2177_v2, %v382_v8  ;;  %v367_v29 = vld [vmem:[%s2172_s12 + $0xc0] sm:$0xff]  ;;  %v380_v30 = vmul.f32 %v2161_v1, %v344_v25  ;;  %v368_v31 = vld [vmem:[%s2172_s12 + $0xc8] sm:$0xff]  ;;  %v349_v54 = vld [vmem:[%s2172_s12 + $0x30] sm:$0xff] }
  0x12   : > { %554 = vst.msk [vmem:[#allocation2 + $0x18] sm:$0x1] %vm552_vm1, %v2094_v0  ;;  %v383_v32 = vmul.f32 %v2161_v1, %v347_v27  ;;  %v348_v33 = vld [vmem:[%s2172_s12 + $0x28] sm:$0xff]  ;;  %v403_v34 = vmul.f32 %v2161_v1, %v367_v29  ;;  %v404_v35 = vmul.f32 %v2161_v1, %v368_v31  ;;  %v483_v46 = vld [vmem:[%s2189_s17 + $0x20] sm:$0xff]  ;;  %v350_v55 = vld [vmem:[%s2172_s12 + $0x38] sm:$0xff]  ;;  %v405_v58 = vmul.f32 %v2161_v1, %v369_v53 }
  0x13   : > { %555 = vst.msk [vmem:[#allocation2 + $0x30] sm:$0x1] %vm552_vm1, %v2094_v0  ;;  %v449_v16 = vmax.f32 %v417_v10, 0.0  ;;  %v447_v17 = vmax.f32 %v415_v11, 0.0  ;;  %v450_v19 = vmax.f32 %v418_v15, 0.0  ;;  %v416_v36 = vadd.f32 %v2177_v2, %v380_v30  ;;  %v480_v44 = vld [vmem:[%s2189_s17 + $0x8] sm:$0xff] }
  0x14   : > { %v658_v9 = vld [vmem:[#allocation2 + $0x1] sm:$0xff]  ;;  %556 = vst.msk [vmem:[#allocation2 + $0x48] sm:$0x1] %vm552_vm1, %v2094_v0  ;;  %v384_v37 = vmul.f32 %v2161_v1, %v348_v33  ;;  %v419_v38 = vadd.f32 %v2177_v2, %v383_v32  ;;  %v439_v40 = vadd.f32 %v2177_v2, %v403_v34  ;;  %v440_v41 = vadd.f32 %v2177_v2, %v404_v35  ;;  %v505_v6 = vld [vmem:[%s2189_s17 + $0xd0] sm:$0xff]  ;;  %v486_v10 = vld [vmem:[%s2189_s17 + $0x38] sm:$0xff] }
  0x15   : > { %v694_v12 = vld [vmem:[#allocation2 + $0x2] sm:$0xff]  ;;  %766 = vrot.lane.b32.xlu1 %v658_v9, %s2095_s18  ;;  %557 = vst.msk [vmem:[#allocation2 + $0x60] sm:$0x1] %vm552_vm1, %v2094_v0  ;;  %v513_v20 = vadd.f32 %v481_v13, %v449_v16  ;;  %v511_v21 = vadd.f32 %v479_v14, %v447_v17  ;;  %v514_v22 = vadd.f32 %v482_v18, %v450_v19  ;;  %v448_v42 = vmax.f32 %v416_v36, 0.0  ;;  %v370_v16 = vld [vmem:[%s2172_s12 + $0xd8] sm:$0xff] }
  0x16   : > { %910 = vrot.lane.b32.xlu2 %v694_v12, %s2096_s19  ;;  %558 = vst.msk [vmem:[#allocation2 + $0x78] sm:$0x1] %vm552_vm1, %v2094_v0  ;;  %v420_v43 = vadd.f32 %v2177_v2, %v384_v37  ;;  %v451_v45 = vmax.f32 %v419_v38, 0.0  ;;  %v471_v47 = vmax.f32 %v439_v40, 0.0  ;;  %v503_v48 = vld [vmem:[%s2189_s17 + $0xc0] sm:$0xff]  ;;  %v472_v49 = vmax.f32 %v440_v41, 0.0 }
  0x17   : > { %559 = vst.msk [vmem:[#allocation2 + $0x90] sm:$0x1] %vm552_vm1, %v2094_v0  ;;  %v504_v50 = vld [vmem:[%s2189_s17 + $0xc8] sm:$0xff]  ;;  %v512_v51 = vadd.f32 %v480_v44, %v448_v42  ;;  %v385_v59 = vmul.f32 %v2161_v1, %v349_v54  ;;  %v386_v60 = vmul.f32 %v2161_v1, %v350_v55  ;;  %v441_v63 = vadd.f32 %v2177_v2, %v405_v58  ;;  %v351_v25 = vld [vmem:[%s2172_s12 + $0x40] sm:$0xff]  ;;  %v353_v58 = vld [vmem:[%s2172_s12 + $0x50] sm:$0xff] }
  0x18   : > { %560 = vst.msk [vmem:[#allocation2 + $0xa8] sm:$0x1] %vm552_vm1, %v2094_v0  ;;  %v452_v52 = vmax.f32 %v420_v43, 0.0  ;;  %v515_v56 = vadd.f32 %v483_v46, %v451_v45  ;;  %v484_v57 = vld [vmem:[%s2189_s17 + $0x28] sm:$0xff]  ;;  %v535_v61 = vadd.f32 %v503_v48, %v471_v47  ;;  %v536_v62 = vadd.f32 %v504_v50, %v472_v49  ;;  %v487_v32 = vld [vmem:[%s2189_s17 + $0x40] sm:$0xff] }
  0x19   : > { %561 = vst.msk [vmem:[#allocation2 + $0xc0] sm:$0x1] %vm552_vm1, %v2094_v0  ;;  %v421_v3 = vadd.f32 %v2177_v2, %v385_v59  ;;  %v422_v4 = vadd.f32 %v2177_v2, %v386_v60  ;;  %v473_v7 = vmax.f32 %v441_v63, 0.0  ;;  %v406_v17 = vmul.f32 %v2161_v1, %v370_v16  ;;  %v352_v34 = vld [vmem:[%s2172_s12 + $0x48] sm:$0xff]  ;;  %v371_v37 = vld [vmem:[%s2172_s12 + $0xe0] sm:$0xff]  ;;  %v373_v59 = vld [vmem:[%s2172_s12 + $0xf0] sm:$0xff] }
  0x1a   : > { %592 = vst.msk [vmem:[#allocation2 + $0x31] sm:$0xff] %vm543_vm0, %v513_v20  ;;  %v516_v5 = vadd.f32 %v484_v57, %v452_v52  ;;  %v387_v27 = vmul.f32 %v2161_v1, %v351_v25  ;;  %v388_v36 = vmul.f32 %v2161_v1, %v352_v34  ;;  %v372_v38 = vld [vmem:[%s2172_s12 + $0xe8] sm:$0xff]  ;;  %v507_v50 = vld [vmem:[%s2189_s17 + $0xe0] sm:$0xff] }
  0x1b   : > { %590 = vst.msk [vmem:[#allocation2 + $0x19] sm:$0xff] %vm543_vm0, %v511_v21  ;;  %v453_v8 = vmax.f32 %v421_v3, 0.0  ;;  %v454_v9 = vmax.f32 %v422_v4, 0.0  ;;  %v537_v12 = vadd.f32 %v505_v6, %v473_v7  ;;  %v442_v19 = vadd.f32 %v2177_v2, %v406_v17  ;;  %v488_v42 = vld [vmem:[%s2189_s17 + $0x48] sm:$0xff]  ;;  %v489_v4 = vld [vmem:[%s2189_s17 + $0x50] sm:$0xff] }
  0x1c   : > { %593 = vst.msk [vmem:[#allocation2 + $0x39] sm:$0xff] %vm543_vm0, %v514_v22  ;;  %v408_v40 = vmul.f32 %v2161_v1, %v372_v38  ;;  %v424_v41 = vadd.f32 %v2177_v2, %v388_v36 }
  0x1d   : > { %562 = vst.msk [vmem:[#allocation2 + $0xd8] sm:$0x1] %vm552_vm1, %v2094_v0  ;;  %v518_v14 = vadd.f32 %v486_v10, %v454_v9  ;;  %v474_v21 = vmax.f32 %v442_v19, 0.0  ;;  %v509_v9 = vld [vmem:[%s2189_s17 + $0xf0] sm:$0xff] }
  0x1e   : > { %563 = vst.msk [vmem:[#allocation2 + $0xf0] sm:$0x1] %vm552_vm1, %v2094_v0  ;;  %v444_v44 = vadd.f32 %v2177_v2, %v408_v40  ;;  %v456_v46 = vmax.f32 %v424_v41, 0.0  ;;  %v501_v41 = vld [vmem:[%s2189_s17 + $0xb0] sm:$0xff] }
  0x1f   : > { %564 = vst.msk [vmem:[#allocation2 + $0x108] sm:$0x1] %vm552_vm1, %v2094_v0 }
  0x20   : > { %565 = vst.msk [vmem:[#allocation2 + $0x120] sm:$0x1] %vm552_vm1, %v2094_v0  ;;  %v476_v49 = vmax.f32 %v444_v44, 0.0  ;;  %v520_v52 = vadd.f32 %v488_v42, %v456_v46  ;;  %v492_v46 = vld [vmem:[%s2189_s17 + $0x68] sm:$0xff] }
  0x21   : > { %v662_v23 = vld [vmem:[#allocation2 + $0x31] sm:$0xff]  ;;  %566 = vst.msk [vmem:[#allocation2 + $0x138] sm:$0x1] %vm552_vm1, %v2094_v0 }
  0x22   : > { %774 = vrot.lane.b32.xlu0 %v662_v23, %s2095_s18  ;;  %v660_v24 = vld [vmem:[#allocation2 + $0x19] sm:$0xff]  ;;  %567 = vst.msk [vmem:[#allocation2 + $0x150] sm:$0x1] %vm552_vm1, %v2094_v0 }
  0x23   : > { %770 = vrot.lane.b32.xlu1 %v660_v24, %s2095_s18  ;;  %568 = vst.msk [vmem:[#allocation2 + $0x168] sm:$0x1] %vm552_vm1, %v2094_v0  ;;  %v698_v26 = vld [vmem:[#allocation2 + $0x32] sm:$0xff]  ;;  %v699_v28 = vld [vmem:[#allocation2 + $0x3a] sm:$0xff] }
  0x24   : > { %569 = vst.msk [vmem:[#allocation2 + $0x180] sm:$0x1] %vm552_vm1, %v2094_v0  ;;  %v663_v39 = vld [vmem:[#allocation2 + $0x39] sm:$0xff] }
  0x25   : > { %570 = vst.msk [vmem:[#allocation2 + $0x198] sm:$0x1] %vm552_vm1, %v2094_v0  ;;  %v506_v23 = vld [vmem:[%s2189_s17 + $0xd8] sm:$0xff] }
  0x26   : > { %572 = vst.msk [vmem:[#allocation2 + $0x29] sm:$0x1] %vm552_vm1, %v2094_v0  ;;  %v538_v24 = vadd.f32 %v506_v23, %v474_v21  ;;  %v490_v23 = vld [vmem:[%s2189_s17 + $0x58] sm:$0xff] }
  0x27   : > { %574 = vst.msk [vmem:[#allocation2 + $0x59] sm:$0x1] %vm552_vm1, %v2094_v0 }
  0x28   : > { %575 = vst.msk [vmem:[#allocation2 + $0x71] sm:$0x1] %vm552_vm1, %v2094_v0 }
  0x29   : > { %576 = vst.msk [vmem:[#allocation2 + $0x89] sm:$0x1] %vm552_vm1, %v2094_v0 }
  0x2a   : > { %918 = vrot.lane.b32.xlu0 %v698_v26, %s2096_s19  ;;  %577 = vst.msk [vmem:[#allocation2 + $0xa1] sm:$0x1] %vm552_vm1, %v2094_v0 }
  0x2b   : > { %920 = vrot.lane.b32.xlu1 %v699_v28, %s2096_s19  ;;  %578 = vst.msk [vmem:[#allocation2 + $0xb9] sm:$0x1] %vm552_vm1, %v2094_v0  ;;  %v423_v28 = vadd.f32 %v2177_v2, %v387_v27 }
  0x2c   : > { %579 = vst.msk [vmem:[#allocation2 + $0xd1] sm:$0x1] %vm552_vm1, %v2094_v0 }
  0x2d   : > { %580 = vst.msk [vmem:[#allocation2 + $0xe9] sm:$0x1] %vm552_vm1, %v2094_v0  ;;  %v455_v30 = vmax.f32 %v423_v28, 0.0 }
  0x2e   : > { %581 = vst.msk [vmem:[#allocation2 + $0x101] sm:$0x1] %vm552_vm1, %v2094_v0 }
  0x2f   : > { %582 = vst.msk [vmem:[#allocation2 + $0x119] sm:$0x1] %vm552_vm1, %v2094_v0  ;;  %v519_v33 = vadd.f32 %v487_v32, %v455_v30  ;;  %v355_v30 = vld [vmem:[%s2172_s12 + $0x60] sm:$0xff] }
  0x30   : > { %583 = vst.msk [vmem:[#allocation2 + $0x131] sm:$0x1] %vm552_vm1, %v2094_v0  ;;  %v391_v34 = vmul.f32 %v2161_v1, %v355_v30 }
  0x31   : > { %584 = vst.msk [vmem:[#allocation2 + $0x149] sm:$0x1] %vm552_vm1, %v2094_v0 }
  0x32   : > { %585 = vst.msk [vmem:[#allocation2 + $0x161] sm:$0x1] %vm552_vm1, %v2094_v0  ;;  %776 = vrot.lane.b32.xlu0 %v663_v39, %s2095_s18  ;;  %v407_v39 = vmul.f32 %v2161_v1, %v371_v37  ;;  %v427_v37 = vadd.f32 %v2177_v2, %v391_v34 }
  0x33   : > { %586 = vst.msk [vmem:[#allocation2 + $0x179] sm:$0x1] %vm552_vm1, %v2094_v0 }
  0x34   : > { %587 = vst.msk [vmem:[#allocation2 + $0x191] sm:$0x1] %vm552_vm1, %v2094_v0  ;;  %v443_v43 = vadd.f32 %v2177_v2, %v407_v39  ;;  %v459_v42 = vmax.f32 %v427_v37, 0.0 }
  0x35   : > { %547 = vst.msk [vmem:[#allocation2 + $0x10] sm:$0x3] %vm546_vm2, %v2094_v0 }
  0x36   : > { %571 = vst.msk [vmem:[#allocation2 + $0x11] sm:$0x1] %vm552_vm1, %v2094_v0  ;;  %v475_v48 = vmax.f32 %v443_v43, 0.0 }
  0x37   : > { %551 = vst.msk [vmem:[#allocation2 + $0x1a8] sm:$0x3] %vm546_vm2, %v2094_v0 }
  0x38   : > { %588 = vst.msk [vmem:[#allocation2 + $0x1a9] sm:$0x1] %vm552_vm1, %v2094_v0  ;;  %v485_v0 = vld [vmem:[%s2189_s17 + $0x30] sm:$0xff]  ;;  %v539_v53 = vadd.f32 %v507_v50, %v475_v48  ;;  %v366_v50 = vld [vmem:[%s2172_s12 + $0xb8] sm:$0xff] }
  0x39   : > { %591 = vst.msk [vmem:[#allocation2 + $0x21] sm:$0xff] %vm543_vm0, %v512_v51  ;;  %v517_v13 = vadd.f32 %v485_v0, %v453_v8  ;;  %v508_v51 = vld [vmem:[%s2189_s17 + $0xe8] sm:$0xff] }
  0x3a   : > { %594 = vst.msk [vmem:[#allocation2 + $0x49] sm:$0xff] %vm543_vm0, %v515_v56  ;;  %v540_v54 = vadd.f32 %v508_v51, %v476_v49 }
  0x3b   : > { %614 = vst.msk [vmem:[#allocation2 + $0x139] sm:$0xff] %vm543_vm0, %v535_v61  ;;  %v389_v61 = vmul.f32 %v2161_v1, %v353_v58  ;;  %v1958_v58 = vld [vmem:[%s3020_s4 + $0x10] sm:$0xff] }
  0x3c   : > { %v659_v11 = vld [vmem:[#allocation2 + $0x9] sm:$0xff]  ;;  %615 = vst.msk [vmem:[#allocation2 + $0x141] sm:$0xff] %vm543_vm0, %v536_v62  ;;  %v409_v62 = vmul.f32 %v2161_v1, %v373_v59  ;;  %v1091_v59 = vld [vmem:[%s3020_s4] sm:$0xff] }
  0x3d   : > { %v695_v15 = vld [vmem:[#allocation2 + $0xa] sm:$0xff]  ;;  %768 = vrot.lane.b32.xlu2 %v659_v11, %s2095_s18  ;;  %595 = vst.msk [vmem:[#allocation2 + $0x51] sm:$0xff] %vm543_vm0, %v516_v5  ;;  %v425_v63 = vadd.f32 %v2177_v2, %v389_v61  ;;  %v374_v11 = vld [vmem:[%s2172_s12 + $0xf8] sm:$0xff]  ;;  %v2437_v61 = vld [vmem:[%s3020_s4 + $0x20] sm:$0xff] }
  0x3e   : > { %912 = vrot.lane.b32.xlu1 %v695_v15, %s2096_s19  ;;  %616 = vst.msk [vmem:[#allocation2 + $0x151] sm:$0xff] %vm543_vm0, %v537_v12  ;;  %v445_v3 = vadd.f32 %v2177_v2, %v409_v62  ;;  %v354_v12 = vld [vmem:[%s2172_s12 + $0x58] sm:$0xff] }
  0x3f   : > { %596 = vst.msk [vmem:[#allocation2 + $0x61] sm:$0xff] %vm543_vm0, %v517_v13  ;;  %v457_v6 = vmax.f32 %v425_v63, 0.0  ;;  %v390_v15 = vmul.f32 %v2161_v1, %v354_v12  ;;  %v502_v63 = vld [vmem:[%s2189_s17 + $0xb8] sm:$0xff] }
  0x40   : > { %v661_v18 = vld [vmem:[#allocation2 + $0x21] sm:$0xff]  ;;  %597 = vst.msk [vmem:[#allocation2 + $0x69] sm:$0xff] %vm543_vm0, %v518_v14  ;;  %v477_v7 = vmax.f32 %v445_v3, 0.0  ;;  %v410_v14 = vmul.f32 %v2161_v1, %v374_v11 }
  0x41   : > { %772 = vrot.lane.b32.xlu0 %v661_v18, %s2095_s18  ;;  %v696_v20 = vld [vmem:[#allocation2 + $0x1a] sm:$0xff]  ;;  %v664_v26 = vld [vmem:[#allocation2 + $0x49] sm:$0xff]  ;;  %617 = vst.msk [vmem:[#allocation2 + $0x159] sm:$0xff] %vm543_vm0, %v538_v24  ;;  %v521_v0 = vadd.f32 %v489_v4, %v457_v6  ;;  %v426_v17 = vadd.f32 %v2177_v2, %v390_v15 }
  0x42   : > { %v684_v22 = vld [vmem:[#allocation2 + $0x139] sm:$0xff]  ;;  %v697_v29 = vld [vmem:[#allocation2 + $0x22] sm:$0xff]  ;;  %598 = vst.msk [vmem:[#allocation2 + $0x79] sm:$0xff] %vm543_vm0, %v519_v33  ;;  %v541_v10 = vadd.f32 %v509_v9, %v477_v7  ;;  %v446_v16 = vadd.f32 %v2177_v2, %v410_v14  ;;  %v493_v15 = vld [vmem:[%s2189_s17 + $0x70] sm:$0xff] }
  0x43   : > { %v720_v35 = vld [vmem:[#allocation2 + $0x13a] sm:$0xff]  ;;  %v721_v47 = vld [vmem:[#allocation2 + $0x142] sm:$0xff]  ;;  %599 = vst.msk [vmem:[#allocation2 + $0x81] sm:$0xff] %vm543_vm0, %v520_v52  ;;  %v458_v21 = vmax.f32 %v426_v17, 0.0  ;;  %v402_v52 = vmul.f32 %v2161_v1, %v366_v50 }
  0x44   : > { %v665_v31 = vld [vmem:[#allocation2 + $0x51] sm:$0xff]  ;;  %618 = vst.msk [vmem:[#allocation2 + $0x169] sm:$0xff] %vm543_vm0, %v539_v53  ;;  %v685_v56 = vld [vmem:[#allocation2 + $0x141] sm:$0xff] }
  0x45   : > { %914 = vrot.lane.b32.xlu2 %v696_v20, %s2096_s19  ;;  %v700_v45 = vld [vmem:[#allocation2 + $0x4a] sm:$0xff]  ;;  %v701_v55 = vld [vmem:[#allocation2 + $0x52] sm:$0xff]  ;;  %619 = vst.msk [vmem:[#allocation2 + $0x171] sm:$0xff] %vm543_vm0, %v540_v54  ;;  %v478_v20 = vmax.f32 %v446_v16, 0.0  ;;  %v522_v25 = vadd.f32 %v490_v23, %v458_v21  ;;  %v438_v53 = vadd.f32 %v2177_v2, %v402_v52  ;;  %v622_v3 = vld [vmem:[#allocation2] sm:$0xff] }
  0x46   : > { %818 = vrot.lane.b32.xlu1 %v684_v22, %s2095_s18  ;;  %v686_v60 = vld [vmem:[#allocation2 + $0x151] sm:$0xff]  ;;  %v666_v5 = vld [vmem:[#allocation2 + $0x61] sm:$0xff]  ;;  %600 = vst.msk [vmem:[#allocation2 + $0x91] sm:$0xff] %vm543_vm0, %v521_v0 }
  0x47   : > { %v702_v57 = vld [vmem:[#allocation2 + $0x62] sm:$0xff]  ;;  %620 = vst.msk [vmem:[#allocation2 + $0x181] sm:$0xff] %vm543_vm0, %v541_v10  ;;  %v510_v18 = vld [vmem:[%s2189_s17 + $0xf8] sm:$0xff]  ;;  %v703_v27 = vld [vmem:[#allocation2 + $0x6a] sm:$0xff]  ;;  %v470_v62 = vmax.f32 %v438_v53, 0.0 }
  0x48   : > { %v687_v8 = vld [vmem:[#allocation2 + $0x159] sm:$0xff]  ;;  %v667_v13 = vld [vmem:[#allocation2 + $0x69] sm:$0xff]  ;;  %v542_v24 = vadd.f32 %v510_v18, %v478_v20  ;;  %601 = vst.msk [vmem:[#allocation2 + $0x99] sm:$0xff] %vm543_vm0, %v522_v25 }
  0x49   : > { %778 = vrot.lane.b32.xlu0 %v664_v26, %s2095_s18  ;;  %v722_v19 = vld [vmem:[#allocation2 + $0x152] sm:$0xff]  ;;  %v723_v26 = vld [vmem:[#allocation2 + $0x15a] sm:$0xff]  ;;  %v356_v33 = vld [vmem:[%s2172_s12 + $0x68] sm:$0xff]  ;;  %v534_v4 = vadd.f32 %v502_v63, %v470_v62 }
  0x4a   : > { %v668_v22 = vld [vmem:[#allocation2 + $0x79] sm:$0xff]  ;;  %621 = vst.msk [vmem:[#allocation2 + $0x189] sm:$0xff] %vm543_vm0, %v542_v24  ;;  %v705_v43 = vld [vmem:[#allocation2 + $0x82] sm:$0xff] }
  0x4b   : > { %v688_v39 = vld [vmem:[#allocation2 + $0x169] sm:$0xff]  ;;  %v669_v54 = vld [vmem:[#allocation2 + $0x81] sm:$0xff]  ;;  %613 = vst.msk [vmem:[#allocation2 + $0x129] sm:$0xff] %vm543_vm0, %v534_v4  ;;  %v358_v17 = vld [vmem:[%s2172_s12 + $0x78] sm:$0xff] }
  0x4c   : > { %v724_v28 = vld [vmem:[#allocation2 + $0x16a] sm:$0xff]  ;;  %v725_v12 = vld [vmem:[#allocation2 + $0x172] sm:$0xff] }
  0x4d   : > { %916 = vrot.lane.b32.xlu2 %v697_v29, %s2096_s19  ;;  %v365_v29 = vld [vmem:[%s2172_s12 + $0xb0] sm:$0xff]  ;;  %v494_v24 = vld [vmem:[%s2189_s17 + $0x78] sm:$0xff] }
  0x4e   : > { %780 = vrot.lane.b32.xlu1 %v665_v31, %s2095_s18  ;;  %v704_v31 = vld [vmem:[#allocation2 + $0x7a] sm:$0xff]  ;;  %v401_v32 = vmul.f32 %v2161_v1, %v365_v29  ;;  %v689_v51 = vld [vmem:[#allocation2 + $0x171] sm:$0xff]  ;;  %v360_v29 = vld [vmem:[%s2172_s12 + $0x88] sm:$0xff] }
  0x4f   : > { %v670_v6 = vld [vmem:[#allocation2 + $0x91] sm:$0xff]  ;;  %v671_v14 = vld [vmem:[#allocation2 + $0x99] sm:$0xff] }
  0x50   : > { %v437_v36 = vadd.f32 %v2177_v2, %v401_v32  ;;  %v706_v21 = vld [vmem:[#allocation2 + $0x92] sm:$0xff]  ;;  %v396_v32 = vmul.f32 %v2161_v1, %v360_v29 }
  0x51   : > { %962 = vrot.lane.b32.xlu0 %v720_v35, %s2096_s19  ;;  %v392_v35 = vmul.f32 %v2161_v1, %v356_v33  ;;  %v726_v18 = vld [vmem:[#allocation2 + $0x182] sm:$0xff]  ;;  %v727_v23 = vld [vmem:[#allocation2 + $0x18a] sm:$0xff]  ;;  %v627_v53 = vld [vmem:[#allocation2 + $0x38] sm:$0xff] }
  0x52   : > { %v469_v40 = vmax.f32 %v437_v36, 0.0  ;;  %v626_v33 = vld [vmem:[#allocation2 + $0x30] sm:$0xff]  ;;  %v624_v36 = vld [vmem:[#allocation2 + $0x18] sm:$0xff] }
  0x53   : > { %v428_v38 = vadd.f32 %v2177_v2, %v392_v35  ;;  %v432_v35 = vadd.f32 %v2177_v2, %v396_v32  ;;  %v691_v37 = vld [vmem:[#allocation2 + $0x189] sm:$0xff]  ;;  %v362_v4 = vld [vmem:[%s2172_s12 + $0x98] sm:$0xff] }
  0x55   : > { %922 = vrot.lane.b32.xlu2 %v700_v45, %s2096_s19  ;;  %v460_v44 = vmax.f32 %v428_v38, 0.0  ;;  %v491_v45 = vld [vmem:[%s2189_s17 + $0x60] sm:$0xff] }
  0x56   : > { %964 = vrot.lane.b32.xlu1 %v721_v47, %s2096_s19  ;;  %v533_v47 = vadd.f32 %v501_v41, %v469_v40  ;;  %v523_v48 = vadd.f32 %v491_v45, %v459_v42  ;;  %v464_v41 = vmax.f32 %v432_v35, 0.0  ;;  %v496_v45 = vld [vmem:[%s2189_s17 + $0x88] sm:$0xff] }
  0x57   : > { %v524_v49 = vadd.f32 %v492_v46, %v460_v44  ;;  %v495_v44 = vld [vmem:[%s2189_s17 + $0x80] sm:$0xff] }
  0x58   : > { %612 = vst.msk [vmem:[#allocation2 + $0x121] sm:$0xff] %vm543_vm0, %v533_v47 }
  0x59   : > { %924 = vrot.lane.b32.xlu0 %v701_v55, %s2096_s19  ;;  %602 = vst.msk [vmem:[#allocation2 + $0xa9] sm:$0xff] %vm543_vm0, %v523_v48  ;;  %v1959_v55 = vld [vmem:[%s3020_s4 + $0x18] sm:$0xf] }
  0x5a   : > { %603 = vst.msk [vmem:[#allocation2 + $0xb1] sm:$0xff] %vm543_vm0, %v524_v49  ;;  %1960 = vmatpush.msk.msra.mxu0 %vm1193_vm3, %v1959_v55  ;;  %2066 = vmatpush.msk.msra.mxu3 %vm1193_vm3, %v1959_v55  ;;  %v528_v49 = vadd.f32 %v496_v45, %v464_v41  ;;  %v683_v55 = vld [vmem:[#allocation2 + $0x129] sm:$0xff] }
  0x5c   : > { %1212 = vmatpush.msra.mxu0 %v1958_v58  ;;  %2067 = vmatpush.msra.mxu3 %v1958_v58  ;;  %607 = vst.msk [vmem:[#allocation2 + $0xe1] sm:$0xff] %vm543_vm0, %v528_v49 }
  0x5d   : > { %820 = vrot.lane.b32.xlu2 %v685_v56, %s2095_s18  ;;  %v1092_v56 = vld [vmem:[%s3020_s4 + $0x8] sm:$0xf] }
  0x5e   : > { %926 = vrot.lane.b32.xlu1 %v702_v57, %s2096_s19  ;;  %1993 = vmatpush.msk.msra.mxu1 %vm1193_vm3, %v1092_v56  ;;  %v2424_v57 = vld [vmem:[%s3020_s4 + $0x28] sm:$0xf] }
  0x5f   : > { %2028 = vmatpush.msk.msra.mxu2 %vm1193_vm3, %v2424_v57  ;;  %2068 = vmatpush.msk.msrb.mxu3 %vm1193_vm3, %v1092_v56  ;;  %v682_v50 = vld [vmem:[#allocation2 + $0x121] sm:$0xff] }
  0x60   : > { %1334 = vmatpush.msra.mxu1 %v1091_v59 }
  0x61   : > { %822 = vrot.lane.b32.xlu0 %v686_v60, %s2095_s18  ;;  %v690_v60 = vld [vmem:[#allocation2 + $0x181] sm:$0xff]  ;;  %1459 = vmatpush.msra.mxu2 %v2437_v61  ;;  %v673_v62 = vld [vmem:[#allocation2 + $0xb1] sm:$0xff] }
  0x62   : > { %2069 = vmatpush.msrb.mxu3 %v1091_v59 }
  0x65   : > { %782 = vrot.lane.b32.xlu2 %v666_v5, %s2095_s18  ;;  %v357_v5 = vld [vmem:[%s2172_s12 + $0x70] sm:$0xff] }
  0x66   : > { %824 = vrot.lane.b32.xlu1 %v687_v8, %s2095_s18  ;;  %v393_v7 = vmul.f32 %v2161_v1, %v357_v5 }
  0x68   : > { %v429_v10 = vadd.f32 %v2177_v2, %v393_v7 }
  0x69   : > { %784 = vrot.lane.b32.xlu0 %v667_v13, %s2095_s18 }
  0x6a   : > { %v461_v13 = vmax.f32 %v429_v10, 0.0  ;;  %v623_v10 = vld [vmem:[#allocation2 + $0x8] sm:$0xff] }
  0x6c   : > { %v525_v16 = vadd.f32 %v493_v15, %v461_v13  ;;  %v498_v15 = vld [vmem:[%s2189_s17 + $0x98] sm:$0xff] }
  0x6d   : > { %966 = vrot.lane.b32.xlu2 %v722_v19, %s2096_s19  ;;  %v394_v19 = vmul.f32 %v2161_v1, %v358_v17 }
  0x6e   : > { %786 = vrot.lane.b32.xlu1 %v668_v22, %s2095_s18  ;;  %604 = vst.msk [vmem:[#allocation2 + $0xc1] sm:$0xff] %vm543_vm0, %v525_v16 }
  0x6f   : > { %v430_v20 = vadd.f32 %v2177_v2, %v394_v19 }
  0x70   : > { %v911_v9 = vpop.permute.xlu2 %910 }
  0x71   : > { %968 = vrot.lane.b32.xlu0 %v723_v26, %s2096_s19  ;;  %v462_v22 = vmax.f32 %v430_v20, 0.0 }
  0x73   : > { %v526_v26 = vadd.f32 %v494_v24, %v462_v22  ;;  %v625_v22 = vld [vmem:[#allocation2 + $0x20] sm:$0xff] }
  0x75   : > { %928 = vrot.lane.b32.xlu2 %v703_v27, %s2096_s19  ;;  %v707_v27 = vld [vmem:[#allocation2 + $0x9a] sm:$0xff]  ;;  %605 = vst.msk [vmem:[#allocation2 + $0xc9] sm:$0xff] %vm543_vm0, %v526_v26 }
  0x76   : > { %970 = vrot.lane.b32.xlu1 %v724_v28, %s2096_s19  ;;  %v359_v28 = vld [vmem:[%s2172_s12 + $0x80] sm:$0xff] }
  0x79   : > { %930 = vrot.lane.b32.xlu0 %v704_v31, %s2096_s19  ;;  %v395_v31 = vmul.f32 %v2161_v1, %v359_v28  ;;  %v363_v28 = vld [vmem:[%s2172_s12 + $0xa0] sm:$0xff] }
  0x7b   : > { %v431_v34 = vadd.f32 %v2177_v2, %v395_v31 }
  0x7c   : > { %v675_v29 = vld [vmem:[#allocation2 + $0xc9] sm:$0xff] }
  0x7d   : > { %826 = vrot.lane.b32.xlu2 %v688_v39, %s2095_s18  ;;  %v708_v39 = vld [vmem:[#allocation2 + $0xaa] sm:$0xff]  ;;  %v463_v40 = vmax.f32 %v431_v34, 0.0  ;;  %v710_v35 = vld [vmem:[#allocation2 + $0xc2] sm:$0xff] }
  0x7e   : > { %932 = vrot.lane.b32.xlu1 %v705_v43, %s2096_s19  ;;  %v628_v34 = vld [vmem:[#allocation2 + $0x48] sm:$0xff] }
  0x7f   : > { %v527_v48 = vadd.f32 %v495_v44, %v463_v40  ;;  %v677_v40 = vld [vmem:[#allocation2 + $0xe1] sm:$0xff]  ;;  %v648_v44 = vld [vmem:[#allocation2 + $0x138] sm:$0xff] }
  0x81   : > { %828 = vrot.lane.b32.xlu0 %v689_v51, %s2095_s18  ;;  %606 = vst.msk [vmem:[#allocation2 + $0xd9] sm:$0xff] %vm543_vm0, %v527_v48 }
  0x85   : > { %788 = vrot.lane.b32.xlu2 %v669_v54, %s2095_s18  ;;  %v672_v54 = vld [vmem:[#allocation2 + $0xa9] sm:$0xff] }
  0x86   : > { %830 = vrot.lane.b32.xlu1 %v690_v60, %s2095_s18  ;;  %v361_v60 = vld [vmem:[%s2172_s12 + $0x90] sm:$0xff] }
  0x87   : > { %v767_v8 = vpop.permute.xlu1 %766 }
  0x88   : > { %v1018_v0 = vsel %vm543_vm0, %v622_v3, %v767_v8  ;;  %v397_v3 = vmul.f32 %v2161_v1, %v361_v60  ;;  %v712_v45 = vld [vmem:[#allocation2 + $0xda] sm:$0xff] }
  0x89   : > { %790 = vrot.lane.b32.xlu0 %v670_v6, %s2095_s18  ;;  %v1055_v11 = vsel %vm1054_vm4, %v1018_v0, %v911_v9  ;;  %v398_v6 = vmul.f32 %v2161_v1, %v362_v4  ;;  %v718_v9 = vld [vmem:[#allocation2 + $0x122] sm:$0xff] }
  0x8a   : > { %1994 = vmatmul.msk.f32.vlgmr.msra.gmra.mxu1 %vm1096_vm5, %v1055_v11  ;;  %v433_v7 = vadd.f32 %v2177_v2, %v397_v3  ;;  %v674_v11 = vld [vmem:[#allocation2 + $0xc1] sm:$0xff] }
  0x8b   : > { %v434_v8 = vadd.f32 %v2177_v2, %v398_v6 }
  0x8c   : > { %v465_v0 = vmax.f32 %v433_v7, 0.0 }
  0x8d   : > { %972 = vrot.lane.b32.xlu2 %v725_v12, %s2096_s19  ;;  %v497_v12 = vld [vmem:[%s2189_s17 + $0x90] sm:$0xff]  ;;  %v466_v13 = vmax.f32 %v434_v8, 0.0  ;;  %v630_v8 = vld [vmem:[#allocation2 + $0x60] sm:$0xff] }
  0x8e   : > { %792 = vrot.lane.b32.xlu1 %v671_v14, %s2095_s18  ;;  %v529_v14 = vadd.f32 %v497_v12, %v465_v0  ;;  %v650_v12 = vld [vmem:[#allocation2 + $0x150] sm:$0xff] }
  0x8f   : > { %v530_v16 = vadd.f32 %v498_v15, %v466_v13 }
  0x90   : > { %608 = vst.msk [vmem:[#allocation2 + $0xf1] sm:$0xff] %vm543_vm0, %v529_v14 }
  0x91   : > { %974 = vrot.lane.b32.xlu0 %v726_v18, %s2096_s19  ;;  %v719_v18 = vld [vmem:[#allocation2 + $0x12a] sm:$0xff]  ;;  %609 = vst.msk [vmem:[#allocation2 + $0xf9] sm:$0xff] %vm543_vm0, %v530_v16 }
  0x94   : > { %v775_v25 = vpop.permute.xlu0 %774 }
  0x95   : > { %934 = vrot.lane.b32.xlu2 %v706_v21, %s2096_s19  ;;  %v771_v38 = vpop.permute.xlu1 %770  ;;  %v1022_v42 = vsel %vm543_vm0, %v626_v33, %v775_v25  ;;  %v711_v25 = vld [vmem:[#allocation2 + $0xca] sm:$0xff] }
  0x96   : > { %976 = vrot.lane.b32.xlu1 %v727_v23, %s2096_s19  ;;  %v1020_v46 = vsel %vm543_vm0, %v624_v36, %v771_v38  ;;  %v709_v23 = vld [vmem:[#allocation2 + $0xb2] sm:$0xff]  ;;  %v499_v38 = vld [vmem:[%s2189_s17 + $0xa0] sm:$0xff] }
  0x97   : > { %v769_v30 = vpop.permute.xlu2 %768  ;;  %v678_v60 = vld [vmem:[#allocation2 + $0xf1] sm:$0xff] }
  0x98   : > { %v1019_v17 = vsel %vm543_vm0, %v623_v10, %v769_v30  ;;  %v399_v30 = vmul.f32 %v2161_v1, %v363_v28 }
  0x99   : > { %936 = vrot.lane.b32.xlu0 %v707_v27, %s2096_s19 }
  0x9a   : > { %v435_v33 = vadd.f32 %v2177_v2, %v399_v30 }
  0x9c   : > { %v919_v43 = vpop.permute.xlu0 %918  ;;  %v467_v36 = vmax.f32 %v435_v33, 0.0  ;;  %v632_v33 = vld [vmem:[#allocation2 + $0x78] sm:$0xff] }
  0x9d   : > { %v2477_v47 = vsel %vm1054_vm4, %v1022_v42, %v919_v43  ;;  %832 = vrot.lane.b32.xlu2 %v691_v37, %s2095_s18  ;;  %v921_v58 = vpop.permute.xlu1 %920  ;;  %v364_v43 = vld [vmem:[%s2172_s12 + $0xa8] sm:$0xff] }
  0x9e   : > { %938 = vrot.lane.b32.xlu1 %v708_v39, %s2096_s19  ;;  %2029 = vmatmul.msk.f32.vlgmr.msra.gmra.mxu2 %vm1096_vm5, %v2477_v47  ;;  %v531_v41 = vadd.f32 %v499_v38, %v467_v36 }
  0x9f   : > { %v915_v51 = vpop.permute.xlu2 %914 }
  0xa0   : > { %v1057_v52 = vsel %vm1054_vm4, %v1020_v46, %v915_v51  ;;  %610 = vst.msk [vmem:[#allocation2 + $0x109] sm:$0xff] %vm543_vm0, %v531_v41  ;;  %v400_v46 = vmul.f32 %v2161_v1, %v364_v43  ;;  %v714_v1 = vld [vmem:[#allocation2 + $0xf2] sm:$0xff] }
  0xa1   : > { %814 = vrot.lane.b32.xlu0 %v682_v50, %s2095_s18  ;;  %1961 = vmatmul.msk.f32.vlgmr.msra.gmra.mxu0 %vm1096_vm5, %v1057_v52 }
  0xa2   : > { %v436_v50 = vadd.f32 %v2177_v2, %v400_v46  ;;  %v629_v2 = vld [vmem:[#allocation2 + $0x50] sm:$0xff] }
  0xa4   : > { %v777_v56 = vpop.permute.xlu0 %776 }
  0xa5   : > { %v1023_v59 = vsel %vm543_vm0, %v627_v53, %v777_v56  ;;  %794 = vrot.lane.b32.xlu2 %v672_v54, %s2095_s18  ;;  %v468_v53 = vmax.f32 %v436_v50, 0.0  ;;  %v649_v56 = vld [vmem:[#allocation2 + $0x140] sm:$0xff] }
  0xa6   : > { %816 = vrot.lane.b32.xlu1 %v683_v55, %s2095_s18  ;;  %v2493_v63 = vsel %vm1054_vm4, %v1023_v59, %v921_v58  ;;  %v500_v55 = vld [vmem:[%s2189_s17 + $0xa8] sm:$0xff]  ;;  %s2680_s17 = scalar_lea.vmem %s3022_s6, %s2166_s9 }
  0xa7   : > { %2030 = vmatmul.msk.f32.gmra.mxu2 %vm1096_vm5, %v2493_v63  ;;  %v917_v5 = vpop.permute.xlu2 %916  ;;  %v532_v59 = vadd.f32 %v500_v55, %v468_v53  ;;  %v680_v0 = vld [vmem:[#allocation2 + $0x109] sm:$0xff] }
  0xa8   : > { %v634_v53 = vld [vmem:[#allocation2 + $0x90] sm:$0xff] }
  0xa9   : > { %796 = vrot.lane.b32.xlu0 %v673_v62, %s2095_s18  ;;  %611 = vst.msk [vmem:[#allocation2 + $0x111] sm:$0xff] %vm543_vm0, %v532_v59  ;;  %v654_v59 = vld [vmem:[#allocation2 + $0x180] sm:$0xff] }
  0xad   : > { %958 = vrot.lane.b32.xlu2 %v718_v9, %s2096_s19 }
  0xae   : > { %798 = vrot.lane.b32.xlu1 %v674_v11, %s2095_s18 }
  0xaf   : > { %v923_v19 = vpop.permute.xlu2 %922 }
  0xb0   : > { %v913_v20 = vpop.permute.xlu1 %912  ;;  %v717_v16 = vld [vmem:[#allocation2 + $0x112] sm:$0xff] }
  0xb1   : > { %v1056_v21 = vsel %vm1054_vm4, %v1019_v17, %v913_v20  ;;  %960 = vrot.lane.b32.xlu0 %v719_v18, %s2096_s19  ;;  %v679_v17 = vld [vmem:[#allocation2 + $0xf9] sm:$0xff] }
  0xb2   : > { %1995 = vmatmul.msk.f32.gmra.mxu1 %vm1096_vm5, %v1056_v21  ;;  %v631_v21 = vld [vmem:[#allocation2 + $0x68] sm:$0xff] }
  0xb3   : > { %v773_v24 = vpop.permute.xlu0 %772 }
  0xb4   : > { %v1021_v26 = vsel %vm543_vm0, %v625_v22, %v773_v24  ;;  %v716_v24 = vld [vmem:[#allocation2 + $0x10a] sm:$0xff] }
  0xb5   : > { %v1058_v27 = vsel %vm1054_vm4, %v1021_v26, %v917_v5  ;;  %940 = vrot.lane.b32.xlu2 %v709_v23, %s2096_s19  ;;  %v651_v26 = vld [vmem:[#allocation2 + $0x158] sm:$0xff] }
  0xb6   : > { %1962 = vmatmul.msk.f32.gmra.mxu0 %vm1096_vm5, %v1058_v27  ;;  %944 = vrot.lane.b32.xlu1 %v711_v25, %s2096_s19 }
  0xb7   : > { %v821_v31 = vpop.permute.xlu2 %820 }
  0xb8   : > { %v819_v32 = vpop.permute.xlu1 %818  ;;  %v1045_v62 = vsel %vm543_vm0, %v649_v56, %v821_v31  ;;  %v652_v31 = vld [vmem:[#allocation2 + $0x168] sm:$0xff] }
  0xb9   : > { %800 = vrot.lane.b32.xlu0 %v675_v29, %s2095_s18  ;;  %v1044_v51 = vsel %vm543_vm0, %v648_v44, %v819_v32 }
  0xba   : > { %1996 = vmatmul.msk.f32.gmra.mxu1 %vm1096_vm5, %v1057_v52  ;;  %v676_v52 = vld [vmem:[#allocation2 + $0xd9] sm:$0xff] }
  0xbb   : > { %v779_v37 = vpop.permute.xlu0 %778 }
  0xbc   : > { %v1024_v39 = vsel %vm543_vm0, %v628_v34, %v779_v37 }
  0xbd   : > { %v2526_v42 = vsel %vm1054_vm4, %v1024_v39, %v923_v19  ;;  %942 = vrot.lane.b32.xlu2 %v710_v35, %s2096_s19  ;;  %v681_v19 = vld [vmem:[#allocation2 + $0x111] sm:$0xff] }
  0xbe   : > { %1963 = vmatmul.msk.f32.gmra.mxu0 %vm1096_vm5, %v2477_v47  ;;  %2031 = vmatmul.msk.f32.gmra.mxu2 %vm1096_vm5, %v2526_v42 }
  0xbf   : > { %804 = vrot.lane.b32.xlu1 %v677_v40, %s2095_s18  ;;  %v783_v48 = vpop.permute.xlu2 %782  ;;  %v633_v40 = vld [vmem:[#allocation2 + $0x80] sm:$0xff] }
  0xc0   : > { %v781_v49 = vpop.permute.xlu1 %780 }
  0xc1   : > { %946 = vrot.lane.b32.xlu0 %v712_v45, %s2096_s19  ;;  %v1025_v5 = vsel %vm543_vm0, %v629_v2, %v781_v49  ;;  %v653_v45 = vld [vmem:[#allocation2 + $0x170] sm:$0xff] }
  0xc2   : > { %1997 = vmatmul.msk.f32.gmra.mxu1 %vm1096_vm5, %v1058_v27 }
  0xc3   : > { %v963_v54 = vpop.permute.xlu0 %962 }
  0xc4   : > { %v2543_v58 = vsel %vm1054_vm4, %v1044_v51, %v963_v54  ;;  %v728_v54 = vld [vmem:[#allocation2 + $0x19a] sm:$0xff] }
  0xc5   : > { %1985 = vmatmul.msk.f32.vlgmr.msra.gmra.mxu3 %vm1096_vm5, %v2543_v58  ;;  %802 = vrot.lane.b32.xlu2 %v676_v52, %s2095_s18 }
  0xc6   : > { %1964 = vmatmul.msk.f32.gmra.mxu0 %vm1096_vm5, %v2493_v63  ;;  %2070 = vmatpush.msk.msra.mxu3 %vm1193_vm3, %v2424_v57  ;;  %v713_v57 = vld [vmem:[#allocation2 + $0xe2] sm:$0xff] }
  0xc7   : > { %950 = vrot.lane.b32.xlu1 %v714_v1, %s2096_s19  ;;  %v967_v3 = vpop.permute.xlu2 %966 }
  0xc8   : > { %v965_v4 = vpop.permute.xlu1 %964  ;;  %2071 = vmatpush.msra.mxu3 %v2437_v61  ;;  %v715_v61 = vld [vmem:[#allocation2 + $0xfa] sm:$0xff] }
  0xc9   : > { %806 = vrot.lane.b32.xlu0 %v678_v60, %s2095_s18  ;;  %v2561_v6 = vsel %vm1054_vm4, %v1045_v62, %v965_v4 }
  0xca   : > { %1998 = vmatmul.msk.f32.gmra.mxu1 %vm1096_vm5, %v2477_v47  ;;  %v1026_v47 = vsel %vm543_vm0, %v630_v8, %v783_v48 }
  0xcb   : > { %v925_v7 = vpop.permute.xlu0 %924 }
  0xcc   : > { %v1062_v9 = vsel %vm1054_vm4, %v1025_v5, %v925_v7  ;;  %v655_v7 = vld [vmem:[#allocation2 + $0x188] sm:$0xff] }
  0xcd   : > { %2032 = vmatmul.msk.f32.gmra.mxu2 %vm1096_vm5, %v1062_v9  ;;  %1986 = vmatmul.msk.f32.gmra.mxu3 %vm1096_vm5, %v2561_v6 }
  0xce   : > { %1965 = vmatmul.msk.f32.gmra.mxu0 %vm1096_vm5, %v2526_v42  ;;  %948 = vrot.lane.b32.xlu2 %v713_v57, %s2096_s19  ;;  %v635_v57 = vld [vmem:[#allocation2 + $0x98] sm:$0xff] }
  0xcf   : > { %v929_v10 = vpop.permute.xlu2 %928  ;;  %810 = vrot.lane.b32.xlu1 %v680_v0, %s2095_s18 }
  0xd0   : > { %v927_v11 = vpop.permute.xlu1 %926 }
  0xd1   : > { %952 = vrot.lane.b32.xlu0 %v715_v61, %s2096_s19  ;;  %v1063_v13 = vsel %vm1054_vm4, %v1026_v47, %v927_v11 }
  0xd2   : > { %1999 = vmatmul.msk.f32.gmra.mxu1 %vm1096_vm5, %v2493_v63 }
  0xd3   : > { %v823_v14 = vpop.permute.xlu0 %822 }
  0xd4   : > { %v1046_v15 = vsel %vm543_vm0, %v650_v12, %v823_v14  ;;  %v692_v14 = vld [vmem:[#allocation2 + $0x199] sm:$0xff] }
  0xd5   : > { %2033 = vmatmul.msk.f32.gmra.mxu2 %vm1096_vm5, %v1063_v13  ;;  %v2579_v18 = vsel %vm1054_vm4, %v1046_v15, %v967_v3  ;;  %v693_v3 = vld [vmem:[#allocation2 + $0x1a1] sm:$0xff] }
  0xd6   : > { %1966 = vmatmul.msk.f32.gmra.mxu0 %vm1096_vm5, %v1062_v9  ;;  %1987 = vmatmul.msk.f32.gmra.mxu3 %vm1096_vm5, %v2579_v18 }
  0xd7   : > { %v827_v20 = vpop.permute.xlu2 %826  ;;  %956 = vrot.lane.b32.xlu1 %v717_v16, %s2096_s19  ;;  %808 = vrot.lane.b32.xlu2 %v679_v17, %s2095_s18  ;;  %v646_v16 = vld [vmem:[#allocation2 + $0x120] sm:$0xff] }
  0xd8   : > { %v825_v63 = vpop.permute.xlu1 %824  ;;  %v1048_v34 = vsel %vm543_vm0, %v652_v31, %v827_v20  ;;  %v638_v31 = vld [vmem:[#allocation2 + $0xc0] sm:$0xff] }
  0xd9   : > { %812 = vrot.lane.b32.xlu0 %v681_v19, %s2095_s18  ;;  %v1047_v29 = vsel %vm543_vm0, %v651_v26, %v825_v63  ;;  %v729_v26 = vld [vmem:[#allocation2 + $0x1a2] sm:$0xff] }
  0xda   : > { %2000 = vmatmul.msk.f32.gmra.mxu1 %vm1096_vm5, %v2526_v42 }
  0xdb   : > { %v785_v22 = vpop.permute.xlu0 %784 }
  0xdc   : > { %v1027_v23 = vsel %vm543_vm0, %v631_v21, %v785_v22 }
  0xdd   : > { %v1064_v25 = vsel %vm1054_vm4, %v1027_v23, %v929_v10  ;;  %v636_v10 = vld [vmem:[#allocation2 + $0xa8] sm:$0xff]  ;;  %v637_v23 = vld [vmem:[#allocation2 + $0xb0] sm:$0xff] }
  0xde   : > { %1967 = vmatmul.msk.f32.gmra.mxu0 %vm1096_vm5, %v1063_v13  ;;  %2034 = vmatmul.msk.f32.gmra.mxu2 %vm1096_vm5, %v1064_v25 }
  0xdf   : > { %v789_v27 = vpop.permute.xlu2 %788  ;;  %954 = vrot.lane.b32.xlu2 %v716_v24, %s2096_s19  ;;  %836 = vrot.lane.b32.xlu1 %v693_v3, %s2095_s18  ;;  %v641_v3 = vld [vmem:[#allocation2 + $0xe0] sm:$0xff] }
  0xe0   : > { %v787_v28 = vpop.permute.xlu1 %786  ;;  %v1029_v42 = vsel %vm543_vm0, %v633_v40, %v789_v27 }
  0xe1   : > { %v1028_v37 = vsel %vm543_vm0, %v632_v33, %v787_v28  ;;  %978 = vrot.lane.b32.xlu0 %v728_v54, %s2096_s19 }
  0xe2   : > { %2001 = vmatmul.msk.f32.gmra.mxu1 %vm1096_vm5, %v1062_v9 }
  0xe3   : > { %v969_v30 = vpop.permute.xlu0 %968 }
  0xe4   : > { %v2597_v32 = vsel %vm1054_vm4, %v1047_v29, %v969_v30  ;;  %v647_v29 = vld [vmem:[#allocation2 + $0x128] sm:$0xff] }
  0xe5   : > { %1988 = vmatmul.msk.f32.gmra.mxu3 %vm1096_vm5, %v2597_v32 }
  0xe6   : > { %1968 = vmatmul.msk.f32.gmra.mxu0 %vm1096_vm5, %v1064_v25 }
  0xe7   : > { %v973_v35 = vpop.permute.xlu2 %972  ;;  %834 = vrot.lane.b32.xlu2 %v692_v14, %s2095_s18 }
  0xe8   : > { %v971_v36 = vpop.permute.xlu1 %970 }
  0xe9   : > { %v2606_v38 = vsel %vm1054_vm4, %v1048_v34, %v971_v36  ;;  %v2670_v36 = vld [vmem:[%s3021_s5] ss:$0 sm:$0xff] }
  0xea   : > { %2002 = vmatmul.msk.f32.gmra.mxu1 %vm1096_vm5, %v1063_v13 }
  0xeb   : > { %v931_v39 = vpop.permute.xlu0 %930 }
  0xec   : > { %v1065_v41 = vsel %vm1054_vm4, %v1028_v37, %v931_v39 }
  0xed   : > { %2035 = vmatmul.msk.f32.gmra.mxu2 %vm1096_vm5, %v1065_v41  ;;  %1989 = vmatmul.msk.f32.gmra.mxu3 %vm1096_vm5, %v2606_v38 }
  0xee   : > { %1969 = vmatmul.msk.f32.gmra.mxu0 %vm1096_vm5, %v1065_v41 }
  0xef   : > { %v935_v43 = vpop.permute.xlu2 %934  ;;  %980 = vrot.lane.b32.xlu2 %v729_v26, %s2096_s19  ;;  %s339_s19 = scalar_lea.vmem %s3023_s7, %s3026_s28 }
  0xf0   : > { %v933_v44 = vpop.permute.xlu1 %932 }
  0xf1   : > { %v1066_v46 = vsel %vm1054_vm4, %v1029_v42, %v933_v44 }
  0xf2   : > { %2003 = vmatmul.msk.f32.gmra.mxu1 %vm1096_vm5, %v1064_v25 }
  0xf3   : > { %v829_v48 = vpop.permute.xlu0 %828 }
  0xf4   : > { %v1049_v49 = vsel %vm543_vm0, %v653_v45, %v829_v48 }
  0xf5   : > { %2036 = vmatmul.msk.f32.gmra.mxu2 %vm1096_vm5, %v1066_v46  ;;  %v2619_v50 = vsel %vm1054_vm4, %v1049_v49, %v973_v35 }
  0xf6   : > { %1970 = vmatmul.msk.f32.gmra.mxu0 %vm1096_vm5, %v1066_v46  ;;  %1990 = vmatmul.msk.f32.gmra.mxu3 %vm1096_vm5, %v2619_v50 }
  0xf7   : > { %v833_v52 = vpop.permute.xlu2 %832 }
  0xf8   : > { %v831_v51 = vpop.permute.xlu1 %830  ;;  %v1051_v8 = vsel %vm543_vm0, %v655_v7, %v833_v52 }
  0xf9   : > { %v1050_v60 = vsel %vm543_vm0, %v654_v59, %v831_v51 }
  0xfa   : > { %2004 = vmatmul.msk.f32.gmra.mxu1 %vm1096_vm5, %v1065_v41 }
  0xfb   : > { %v791_v55 = vpop.permute.xlu0 %790 }
  0xfc   : > { %v1030_v56 = vsel %vm543_vm0, %v634_v53, %v791_v55  ;;  %v640_v53 = vld [vmem:[#allocation2 + $0xd8] sm:$0xff] }
  0xfd   : > { %v1067_v1 = vsel %vm1054_vm4, %v1030_v56, %v935_v43 }
  0xfe   : > { %1971 = vmatmul.msk.f32.gmra.mxu0 %vm1096_vm5, %v1067_v1  ;;  %2037 = vmatmul.msk.f32.gmra.mxu2 %vm1096_vm5, %v1067_v1 }
  0xff   : > { %v795_v62 = vpop.permute.xlu2 %794 }
 0x100   : > { %v793_v2 = vpop.permute.xlu1 %792  ;;  %v1032_v13 = vsel %vm543_vm0, %v636_v10, %v795_v62 }
 0x101   : > { %v1031_v0 = vsel %vm543_vm0, %v635_v57, %v793_v2 }
 0x102   : > { %2005 = vmatmul.msk.f32.gmra.mxu1 %vm1096_vm5, %v1066_v46  ;;  %v639_v46 = vld [vmem:[#allocation2 + $0xc8] sm:$0xff] }
 0x103   : > { %v975_v4 = vpop.permute.xlu0 %974 }
 0x104   : > { %v2634_v5 = vsel %vm1054_vm4, %v1050_v60, %v975_v4 }
 0x105   : > { %1991 = vmatmul.msk.f32.gmra.mxu3 %vm1096_vm5, %v2634_v5 }
 0x107   : > { %v959_v12 = vpop.permute.xlu2 %958  ;;  %v1336_v28 = vpop.f32.mrf.mxu1 }
 0x108   : > { %v977_v9 = vpop.permute.xlu1 %976 }
 0x109   : > { %v2642_v47 = vsel %vm1054_vm4, %v1051_v8, %v977_v9 }
 0x10a   : > { %2006 = vmatmul.msk.f32.gmra.mxu1 %vm1096_vm5, %v1067_v1 }
 0x10b   : > { %v937_v61 = vpop.permute.xlu0 %936 }
 0x10c   : > { %v1068_v11 = vsel %vm1054_vm4, %v1031_v0, %v937_v61 }
 0x10d   : > { %1972 = vmatmul.msk.f32.gmra.mxu0 %vm1096_vm5, %v1068_v11  ;;  %2038 = vmatmul.msk.f32.gmra.mxu2 %vm1096_vm5, %v1068_v11 }
 0x10e   : > { %1992 = vmatmul.msk.f32.gmra.mxu3 %vm1096_vm5, %v2642_v47 }
 0x10f   : > { %v941_v21 = vpop.permute.xlu2 %940 }
 0x110   : > { %v939_v15 = vpop.permute.xlu1 %938 }
 0x111   : > { %v1069_v17 = vsel %vm1054_vm4, %v1032_v13, %v939_v15 }
 0x112   : > { %2007 = vmatmul.msk.f32.gmra.mxu1 %vm1096_vm5, %v1068_v11 }
 0x113   : > { %v815_v19 = vpop.permute.xlu0 %814 }
 0x114   : > { %v1042_v20 = vsel %vm543_vm0, %v646_v16, %v815_v19 }
 0x115   : > { %v2655_v63 = vsel %vm1054_vm4, %v1042_v20, %v959_v12  ;;  %1973 = vmatmul.msk.f32.gmra.mxu0 %vm1096_vm5, %v1069_v17  ;;  %2039 = vmatmul.msk.f32.gmra.mxu2 %vm1096_vm5, %v1069_v17  ;;  %v642_v20 = vld [vmem:[#allocation2 + $0xf0] sm:$0xff] }
 0x116   : > { %2018 = vmatmul.msk.f32.vlgmr.msrb.gmra.mxu3 %vm1096_vm5, %v2655_v63 }
 0x117   : > { %v943_v35 = vpop.permute.xlu2 %942 }
 0x118   : > { %v817_v22 = vpop.permute.xlu1 %816 }
 0x119   : > { %v1043_v37 = vsel %vm543_vm0, %v647_v29, %v817_v22 }
 0x11a   : > { %2008 = vmatmul.msk.f32.gmra.mxu1 %vm1096_vm5, %v1069_v17 }
 0x11b   : > { %v797_v24 = vpop.permute.xlu0 %796 }
 0x11c   : > { %v1033_v25 = vsel %vm543_vm0, %v637_v23, %v797_v24 }
 0x11d   : > { %v1070_v27 = vsel %vm1054_vm4, %v1033_v25, %v941_v21 }
 0x11e   : > { %1974 = vmatmul.msk.f32.gmra.mxu0 %vm1096_vm5, %v1070_v27  ;;  %2040 = vmatmul.msk.f32.gmra.mxu2 %vm1096_vm5, %v1070_v27  ;;  %v1214_v30 = vpop.f32.mrf.mxu0 }
 0x11f   : > { %v1337_v33 = vadd.f32 %v1336_v28, %v1214_v30  ;;  %v803_v54 = vpop.permute.xlu2 %802 }
 0x120   : > { %v799_v34 = vpop.permute.xlu1 %798  ;;  %v1036_v56 = vsel %vm543_vm0, %v640_v53, %v803_v54 }
 0x121   : > { %v1034_v39 = vsel %vm543_vm0, %v638_v31, %v799_v34  ;;  %v1461_v40 = vpop.f32.mrf.mxu2  ;;  %v643_v31 = vld [vmem:[#allocation2 + $0xf8] sm:$0xff] }
 0x122   : > { %2009 = vmatmul.msk.f32.gmra.mxu1 %vm1096_vm5, %v1070_v27  ;;  %v1557_v41 = vadd.f32 %v1461_v40, %v1337_v33  ;;  %v1071_v43 = vsel %vm1054_vm4, %v1034_v39, %v943_v35 }
 0x123   : > { %v961_v42 = vpop.permute.xlu0 %960 }
 0x124   : > { %v2683_v44 = vsel %vm1054_vm4, %v1043_v37, %v961_v42  ;;  %v1593_v45 = vadd.f32 %v2670_v36, %v1557_v41 }
 0x125   : > { %2019 = vmatmul.msk.f32.gmra.mxu3 %vm1096_vm5, %v2683_v44 }
 0x126   : > { %1975 = vmatmul.msk.f32.gmra.mxu0 %vm1096_vm5, %v1071_v43  ;;  %2041 = vmatmul.msk.f32.gmra.mxu2 %vm1096_vm5, %v1071_v43  ;;  %1798 = vst.msk [vmem:[%s2680_s17] sm:$0xff] %vm1054_vm4, %v1593_v45  ;;  %v1696_v8 = vmul.f32 %v1593_v45, %v1593_v45  ;;  %v1625_v10 = vsel %vm1054_vm4, %v1593_v45, 0.0 }
 0x128   : > { %v945_v48 = vpop.permute.xlu1 %944  ;;  %v949_v61 = vpop.permute.xlu2 %948  ;;  %v1728_v16 = vsel %vm1054_vm4, %v1696_v8, 0.0 }
 0x12a   : > { %2010 = vmatmul.msk.f32.gmra.mxu1 %vm1096_vm5, %v1071_v43  ;;  %v1464_v62 = vpop.f32.mrf.mxu2 }
 0x12b   : > { %v801_v49 = vpop.permute.xlu0 %800 }
 0x12c   : > { %v1035_v51 = vsel %vm543_vm0, %v639_v46, %v801_v49 }
 0x12d   : > { %2020 = vmatmul.msk.f32.gmra.mxu3 %vm1096_vm5, %v2543_v58  ;;  %v1072_v52 = vsel %vm1054_vm4, %v1035_v51, %v945_v48  ;;  %v644_v48 = vld [vmem:[#allocation2 + $0x108] sm:$0xff] }
 0x12e   : > { %1976 = vmatmul.msk.f32.gmra.mxu0 %vm1096_vm5, %v1072_v52  ;;  %2042 = vmatmul.msk.f32.gmra.mxu2 %vm1096_vm5, %v1072_v52 }
 0x12f   : > { %v1339_v55 = vpop.f32.mrf.mxu1 }
 0x131   : > { %v805_v4 = vpop.permute.xlu1 %804  ;;  %v809_v33 = vpop.permute.xlu2 %808 }
 0x132   : > { %2011 = vmatmul.msk.f32.gmra.mxu1 %vm1096_vm5, %v1072_v52  ;;  %v1037_v0 = vsel %vm543_vm0, %v641_v3, %v805_v4  ;;  %v1039_v41 = vsel %vm543_vm0, %v643_v31, %v809_v33  ;;  %v645_v4 = vld [vmem:[#allocation2 + $0x110] sm:$0xff] }
 0x133   : > { %v1217_v1 = vpop.f32.mrf.mxu0  ;;  %v947_v59 = vpop.permute.xlu0 %946  ;;  %v1074_v14 = vsel %vm1054_vm4, %v1037_v0, %v949_v61 }
 0x134   : > { %v1340_v2 = vadd.f32 %v1339_v55, %v1217_v1  ;;  %v1073_v60 = vsel %vm1054_vm4, %v1036_v56, %v947_v59 }
 0x135   : > { %2021 = vmatmul.msk.f32.gmra.mxu3 %vm1096_vm5, %v2561_v6 }
 0x136   : > { %v1558_v7 = vadd.f32 %v1464_v62, %v1340_v2  ;;  %1977 = vmatmul.msk.f32.gmra.mxu0 %vm1096_vm5, %v1073_v60  ;;  %2043 = vmatmul.msk.f32.gmra.mxu2 %vm1096_vm5, %v1073_v60 }
 0x137   : > { %v1342_v57 = vpop.f32.mrf.mxu1 }
 0x138   : > { %v1594_v9 = vadd.f32 %v2670_v36, %v1558_v7 }
 0x139   : > { %v951_v25 = vpop.permute.xlu1 %950  ;;  %v955_v55 = vpop.permute.xlu2 %954 }
 0x13a   : > { %v1626_v11 = vsel %vm1054_vm4, %v1594_v9, 0.0  ;;  %v1697_v12 = vmul.f32 %v1594_v9, %v1594_v9  ;;  %1799 = vst.msk [vmem:[%s2680_s17 + $0x8] sm:$0xff] %vm1054_vm4, %v1594_v9  ;;  %2012 = vmatmul.msk.f32.gmra.mxu1 %vm1096_vm5, %v1073_v60 }
 0x13b   : > { %v1220_v13 = vpop.f32.mrf.mxu0  ;;  %v1627_v15 = vadd.f32 %v1626_v11, %v1625_v10  ;;  %v807_v21 = vpop.permute.xlu0 %806 }
 0x13c   : > { %v1729_v17 = vsel %vm1054_vm4, %v1697_v12, 0.0  ;;  %v1343_v23 = vadd.f32 %v1342_v57, %v1220_v13  ;;  %v1038_v24 = vsel %vm543_vm0, %v642_v20, %v807_v21 }
 0x13d   : > { %2022 = vmatmul.msk.f32.gmra.mxu3 %vm1096_vm5, %v2579_v18  ;;  %v1730_v19 = vadd.f32 %v1729_v17, %v1728_v16  ;;  %v1075_v29 = vsel %vm1054_vm4, %v1038_v24, %v951_v25 }
 0x13e   : > { %1978 = vmatmul.msk.f32.gmra.mxu0 %vm1096_vm5, %v1074_v14  ;;  %2044 = vmatmul.msk.f32.gmra.mxu2 %vm1096_vm5, %v1074_v14 }
 0x13f   : > { %v1345_v22 = vpop.f32.mrf.mxu1 }
 0x141   : > { %v1467_v26 = vpop.f32.mrf.mxu2  ;;  %v811_v49 = vpop.permute.xlu1 %810 }
 0x142   : > { %v1559_v27 = vadd.f32 %v1467_v26, %v1343_v23  ;;  %2013 = vmatmul.msk.f32.gmra.mxu1 %vm1096_vm5, %v1074_v14  ;;  %v1040_v54 = vsel %vm543_vm0, %v644_v48, %v811_v49 }
 0x143   : > { %v1223_v28 = vpop.f32.mrf.mxu0  ;;  %v953_v42 = vpop.permute.xlu0 %952  ;;  %v1077_v2 = vsel %vm1054_vm4, %v1040_v54, %v955_v55 }
 0x144   : > { %v1595_v30 = vadd.f32 %v2670_v36, %v1559_v27  ;;  %v1076_v46 = vsel %vm1054_vm4, %v1039_v41, %v953_v42  ;;  %v1346_v51 = vadd.f32 %v1345_v22, %v1223_v28 }
 0x145   : > { %2023 = vmatmul.msk.f32.gmra.mxu3 %vm1096_vm5, %v2597_v32 }
 0x146   : > { %v1628_v34 = vsel %vm1054_vm4, %v1595_v30, 0.0  ;;  %v1698_v35 = vmul.f32 %v1595_v30, %v1595_v30  ;;  %1800 = vst.msk [vmem:[%s2680_s17 + $0x10] sm:$0xff] %vm1054_vm4, %v1595_v30  ;;  %1979 = vmatmul.msk.f32.gmra.mxu0 %vm1096_vm5, %v1075_v29  ;;  %2045 = vmatmul.msk.f32.gmra.mxu2 %vm1096_vm5, %v1075_v29 }
 0x147   : > { %v1629_v37 = vadd.f32 %v1628_v34, %v1627_v15  ;;  %v1348_v39 = vpop.f32.mrf.mxu1 }
 0x148   : > { %v1731_v40 = vsel %vm1054_vm4, %v1698_v35, 0.0  ;;  %v2743_v60 = vpop.f32.mrf.mxu3 }
 0x149   : > { %v1732_v43 = vadd.f32 %v1731_v40, %v1730_v19  ;;  %v957_v12 = vpop.permute.xlu1 %956 }
 0x14a   : > { %2014 = vmatmul.msk.f32.gmra.mxu1 %vm1096_vm5, %v1075_v29 }
 0x14b   : > { %v1226_v45 = vpop.f32.mrf.mxu0  ;;  %v813_v7 = vpop.permute.xlu0 %812 }
 0x14c   : > { %v1349_v8 = vadd.f32 %v1348_v39, %v1226_v45  ;;  %v1041_v11 = vsel %vm543_vm0, %v645_v4, %v813_v7 }
 0x14d   : > { %2024 = vmatmul.msk.f32.gmra.mxu3 %vm1096_vm5, %v2606_v38  ;;  %v1078_v16 = vsel %vm1054_vm4, %v1041_v11, %v957_v12 }
 0x14e   : > { %1980 = vmatmul.msk.f32.gmra.mxu0 %vm1096_vm5, %v1076_v46  ;;  %2046 = vmatmul.msk.f32.gmra.mxu2 %vm1096_vm5, %v1076_v46 }
 0x14f   : > { %v1351_v52 = vpop.f32.mrf.mxu1 }
 0x150   : > { %v1470_v53 = vpop.f32.mrf.mxu2  ;;  %v2762_v20 = vpop.f32.mrf.mxu3 }
 0x151   : > { %v1560_v56 = vadd.f32 %v1470_v53, %v1346_v51 }
 0x152   : > { %2015 = vmatmul.msk.f32.gmra.mxu1 %vm1096_vm5, %v1076_v46 }
 0x153   : > { %v1596_v1 = vadd.f32 %v2670_v36, %v1560_v56  ;;  %v1229_v59 = vpop.f32.mrf.mxu0  ;;  %v979_v11 = vpop.permute.xlu0 %978 }
 0x154   : > { %v1352_v23 = vadd.f32 %v1351_v52, %v1229_v59 }
 0x155   : > { %v1630_v62 = vsel %vm1054_vm4, %v1596_v1, 0.0  ;;  %v1699_v3 = vmul.f32 %v1596_v1, %v1596_v1  ;;  %1801 = vst.msk [vmem:[%s2680_s17 + $0x18] sm:$0xff] %vm1054_vm4, %v1596_v1  ;;  %2025 = vmatmul.msk.f32.gmra.mxu3 %vm1096_vm5, %v2619_v50 }
 0x156   : > { %v1631_v57 = vadd.f32 %v1630_v62, %v1629_v37  ;;  %1981 = vmatmul.msk.f32.gmra.mxu0 %vm1096_vm5, %v1077_v2  ;;  %2047 = vmatmul.msk.f32.gmra.mxu2 %vm1096_vm5, %v1077_v2 }
 0x157   : > { %v1733_v9 = vsel %vm1054_vm4, %v1699_v3, 0.0  ;;  %v1354_v0 = vpop.f32.mrf.mxu1 }
 0x158   : > { %v1734_v61 = vadd.f32 %v1733_v9, %v1732_v43  ;;  %v1473_v10 = vpop.f32.mrf.mxu2  ;;  %v656_v9 = vld [vmem:[#allocation2 + $0x198] sm:$0xff] }
 0x159   : > { %v1561_v13 = vadd.f32 %v1473_v10, %v1349_v8  ;;  %v2778_v33 = vpop.f32.mrf.mxu3 }
 0x15a   : > { %2016 = vmatmul.msk.f32.gmra.mxu1 %vm1096_vm5, %v1077_v2 }
 0x15b   : > { %v1597_v14 = vadd.f32 %v2670_v36, %v1561_v13  ;;  %v1232_v15 = vpop.f32.mrf.mxu0 }
 0x15c   : > { %v1355_v39 = vadd.f32 %v1354_v0, %v1232_v15  ;;  %v835_v0 = vpop.permute.xlu2 %834 }
 0x15d   : > { %v1632_v17 = vsel %vm1054_vm4, %v1597_v14, 0.0  ;;  %v1700_v19 = vmul.f32 %v1597_v14, %v1597_v14  ;;  %1802 = vst.msk [vmem:[%s2680_s17 + $0x20] sm:$0xff] %vm1054_vm4, %v1597_v14  ;;  %2053 = vmatmul.msk.f32.vlgmr.msra.gmra.mxu3 %vm1096_vm5, %v2579_v18  ;;  %v1052_v10 = vsel %vm543_vm0, %v656_v9, %v835_v0 }
 0x15e   : > { %v1633_v21 = vadd.f32 %v1632_v17, %v1631_v57  ;;  %1982 = vmatmul.msk.f32.gmra.mxu0 %vm1096_vm5, %v1078_v16  ;;  %2048 = vmatmul.msk.f32.gmra.mxu2 %vm1096_vm5, %v1078_v16 }
 0x15f   : > { %v1735_v22 = vsel %vm1054_vm4, %v1700_v19, 0.0  ;;  %v1357_v25 = vpop.f32.mrf.mxu1  ;;  %v837_v19 = vpop.permute.xlu1 %836 }
 0x160   : > { %v1736_v24 = vadd.f32 %v1735_v22, %v1734_v61 }
 0x161   : > { %v1476_v26 = vpop.f32.mrf.mxu2 }
 0x162   : > { %v1562_v27 = vadd.f32 %v1476_v26, %v1352_v23  ;;  %2017 = vmatmul.msk.f32.gmra.mxu1 %vm1096_vm5, %v1078_v16  ;;  %v1089_v16 = vsel %vm1054_vm4, %v1052_v10, %v979_v11 }
 0x163   : > { %v1235_v18 = vpop.f32.mrf.mxu0 }
 0x164   : > { %v1598_v28 = vadd.f32 %v2670_v36, %v1562_v27  ;;  %v981_v23 = vpop.permute.xlu2 %980 }
 0x165   : > { %2054 = vmatmul.msk.f32.gmra.mxu3 %vm1096_vm5, %v2597_v32 }
 0x166   : > { %v1634_v29 = vsel %vm1054_vm4, %v1598_v28, 0.0  ;;  %v1701_v30 = vmul.f32 %v1598_v28, %v1598_v28  ;;  %1803 = vst.msk [vmem:[%s2680_s17 + $0x28] sm:$0xff] %vm1054_vm4, %v1598_v28  ;;  %1983 = vmatmul.msk.f32.gmra.mxu0 %vm1096_vm5, %v2655_v63  ;;  %2049 = vmatmul.msk.f32.gmra.mxu2 %vm1096_vm5, %v2655_v63 }
 0x167   : > { %v1635_v31 = vadd.f32 %v1634_v29, %v1633_v21  ;;  %v1360_v37 = vpop.f32.mrf.mxu1 }
 0x168   : > { %v1737_v34 = vsel %vm1054_vm4, %v1701_v30, 0.0  ;;  %v2787_v63 = vpop.f32.mrf.mxu3 }
 0x169   : > { %v1738_v35 = vadd.f32 %v1737_v34, %v1736_v24 }
 0x16b   : > { %v1238_v32 = vpop.f32.mrf.mxu0 }
 0x16c   : > { %v1361_v2 = vadd.f32 %v1360_v37, %v1238_v32 }
 0x16d   : > { %2055 = vmatmul.msk.f32.gmra.mxu3 %vm1096_vm5, %v2606_v38 }
 0x16e   : > { %1984 = vmatmul.msk.f32.gmra.mxu0 %vm1096_vm5, %v2683_v44  ;;  %2050 = vmatmul.msk.f32.gmra.mxu2 %vm1096_vm5, %v2683_v44  ;;  %v1358_v44 = vadd.f32 %v1357_v25, %v1235_v18 }
 0x16f   : > { %v1363_v43 = vpop.f32.mrf.mxu1 }
 0x170   : > { %v1479_v40 = vpop.f32.mrf.mxu2  ;;  %v2798_v54 = vpop.f32.mrf.mxu3 }
 0x171   : > { %v1563_v41 = vadd.f32 %v1479_v40, %v1355_v39 }
 0x173   : > { %v1599_v42 = vadd.f32 %v2670_v36, %v1563_v41  ;;  %v1241_v51 = vpop.f32.mrf.mxu0 }
 0x174   : > { %v1364_v21 = vadd.f32 %v1363_v43, %v1241_v51 }
 0x175   : > { %v1636_v45 = vsel %vm1054_vm4, %v1599_v42, 0.0  ;;  %v1702_v46 = vmul.f32 %v1599_v42, %v1599_v42  ;;  %1804 = vst.msk [vmem:[%s2680_s17 + $0x30] sm:$0xff] %vm1054_vm4, %v1599_v42  ;;  %2056 = vmatmul.msk.f32.gmra.mxu3 %vm1096_vm5, %v2619_v50 }
 0x176   : > { %v1637_v38 = vadd.f32 %v1636_v45, %v1635_v31  ;;  %2051 = vmatmul.msk.f32.gmra.mxu2 %vm1096_vm5, %v2543_v58 }
 0x177   : > { %v1739_v48 = vsel %vm1054_vm4, %v1702_v46, 0.0  ;;  %v1366_v50 = vpop.f32.mrf.mxu1 }
 0x178   : > { %v1740_v49 = vadd.f32 %v1739_v48, %v1738_v35  ;;  %v1482_v52 = vpop.f32.mrf.mxu2 }
 0x179   : > { %v1564_v53 = vadd.f32 %v1482_v52, %v1358_v44  ;;  %v2809_v57 = vpop.f32.mrf.mxu3 }
 0x17b   : > { %v1600_v55 = vadd.f32 %v2670_v36, %v1564_v53  ;;  %v1244_v4 = vpop.f32.mrf.mxu0 }
 0x17c   : > { %v1367_v35 = vadd.f32 %v1366_v50, %v1244_v4 }
 0x17d   : > { %v1638_v56 = vsel %vm1054_vm4, %v1600_v55, 0.0  ;;  %v1703_v1 = vmul.f32 %v1600_v55, %v1600_v55  ;;  %1805 = vst.msk [vmem:[%s2680_s17 + $0x38] sm:$0xff] %vm1054_vm4, %v1600_v55  ;;  %2057 = vmatmul.msk.f32.gmra.mxu3 %vm1096_vm5, %v2634_v5 }
 0x17e   : > { %v1639_v58 = vadd.f32 %v1638_v56, %v1637_v38  ;;  %2052 = vmatmul.msk.f32.gmra.mxu2 %vm1096_vm5, %v2561_v6 }
 0x17f   : > { %v1741_v59 = vsel %vm1054_vm4, %v1703_v1, 0.0  ;;  %v1369_v13 = vpop.f32.mrf.mxu1 }
 0x180   : > { %v1742_v62 = vadd.f32 %v1741_v59, %v1740_v49 }
 0x181   : > { %v1485_v3 = vpop.f32.mrf.mxu2 }
 0x182   : > { %v1565_v7 = vadd.f32 %v1485_v3, %v1361_v2 }
 0x184   : > { %v1601_v8 = vadd.f32 %v2670_v36, %v1565_v7 }
 0x185   : > { %2058 = vmatmul.msk.f32.gmra.mxu3 %vm1096_vm5, %v2642_v47  ;;  %v657_v47 = vld [vmem:[#allocation2 + $0x1a0] sm:$0xff] }
 0x186   : > { %v1640_v5 = vsel %vm1054_vm4, %v1601_v8, 0.0  ;;  %v1704_v6 = vmul.f32 %v1601_v8, %v1601_v8  ;;  %1806 = vst.msk [vmem:[%s2680_s17 + $0x40] sm:$0xff] %vm1054_vm4, %v1601_v8  ;;  %v1053_v22 = vsel %vm543_vm0, %v657_v47, %v837_v19 }
 0x187   : > { %v1641_v61 = vadd.f32 %v1640_v5, %v1639_v58  ;;  %v1090_v27 = vsel %vm1054_vm4, %v1053_v22, %v981_v23  ;;  %v1372_v28 = vpop.f32.mrf.mxu1 }
 0x188   : > { %v1743_v12 = vsel %vm1054_vm4, %v1704_v6, 0.0  ;;  %v2820_v17 = vpop.f32.mrf.mxu3 }
 0x189   : > { %v1744_v14 = vadd.f32 %v1743_v12, %v1742_v62 }
 0x18a   : > { %v1247_v15 = vpop.f32.mrf.mxu0 }
 0x18b   : > { %v1370_v48 = vadd.f32 %v1369_v13, %v1247_v15 }
 0x18d   : > { %2059 = vmatmul.msk.f32.gmra.mxu3 %vm1096_vm5, %v1089_v16 }
 0x18f   : > { %v1375_v43 = vpop.f32.mrf.mxu1 }
 0x190   : > { %v1488_v24 = vpop.f32.mrf.mxu2 }
 0x191   : > { %v1566_v25 = vadd.f32 %v1488_v24, %v1364_v21  ;;  %v2830_v34 = vpop.f32.mrf.mxu3 }
 0x192   : > { %v1250_v26 = vpop.f32.mrf.mxu0 }
 0x193   : > { %v1602_v18 = vadd.f32 %v2670_v36, %v1566_v25  ;;  %v1373_v2 = vadd.f32 %v1372_v28, %v1250_v26 }
 0x195   : > { %v1642_v29 = vsel %vm1054_vm4, %v1602_v18, 0.0  ;;  %v1705_v30 = vmul.f32 %v1602_v18, %v1602_v18  ;;  %1807 = vst.msk [vmem:[%s2680_s17 + $0x48] sm:$0xff] %vm1054_vm4, %v1602_v18  ;;  %2060 = vmatmul.msk.f32.gmra.mxu3 %vm1096_vm5, %v1090_v27 }
 0x196   : > { %v1643_v31 = vadd.f32 %v1642_v29, %v1641_v61 }
 0x197   : > { %v1745_v37 = vsel %vm1054_vm4, %v1705_v30, 0.0  ;;  %v1378_v50 = vpop.f32.mrf.mxu1 }
 0x198   : > { %v1746_v32 = vadd.f32 %v1745_v37, %v1744_v14  ;;  %v1491_v39 = vpop.f32.mrf.mxu2 }
 0x199   : > { %v1567_v40 = vadd.f32 %v1491_v39, %v1367_v35  ;;  %v2838_v51 = vpop.f32.mrf.mxu3 }
 0x19b   : > { %v1603_v41 = vadd.f32 %v2670_v36, %v1567_v40  ;;  %v1253_v42 = vpop.f32.mrf.mxu0 }
 0x19c   : > { %v1376_v10 = vadd.f32 %v1375_v43, %v1253_v42 }
 0x19d   : > { %v1644_v45 = vsel %vm1054_vm4, %v1603_v41, 0.0  ;;  %v1706_v46 = vmul.f32 %v1603_v41, %v1603_v41  ;;  %1808 = vst.msk [vmem:[%s2680_s17 + $0x50] sm:$0xff] %vm1054_vm4, %v1603_v41 }
 0x19e   : > { %v1645_v38 = vadd.f32 %v1644_v45, %v1643_v31 }
 0x19f   : > { %v1747_v44 = vsel %vm1054_vm4, %v1706_v46, 0.0  ;;  %v1381_v13 = vpop.f32.mrf.mxu1 }
 0x1a0   : > { %v1748_v49 = vadd.f32 %v1747_v44, %v1746_v32 }
 0x1a1   : > { %v1494_v52 = vpop.f32.mrf.mxu2 }
 0x1a2   : > { %v1568_v53 = vadd.f32 %v1494_v52, %v1370_v48 }
 0x1a3   : > { %v1256_v55 = vpop.f32.mrf.mxu0 }
 0x1a4   : > { %v1604_v56 = vadd.f32 %v2670_v36, %v1568_v53  ;;  %v1379_v24 = vadd.f32 %v1378_v50, %v1256_v55 }
 0x1a6   : > { %v1646_v1 = vsel %vm1054_vm4, %v1604_v56, 0.0  ;;  %v1707_v58 = vmul.f32 %v1604_v56, %v1604_v56  ;;  %1809 = vst.msk [vmem:[%s2680_s17 + $0x58] sm:$0xff] %vm1054_vm4, %v1604_v56 }
 0x1a7   : > { %v1647_v59 = vadd.f32 %v1646_v1, %v1645_v38  ;;  %v1384_v27 = vpop.f32.mrf.mxu1 }
 0x1a8   : > { %v1749_v62 = vsel %vm1054_vm4, %v1707_v58, 0.0  ;;  %v2845_v3 = vpop.f32.mrf.mxu3 }
 0x1a9   : > { %v1750_v4 = vadd.f32 %v1749_v62, %v1748_v49  ;;  %v1497_v7 = vpop.f32.mrf.mxu2 }
 0x1aa   : > { %v1569_v8 = vadd.f32 %v1497_v7, %v1373_v2  ;;  %v1409_v7 = vadd.f32 %v2838_v51, %v2743_v60  ;;  %v1412_v60 = vadd.f32 %v2845_v3, %v2762_v20 }
 0x1ab   : > { %v1259_v0 = vpop.f32.mrf.mxu0 }
 0x1ac   : > { %v1605_v9 = vadd.f32 %v2670_v36, %v1569_v8  ;;  %v1382_v31 = vadd.f32 %v1381_v13, %v1259_v0 }
 0x1ae   : > { %v1648_v5 = vsel %vm1054_vm4, %v1605_v9, 0.0  ;;  %v1708_v6 = vmul.f32 %v1605_v9, %v1605_v9  ;;  %1810 = vst.msk [vmem:[%s2680_s17 + $0x60] sm:$0xff] %vm1054_vm4, %v1605_v9 }
 0x1af   : > { %v1649_v61 = vadd.f32 %v1648_v5, %v1647_v59  ;;  %v1387_v40 = vpop.f32.mrf.mxu1 }
 0x1b0   : > { %v1751_v11 = vsel %vm1054_vm4, %v1708_v6, 0.0  ;;  %v2852_v12 = vpop.f32.mrf.mxu3 }
 0x1b1   : > { %v1752_v14 = vadd.f32 %v1751_v11, %v1750_v4  ;;  %v1500_v15 = vpop.f32.mrf.mxu2  ;;  %v1415_v20 = vadd.f32 %v2852_v12, %v2778_v33 }
 0x1b2   : > { %v1570_v16 = vadd.f32 %v1500_v15, %v1376_v10 }
 0x1b3   : > { %v1262_v23 = vpop.f32.mrf.mxu0 }
 0x1b4   : > { %v1606_v47 = vadd.f32 %v2670_v36, %v1570_v16  ;;  %v1385_v42 = vadd.f32 %v1384_v27, %v1262_v23 }
 0x1b6   : > { %v1650_v19 = vsel %vm1054_vm4, %v1606_v47, 0.0  ;;  %v1709_v21 = vmul.f32 %v1606_v47, %v1606_v47  ;;  %1811 = vst.msk [vmem:[%s2680_s17 + $0x68] sm:$0xff] %vm1054_vm4, %v1606_v47 }
 0x1b7   : > { %v2858_v22 = vadd.f32 %v1650_v19, %v1649_v61  ;;  %v1390_v48 = vpop.f32.mrf.mxu1 }
 0x1b8   : > { %v1753_v25 = vsel %vm1054_vm4, %v1709_v21, 0.0  ;;  %v2861_v26 = vpop.f32.mrf.mxu3 }
 0x1b9   : > { %v2863_v28 = vadd.f32 %v1753_v25, %v1752_v14  ;;  %v1503_v18 = vpop.f32.mrf.mxu2 }
 0x1ba   : > { %v1571_v29 = vadd.f32 %v1503_v18, %v1379_v24 }
 0x1bb   : > { %v1265_v37 = vpop.f32.mrf.mxu0 }
 0x1bc   : > { %v1607_v30 = vadd.f32 %v2670_v36, %v1571_v29  ;;  %v1388_v49 = vadd.f32 %v1387_v40, %v1265_v37 }
 0x1be   : > { %1812 = vst.msk [vmem:[%s2680_s17 + $0x70] sm:$0xff] %vm1054_vm4, %v1607_v30  ;;  %v1710_v3 = vmul.f32 %v1607_v30, %v1607_v30 }
 0x1bf   : > { %v1393_v58 = vpop.f32.mrf.mxu1 }
 0x1c0   : > { %v2868_v35 = vpop.f32.mrf.mxu3 }
 0x1c1   : > { %v1506_v32 = vpop.f32.mrf.mxu2 }
 0x1c2   : > { %v1572_v39 = vadd.f32 %v1506_v32, %v1382_v31  ;;  %v1652_v31 = vsel %vm1054_vm4, %v1607_v30, 0.0 }
 0x1c3   : > { %v1268_v38 = vpop.f32.mrf.mxu0 }
 0x1c4   : > { %v1608_v41 = vadd.f32 %v2670_v36, %v1572_v39  ;;  %v1391_v50 = vadd.f32 %v1390_v48, %v1268_v38 }
 0x1c6   : > { %1813 = vst.msk [vmem:[%s2680_s17 + $0x78] sm:$0xff] %vm1054_vm4, %v1608_v41  ;;  %v1711_v37 = vmul.f32 %v1608_v41, %v1608_v41 }
 0x1c7   : > { %v1396_v5 = vpop.f32.mrf.mxu1 }
 0x1c8   : > { %v2873_v43 = vpop.f32.mrf.mxu3  ;;  %v1757_v30 = vsel %vm1054_vm4, %v1711_v37, 0.0 }
 0x1c9   : > { %v1509_v45 = vpop.f32.mrf.mxu2 }
 0x1ca   : > { %v1573_v46 = vadd.f32 %v1509_v45, %v1385_v42  ;;  %v1755_v42 = vsel %vm1054_vm4, %v1710_v3, 0.0  ;;  %v1654_v45 = vsel %vm1054_vm4, %v1608_v41, 0.0 }
 0x1cb   : > { %v1271_v1 = vpop.f32.mrf.mxu0  ;;  %v1756_v41 = vadd.f32 %v1755_v42, %v2863_v28 }
 0x1cc   : > { %v1609_v44 = vadd.f32 %v2670_v36, %v1573_v46  ;;  %v1394_v9 = vadd.f32 %v1393_v58, %v1271_v1  ;;  %v1653_v46 = vadd.f32 %v1652_v31, %v2858_v22 }
 0x1ce   : > { %1814 = vst.msk [vmem:[%s2680_s17 + $0x80] sm:$0xff] %vm1054_vm4, %v1609_v44  ;;  %v1712_v33 = vmul.f32 %v1609_v44, %v1609_v44  ;;  %v1656_v48 = vsel %vm1054_vm4, %v1609_v44, 0.0 }
 0x1cf   : > { %v1399_v21 = vpop.f32.mrf.mxu1 }
 0x1d0   : > { %v2878_v52 = vpop.f32.mrf.mxu3  ;;  %v1759_v1 = vsel %vm1054_vm4, %v1712_v33, 0.0 }
 0x1d1   : > { %v1512_v53 = vpop.f32.mrf.mxu2 }
 0x1d2   : > { %v1574_v55 = vadd.f32 %v1512_v53, %v1388_v49  ;;  %v1418_v53 = vadd.f32 %v2861_v26, %v2787_v63 }
 0x1d3   : > { %v1274_v8 = vpop.f32.mrf.mxu0 }
 0x1d4   : > { %v1610_v56 = vadd.f32 %v2670_v36, %v1574_v55  ;;  %v1397_v51 = vadd.f32 %v1396_v5, %v1274_v8  ;;  %v1655_v55 = vadd.f32 %v1654_v45, %v1653_v46 }
 0x1d6   : > { %1815 = vst.msk [vmem:[%s2680_s17 + $0x88] sm:$0xff] %vm1054_vm4, %v1610_v56  ;;  %v1713_v49 = vmul.f32 %v1610_v56, %v1610_v56  ;;  %v1658_v22 = vsel %vm1054_vm4, %v1610_v56, 0.0 }
 0x1d7   : > { %v1402_v38 = vpop.f32.mrf.mxu1 }
 0x1d8   : > { %v2883_v59 = vpop.f32.mrf.mxu3 }
 0x1d9   : > { %v1515_v2 = vpop.f32.mrf.mxu2 }
 0x1da   : > { %v1575_v62 = vadd.f32 %v1515_v2, %v1391_v50 }
 0x1db   : > { %v1277_v15 = vpop.f32.mrf.mxu0 }
 0x1dc   : > { %v1611_v4 = vadd.f32 %v2670_v36, %v1575_v62  ;;  %v1400_v25 = vadd.f32 %v1399_v21, %v1277_v15  ;;  %v1758_v62 = vadd.f32 %v1757_v30, %v1756_v41  ;;  %v1424_v41 = vadd.f32 %v2873_v43, %v2809_v57 }
 0x1de   : > { %1816 = vst.msk [vmem:[%s2680_s17 + $0x90] sm:$0xff] %vm1054_vm4, %v1611_v4  ;;  %v1714_v58 = vmul.f32 %v1611_v4, %v1611_v4  ;;  %v1760_v28 = vadd.f32 %v1759_v1, %v1758_v62 }
 0x1e0   : > { %v1533_v0 = vpop.f32.mrf.mxu3  ;;  %v1763_v56 = vsel %vm1054_vm4, %v1714_v58, 0.0 }
 0x1e1   : > { %v1581_v6 = vadd.f32 %v1533_v0, %v1409_v7  ;;  %v1518_v61 = vpop.f32.mrf.mxu2  ;;  %v1657_v7 = vadd.f32 %v1656_v48, %v1655_v55  ;;  %v1660_v0 = vsel %vm1054_vm4, %v1611_v4, 0.0 }
 0x1e2   : > { %v1576_v10 = vadd.f32 %v1518_v61, %v1394_v9  ;;  %v1761_v9 = vsel %vm1054_vm4, %v1713_v49, 0.0 }
 0x1e3   : > { %v2891_v11 = vadd.f32 %v2670_v36, %v1581_v6  ;;  %v1280_v39 = vpop.f32.mrf.mxu0  ;;  %v1659_v5 = vadd.f32 %v1658_v22, %v1657_v7 }
 0x1e4   : > { %v1612_v13 = vadd.f32 %v2670_v36, %v1576_v10  ;;  %v1403_v50 = vadd.f32 %v1402_v38, %v1280_v39 }
 0x1e5   : > { %1822 = vst.msk [vmem:[%s2680_s17 + $0xc0] sm:$0xff] %vm1054_vm4, %v2891_v11  ;;  %v1720_v48 = vmul.f32 %v2891_v11, %v2891_v11  ;;  %v1672_v22 = vsel %vm1054_vm4, %v2891_v11, 0.0 }
 0x1e6   : > { %1817 = vst.msk [vmem:[%s2680_s17 + $0x98] sm:$0xff] %vm1054_vm4, %v1612_v13  ;;  %v1715_v63 = vmul.f32 %v1612_v13, %v1612_v13  ;;  %v1662_v61 = vsel %vm1054_vm4, %v1612_v13, 0.0 }
 0x1e8   : > { %v1536_v14 = vpop.f32.mrf.mxu3  ;;  %v1765_v4 = vsel %vm1054_vm4, %v1715_v63, 0.0 }
 0x1e9   : > { %v1582_v16 = vadd.f32 %v1536_v14, %v1412_v60  ;;  %v1521_v47 = vpop.f32.mrf.mxu2  ;;  %v1661_v14 = vadd.f32 %v1660_v0, %v1659_v5 }
 0x1ea   : > { %v1577_v19 = vadd.f32 %v1521_v47, %v1397_v51  ;;  %v1762_v51 = vadd.f32 %v1761_v9, %v1760_v28 }
 0x1eb   : > { %v2902_v23 = vadd.f32 %v2670_v36, %v1582_v16  ;;  %v1283_v15 = vpop.f32.mrf.mxu0  ;;  %v1663_v21 = vadd.f32 %v1662_v61, %v1661_v14 }
 0x1ec   : > { %v1613_v24 = vadd.f32 %v2670_v36, %v1577_v19  ;;  %v1421_v19 = vadd.f32 %v2868_v35, %v2798_v54  ;;  %v1764_v13 = vadd.f32 %v1763_v56, %v1762_v51 }
 0x1ed   : > { %1823 = vst.msk [vmem:[%s2680_s17 + $0xc8] sm:$0xff] %vm1054_vm4, %v2902_v23  ;;  %v1721_v58 = vmul.f32 %v2902_v23, %v2902_v23  ;;  %v1674_v57 = vsel %vm1054_vm4, %v2902_v23, 0.0 }
 0x1ee   : > { %1818 = vst.msk [vmem:[%s2680_s17 + $0xa0] sm:$0xff] %vm1054_vm4, %v1613_v24  ;;  %v1716_v10 = vmul.f32 %v1613_v24, %v1613_v24  ;;  %v1664_v16 = vsel %vm1054_vm4, %v1613_v24, 0.0  ;;  %v1766_v31 = vadd.f32 %v1765_v4, %v1764_v13 }
 0x1ef   : > { %v1665_v37 = vadd.f32 %v1664_v16, %v1663_v21  ;;  %v1777_v63 = vsel %vm1054_vm4, %v1721_v58, 0.0 }
 0x1f0   : > { %v1539_v27 = vpop.f32.mrf.mxu3  ;;  %v1767_v3 = vsel %vm1054_vm4, %v1716_v10, 0.0 }
 0x1f1   : > { %v1583_v18 = vadd.f32 %v1539_v27, %v1415_v20  ;;  %v1524_v29 = vpop.f32.mrf.mxu2  ;;  %v1405_v20 = vpop.f32.mrf.mxu1  ;;  %v1768_v42 = vadd.f32 %v1767_v3, %v1766_v31  ;;  %v1430_v31 = vadd.f32 %v2883_v59, %v2830_v34 }
 0x1f2   : > { %v1578_v32 = vadd.f32 %v1524_v29, %v1400_v25  ;;  %v1406_v25 = vadd.f32 %v1405_v20, %v1283_v15 }
 0x1f3   : > { %v2914_v40 = vadd.f32 %v2670_v36, %v1583_v18 }
 0x1f4   : > { %v1614_v12 = vadd.f32 %v2670_v36, %v1578_v32 }
 0x1f5   : > { %1824 = vst.msk [vmem:[%s2680_s17 + $0xd0] sm:$0xff] %vm1054_vm4, %v2914_v40  ;;  %v1722_v43 = vmul.f32 %v2914_v40, %v2914_v40 }
 0x1f6   : > { %1819 = vst.msk [vmem:[%s2680_s17 + $0xa8] sm:$0xff] %vm1054_vm4, %v1614_v12  ;;  %v1717_v47 = vmul.f32 %v1614_v12, %v1614_v12  ;;  %v1666_v27 = vsel %vm1054_vm4, %v1614_v12, 0.0 }
 0x1f7   : > { %v1667_v45 = vadd.f32 %v1666_v27, %v1665_v37  ;;  %v1779_v23 = vsel %vm1054_vm4, %v1722_v43, 0.0 }
 0x1f8   : > { %v1542_v2 = vpop.f32.mrf.mxu3  ;;  %v1769_v39 = vsel %vm1054_vm4, %v1717_v47, 0.0 }
 0x1f9   : > { %v1584_v8 = vadd.f32 %v1542_v2, %v1418_v53  ;;  %v1527_v44 = vpop.f32.mrf.mxu2  ;;  %v1770_v38 = vadd.f32 %v1769_v39, %v1768_v42 }
 0x1fa   : > { %v1579_v26 = vadd.f32 %v1527_v44, %v1403_v50  ;;  %v1775_v44 = vsel %vm1054_vm4, %v1720_v48, 0.0 }
 0x1fb   : > { %v2935_v6 = vadd.f32 %v2670_v36, %v1584_v8 }
 0x1fc   : > { %v1615_v60 = vadd.f32 %v2670_v36, %v1579_v26  ;;  %v1676_v26 = vsel %vm1054_vm4, %v2914_v40, 0.0 }
 0x1fd   : > { %1825 = vst.msk [vmem:[%s2680_s17 + $0xd8] sm:$0xff] %vm1054_vm4, %v2935_v6  ;;  %v1723_v28 = vmul.f32 %v2935_v6, %v2935_v6  ;;  %v1678_v61 = vsel %vm1054_vm4, %v2935_v6, 0.0 }
 0x1fe   : > { %1820 = vst.msk [vmem:[%s2680_s17 + $0xb0] sm:$0xff] %vm1054_vm4, %v1615_v60  ;;  %v1718_v18 = vmul.f32 %v1615_v60, %v1615_v60  ;;  %v1668_v54 = vsel %vm1054_vm4, %v1615_v60, 0.0  ;;  %v1427_v60 = vadd.f32 %v2878_v52, %v2820_v17 }
 0x1ff   : > { %v1669_v30 = vadd.f32 %v1668_v54, %v1667_v45  ;;  %v1781_v40 = vsel %vm1054_vm4, %v1723_v28, 0.0 }
 0x200   : > { %v1545_v29 = vpop.f32.mrf.mxu3  ;;  %v1771_v46 = vsel %vm1054_vm4, %v1718_v18, 0.0 }
 0x201   : > { %v1585_v24 = vadd.f32 %v1545_v29, %v1421_v19  ;;  %v1530_v32 = vpop.f32.mrf.mxu2  ;;  %v1772_v55 = vadd.f32 %v1771_v46, %v1770_v38 }
 0x202   : > { %v1580_v35 = vadd.f32 %v1530_v32, %v1406_v25 }
 0x203   : > { %v1621_v33 = vadd.f32 %v2670_v36, %v1585_v24 }
 0x204   : > { %v1616_v12 = vadd.f32 %v2670_v36, %v1580_v35 }
 0x205   : > { %1826 = vst.msk [vmem:[%s2680_s17 + $0xe0] sm:$0xff] %vm1054_vm4, %v1621_v33  ;;  %v1724_v10 = vmul.f32 %v1621_v33, %v1621_v33  ;;  %v1680_v15 = vsel %vm1054_vm4, %v1621_v33, 0.0 }
 0x206   : > { %v1670_v49 = vsel %vm1054_vm4, %v1616_v12, 0.0  ;;  %v1719_v53 = vmul.f32 %v1616_v12, %v1616_v12  ;;  %1821 = vst.msk [vmem:[%s2680_s17 + $0xb8] sm:$0xff] %vm1054_vm4, %v1616_v12 }
 0x207   : > { %v1671_v1 = vadd.f32 %v1670_v49, %v1669_v30  ;;  %v1783_v21 = vsel %vm1054_vm4, %v1724_v10, 0.0 }
 0x208   : > { %v1773_v50 = vsel %vm1054_vm4, %v1719_v53, 0.0  ;;  %v1548_v2 = vpop.f32.mrf.mxu3 }
 0x209   : > { %v1673_v62 = vadd.f32 %v1672_v22, %v1671_v1  ;;  %v1774_v7 = vadd.f32 %v1773_v50, %v1772_v55  ;;  %v1586_v8 = vadd.f32 %v1548_v2, %v1424_v41 }
 0x20b   : > { %v1675_v9 = vadd.f32 %v1674_v57, %v1673_v62  ;;  %v1776_v11 = vadd.f32 %v1775_v44, %v1774_v7  ;;  %v1622_v0 = vadd.f32 %v2670_v36, %v1586_v8 }
 0x20d   : > { %v1778_v5 = vadd.f32 %v1777_v63, %v1776_v11  ;;  %v1677_v56 = vadd.f32 %v1676_v26, %v1675_v9  ;;  %1827 = vst.msk [vmem:[%s2680_s17 + $0xe8] sm:$0xff] %vm1054_vm4, %v1622_v0  ;;  %v1725_v4 = vmul.f32 %v1622_v0, %v1622_v0  ;;  %v1682_v6 = vsel %vm1054_vm4, %v1622_v0, 0.0 }
 0x20f   : > { %v1679_v51 = vadd.f32 %v1678_v61, %v1677_v56  ;;  %v1780_v14 = vadd.f32 %v1779_v23, %v1778_v5  ;;  %v1785_v52 = vsel %vm1054_vm4, %v1725_v4, 0.0 }
 0x210   : > { %v1551_v16 = vpop.f32.mrf.mxu3 }
 0x211   : > { %v1681_v47 = vadd.f32 %v1680_v15, %v1679_v51  ;;  %v1782_v19 = vadd.f32 %v1781_v40, %v1780_v14  ;;  %v1587_v13 = vadd.f32 %v1551_v16, %v1427_v60 }
 0x213   : > { %v1683_v20 = vadd.f32 %v1682_v6, %v1681_v47  ;;  %v1784_v3 = vadd.f32 %v1783_v21, %v1782_v19  ;;  %v1623_v17 = vadd.f32 %v2670_v36, %v1587_v13 }
 0x215   : > { %v1786_v25 = vadd.f32 %v1785_v52, %v1784_v3  ;;  %v1684_v27 = vsel %vm1054_vm4, %v1623_v17, 0.0  ;;  %v1726_v18 = vmul.f32 %v1623_v17, %v1623_v17  ;;  %1828 = vst.msk [vmem:[%s2680_s17 + $0xf0] sm:$0xff] %vm1054_vm4, %v1623_v17 }
 0x216   : > { %v1685_v29 = vadd.f32 %v1684_v27, %v1683_v20 }
 0x217   : > { %v1787_v37 = vsel %vm1054_vm4, %v1726_v18, 0.0 }
 0x218   : > { %v1788_v24 = vadd.f32 %v1787_v37, %v1786_v25  ;;  %v1554_v32 = vpop.f32.mrf.mxu3 }
 0x219   : > { %v1588_v39 = vadd.f32 %v1554_v32, %v1430_v31 }
 0x21b   : > { %v1624_v54 = vadd.f32 %v2670_v36, %v1588_v39 }
 0x21d   : > { %v1686_v35 = vsel %vm1054_vm4, %v1624_v54, 0.0  ;;  %v1727_v42 = vmul.f32 %v1624_v54, %v1624_v54  ;;  %1829 = vst.msk [vmem:[%s2680_s17 + $0xf8] sm:$0xff] %vm1054_vm4, %v1624_v54 }
 0x21e   : > { %v1687_v45 = vadd.f32 %v1686_v35, %v1685_v29 }
 0x21f   : > { %v1789_v33 = vsel %vm1054_vm4, %v1727_v42, 0.0 }
 0x220   : > { %v1688_v46 = vrot.slane %v1687_v45, 4  ;;  %v1790_v12 = vadd.f32 %v1789_v33, %v1788_v24 }
 0x222   : > { %v1689_v34 = vadd.f32 %v1688_v46, %v1687_v45  ;;  %v1791_v59 = vrot.slane %v1790_v12, 4 }
 0x224   : > { %v1690_v38 = vrot.slane %v1689_v34, 2  ;;  %v1792_v30 = vadd.f32 %v1791_v59, %v1790_v12 }
 0x226   : > { %v1691_v48 = vadd.f32 %v1690_v38, %v1689_v34  ;;  %v1793_v49 = vrot.slane %v1792_v30, 2 }
 0x228   : > { %v1692_v53 = vrot.slane %v1691_v48, 1  ;;  %v1794_v36 = vadd.f32 %v1793_v49, %v1792_v30 }
 0x22a   : > { %v1693_v41 = vadd.f32 %v1692_v53, %v1691_v48  ;;  %v1795_v55 = vrot.slane %v1794_v36, 1 }
 0x22c   : > { %1695 = vst.msk [vmem:[%s339_s19] sm:$0x1] %vm1694_vm6, %v1693_v41  ;;  %v1796_v1 = vadd.f32 %v1795_v55, %v1794_v36 }
 0x22e   : > { %1797 = vst.msk [vmem:[%s342_s22] sm:$0x1] %vm1694_vm6, %v1796_v1 }
 0x22f PF: > { %s19_s27 = sadd.s32 1, %s2092_s27  }
 0x230   : > { %p16_p4 = scmp.ge.s32.totalorder %s19_s27, 4  }
 0x232   :  { %18 = sbr.rel (!%p16_p4) target bundleno = 1 (0x1), region = 105 }

</bundles_post_ra>
